<compile_context>
chip_gen: v6e
topology: v6e:2x2x1
jax: 0.10.0
libtpu: 0.0.40
codegen_flags: <defaults>
</compile_context>

<pallas_src>
import functools

import jax
import jax.numpy as jnp
from jax import lax
from jax.experimental import pallas as pl
from jax.experimental.pallas import tpu as pltpu


def _round_up(x, m):
    return ((x + m - 1) // m) * m


# ---------------------------------------------------------------------------
# The single fused kernel:
#   conv1 -> ReLU -> maxpool -> conv2 -> ReLU -> maxpool -> flatten
#   -> fc1 -> ReLU -> fc2 -> ReLU -> fc3
# ---------------------------------------------------------------------------
def _net_kernel(p1t_ref, w1t_ref, b1t_ref, w2t_ref, b2t_ref,
                wf1_ref, bf1_ref, wf2_ref, bf2_ref, wf3_ref, bf3_ref,
                out_ref, xfc_ref, *, B, TB):
    f32 = jnp.float32
    M2 = B * 196                          # pooled conv1 map: (b, 14, 14) flat

    # ---- conv1: (8,128) x (128, 4*TB) -> lane-dense (8, 4*TB), bias, ReLU.
    o1 = jnp.dot(w1t_ref[...], p1t_ref[...], preferred_element_type=f32)
    o1 = jnp.maximum(o1 + b1t_ref[...], 0.0)

    # ---- maxpool 2x2/2 fused: the 4 pool taps are 4 contiguous lane blocks
    #      (the host packed conv1's pixels pool-tap-major).
    a1 = jnp.maximum(jnp.maximum(o1[:, 0:TB], o1[:, TB:2 * TB]),
                     jnp.maximum(o1[:, 2 * TB:3 * TB], o1[:, 3 * TB:4 * TB]))

    # ---- conv2 fully in-kernel: 25 shifted-slab matmuls accumulated in
    #      registers.  Valid outputs sit at lanes b*196 + u*14 + v (u, v < 10);
    #      ragged margin lanes hold junk that is never read downstream.
    acc = jnp.zeros((16, M2), f32)
    for t in range(25):
        du, dv = t // 5, t % 5
        shift = du * 14 + dv
        slab = a1[:, shift:shift + M2]                       # (8, M2)
        acc = acc + jnp.dot(w2t_ref[t], slab, preferred_element_type=f32)
    o2 = jnp.maximum(acc + b2t_ref[...], 0.0)                # (16, M2)

    # ---- maxpool 2x2/2 fused via shifted maxes: pooled value for
    #      (b, up, vp) ends up at lane b*196 + 28*up + 2*vp.
    m1 = jnp.maximum(o2[:, :M2 - 1], o2[:, 1:])              # max over v pairs
    m2 = jnp.maximum(m1[:, :M2 - 15], m1[:, 14:])            # max over u pairs

    # ---- flatten: gather the 400 pooled features per batch into xfc
    #      (rows = feature k = (up*5+vp)*16 + co, lanes = batch).  fc1's weight
    #      columns were pre-permuted to this order at pack time.
    xfc_ref[...] = jnp.zeros_like(xfc_ref)
    for b in range(B):
        for p in range(25):
            up, vp = p // 5, p % 5
            lane = b * 196 + 28 * up + 2 * vp
            xfc_ref[p * 16:(p + 1) * 16, b:b + 1] = m2[:, lane:lane + 1]

    # ---- fc1 -> ReLU -> fc2 -> ReLU -> fc3 (neurons in rows, batch in lanes)
    h = jnp.dot(wf1_ref[...], xfc_ref[...], preferred_element_type=f32)
    h = jnp.maximum(h + bf1_ref[...], 0.0)
    h = jnp.dot(wf2_ref[...], h, preferred_element_type=f32)
    h = jnp.maximum(h + bf2_ref[...], 0.0)
    h = jnp.dot(wf3_ref[...], h, preferred_element_type=f32)
    out_ref[...] = (h + bf3_ref[...]).astype(out_ref.dtype)


# ---------------------------------------------------------------------------
# Host-side glue
# ---------------------------------------------------------------------------
def _conv1_patches_t(x, TB):
    """Transposed, pool-block-reordered im2col matrix for conv1.

    Rows : k = ci*25 + di*5 + dj (75 used, zero-padded to 128).
    Lanes: (pool tap dip*2+djp)*TB + (b*196 + ip*14 + jp), where the conv1
           output pixel is (i, j) = (2*ip + dip, 2*jp + djp).
    (Kept on the host: it only touches the raw input and is ~1 MB.)
    """
    B = x.shape[0]
    x = x.astype(jnp.float32)
    cols = jnp.stack([x[:, :, di:di + 28, dj:dj + 28]
                      for di in range(5) for dj in range(5)], axis=-1)
    cols = jnp.transpose(cols, (0, 2, 3, 1, 4)).reshape(B, 28, 28, 75)
    cols = cols.reshape(B, 14, 2, 14, 2, 75)                 # (b,ip,dip,jp,djp,k)
    cols = jnp.transpose(cols, (2, 4, 0, 1, 3, 5)).reshape(4, B * 196, 75)
    cols = jnp.pad(cols, ((0, 0), (0, TB - B * 196), (0, 0)))
    p1t = jnp.transpose(cols, (2, 0, 1)).reshape(75, 4 * TB)
    return jnp.pad(p1t, ((0, 128 - 75), (0, 0)))             # (128, 4*TB)


def pack_params(params):
    """One-time weight packing (transposes/permutations/padding hoisted out
    of the per-forward path, MXU-friendly K-aligned layouts)."""
    f32 = jnp.float32

    def pad2(a, r, c):
        return jnp.pad(a.astype(f32), ((0, r - a.shape[0]), (0, c - a.shape[1])))

    w1t = pad2(params["conv1_w"].reshape(6, 75), 8, 128)          # (co, k)
    b1t = jnp.pad(params["conv1_b"].astype(f32), (0, 2)).reshape(8, 1)

    w2 = jnp.transpose(params["conv2_w"].astype(f32), (2, 3, 0, 1))
    w2t = jnp.pad(w2.reshape(25, 16, 6), ((0, 0), (0, 0), (0, 2)))  # (t, co, ci)
    b2t = params["conv2_b"].astype(f32).reshape(16, 1)

    wf1 = params["fc1_w"].astype(f32).reshape(120, 16, 25)        # (n, co, p)
    wf1 = jnp.transpose(wf1, (0, 2, 1)).reshape(120, 400)         # cols: p*16+co
    wf1 = pad2(wf1, 128, 512)
    bf1 = jnp.pad(params["fc1_b"].astype(f32), (0, 8)).reshape(128, 1)

    wf2 = pad2(params["fc2_w"].astype(f32), 128, 128)
    bf2 = jnp.pad(params["fc2_b"].astype(f32), (0, 44)).reshape(128, 1)
    wf3 = pad2(params["fc3_w"].astype(f32), 128, 128)
    bf3 = jnp.pad(params["fc3_b"].astype(f32), (0, 118)).reshape(128, 1)

    return dict(w1t=w1t, b1t=b1t, w2t=w2t, b2t=b2t,
                wf1=wf1, bf1=bf1, wf2=wf2, bf2=bf2, wf3=wf3, bf3=bf3)


def make_net_forward(B):
    """Returns forward(packed_params, x): the whole net in ONE pallas_call."""
    assert 1 <= B <= 8, "batch is packed into the 8 lanes of the fc tail"
    M2 = B * 196
    TB = _round_up(M2 + 64, 128)        # pool-block lane pitch (>= M2 + max shift)
    BL = 8                              # batch lanes in the fc tail

    call = pl.pallas_call(
        functools.partial(_net_kernel, B=B, TB=TB),
        out_shape=jax.ShapeDtypeStruct((128, BL), jnp.float32),
        in_specs=[pl.BlockSpec(memory_space=pltpu.MemorySpace.VMEM)] * 11,
        out_specs=pl.BlockSpec(memory_space=pltpu.MemorySpace.VMEM),
        scratch_shapes=[pltpu.VMEM((512, BL), jnp.float32)],
    )

    def forward(pp, x):
        p1t = _conv1_patches_t(x, TB)
        out_t = call(p1t, pp["w1t"], pp["b1t"], pp["w2t"], pp["b2t"],
                     pp["wf1"], pp["bf1"], pp["wf2"], pp["bf2"],
                     pp["wf3"], pp["bf3"])
        return out_t[:10, :B].T          # (B, 10) logits

    return forward


# ---------------------------------------------------------------------------
# Parameters (deterministic, PyTorch-style uniform init with fan_in scaling)
# ---------------------------------------------------------------------------
def init_params(key):
    ks = jax.random.split(key, 10)

    def u(k, shape, fan_in):
        bound = 1.0 / float(fan_in) ** 0.5
        return jax.random.uniform(k, shape, jnp.float32, -bound, bound)

    return {
        "conv1_w": u(ks[0], (6, 3, 5, 5), 3 * 5 * 5),
        "conv1_b": u(ks[1], (6,), 3 * 5 * 5),
        "conv2_w": u(ks[2], (16, 6, 5, 5), 6 * 5 * 5),
        "conv2_b": u(ks[3], (16,), 6 * 5 * 5),
        "fc1_w": u(ks[4], (120, 16 * 5 * 5), 16 * 5 * 5),
        "fc1_b": u(ks[5], (120,), 16 * 5 * 5),
        "fc2_w": u(ks[6], (84, 120), 120),
        "fc2_b": u(ks[7], (84,), 120),
        "fc3_w": u(ks[8], (10, 84), 84),
        "fc3_b": u(ks[9], (10,), 84),
    }


# ---------------------------------------------------------------------------
# Plain-JAX reference (matches Net.forward) for a self-check
# ---------------------------------------------------------------------------
def _reference_forward(params, x):
    dn = ("NCHW", "OIHW", "NCHW")
    hp = lax.Precision.HIGHEST

    def pool(z):
        b, c, h, w = z.shape
        return z.reshape(b, c, h // 2, 2, w // 2, 2).max(axis=(3, 5))

    out = lax.conv_general_dilated(x, params["conv1_w"], (1, 1), "VALID",
                                   dimension_numbers=dn, precision=hp)
    out = jax.nn.relu(out + params["conv1_b"][None, :, None, None])
    out = pool(out)
    out = lax.conv_general_dilated(out, params["conv2_w"], (1, 1), "VALID",
                                   dimension_numbers=dn, precision=hp)
    out = jax.nn.relu(out + params["conv2_b"][None, :, None, None])
    out = pool(out)
    out = out.reshape(out.shape[0], -1)
    out = jax.nn.relu(jnp.dot(out, params["fc1_w"].T, precision=hp) + params["fc1_b"])
    out = jax.nn.relu(jnp.dot(out, params["fc2_w"].T, precision=hp) + params["fc2_b"])
    return jnp.dot(out, params["fc3_w"].T, precision=hp) + params["fc3_b"]


if __name__ == "__main__":
    key = jax.random.PRNGKey(0)
    pkey, xkey = jax.random.split(key)
    params = init_params(pkey)
    packed = pack_params(params)          # one-time packing, outside forward

    # LeNet-on-CIFAR geometry: 32x32 RGB input; small batch of 2.
    x = jax.random.normal(xkey, (2, 3, 32, 32), dtype=jnp.float32)

    fwd = jax.jit(make_net_forward(B=2))
    logits = jax.block_until_ready(fwd(packed, x))

    assert logits.shape == (2, 10), logits.shape
    assert logits.dtype == jnp.float32

    # Cross-check the fused kernel against a plain-JAX reference forward pass.
    ref = jax.block_until_ready(jax.jit(_reference_forward)(params, x))
    assert jnp.allclose(logits, ref, rtol=2e-2, atol=2e-2), \
        float(jnp.max(jnp.abs(logits - ref)))

    print("KERNEL_OK")
</pallas_src>

<mosaic_0001>
module attributes {stable_mosaic.version = 11 : i64} {
  func.func @_net_kernel(%arg0: memref<128x2048xf32, #tpu.memory_space<vmem>>, %arg1: memref<8x128xf32, #tpu.memory_space<vmem>>, %arg2: memref<8x1xf32, #tpu.memory_space<vmem>>, %arg3: memref<25x16x8xf32, #tpu.memory_space<vmem>>, %arg4: memref<16x1xf32, #tpu.memory_space<vmem>>, %arg5: memref<128x512xf32, #tpu.memory_space<vmem>>, %arg6: memref<128x1xf32, #tpu.memory_space<vmem>>, %arg7: memref<128x128xf32, #tpu.memory_space<vmem>>, %arg8: memref<128x1xf32, #tpu.memory_space<vmem>>, %arg9: memref<128x128xf32, #tpu.memory_space<vmem>>, %arg10: memref<128x1xf32, #tpu.memory_space<vmem>>, %arg11: memref<128x8xf32, #tpu.memory_space<vmem>>, %arg12: memref<512x8xf32, #tpu.memory_space<vmem>>) attributes {dimension_semantics = [], scalar_prefetch = 0 : i64, scratch_operands = 1 : i64, tpu.core_type = #tpu.core_type<tc>} {
    %c0 = arith.constant 0 : index
    %c0_0 = arith.constant 0 : index
    %0 = vector.load %arg1[%c0, %c0_0] : memref<8x128xf32, #tpu.memory_space<vmem>>, vector<8x128xf32>
    %c0_1 = arith.constant 0 : index
    %c0_2 = arith.constant 0 : index
    %1 = vector.load %arg0[%c0_1, %c0_2] : memref<128x2048xf32, #tpu.memory_space<vmem>>, vector<128x2048xf32>
    %cst = arith.constant dense<0.000000e+00> : vector<8x2048xf32>
    %2 = tpu.matmul %0, %1, %cst {dimension_numbers = #tpu.dot_dimension_numbers<[1], [0], [0], [1], [0, 0, 1, 1], [], []>} : vector<8x128xf32>, vector<128x2048xf32>, vector<8x2048xf32> -> vector<8x2048xf32>
    %c0_3 = arith.constant 0 : index
    %c0_4 = arith.constant 0 : index
    %3 = vector.load %arg2[%c0_3, %c0_4] : memref<8x1xf32, #tpu.memory_space<vmem>>, vector<8x1xf32>
    %4 = vector.broadcast %3 : vector<8x1xf32> to vector<8x2048xf32>
    %5 = arith.addf %2, %4 : vector<8x2048xf32>
    %cst_5 = arith.constant 0.000000e+00 : f32
    %6 = vector.broadcast %cst_5 : f32 to vector<8x2048xf32>
    %7 = arith.maximumf %5, %6 : vector<8x2048xf32>
    %8 = vector.extract_strided_slice %7 {offsets = [0, 0], sizes = [8, 512], strides = [1, 1]} : vector<8x2048xf32> to vector<8x512xf32>
    %9 = vector.extract_strided_slice %7 {offsets = [0, 512], sizes = [8, 512], strides = [1, 1]} : vector<8x2048xf32> to vector<8x512xf32>
    %10 = arith.maximumf %8, %9 : vector<8x512xf32>
    %11 = vector.extract_strided_slice %7 {offsets = [0, 1024], sizes = [8, 512], strides = [1, 1]} : vector<8x2048xf32> to vector<8x512xf32>
    %12 = vector.extract_strided_slice %7 {offsets = [0, 1536], sizes = [8, 512], strides = [1, 1]} : vector<8x2048xf32> to vector<8x512xf32>
    %13 = arith.maximumf %11, %12 : vector<8x512xf32>
    %14 = arith.maximumf %10, %13 : vector<8x512xf32>
    %cst_6 = arith.constant 0.000000e+00 : f32
    %15 = vector.broadcast %cst_6 : f32 to vector<16x392xf32>
    %16 = vector.extract_strided_slice %14 {offsets = [0, 0], sizes = [8, 392], strides = [1, 1]} : vector<8x512xf32> to vector<8x392xf32>
    %c0_7 = arith.constant 0 : index
    %c0_8 = arith.constant 0 : index
    %c0_9 = arith.constant 0 : index
    %17 = vector.load %arg3[%c0_7, %c0_8, %c0_9] : memref<25x16x8xf32, #tpu.memory_space<vmem>>, vector<1x16x8xf32>
    %18 = vector.shape_cast %17 : vector<1x16x8xf32> to vector<16x8xf32>
    %cst_10 = arith.constant dense<0.000000e+00> : vector<16x392xf32>
    %19 = tpu.matmul %18, %16, %cst_10 {dimension_numbers = #tpu.dot_dimension_numbers<[1], [0], [0], [1], [0, 0, 1, 1], [], []>} : vector<16x8xf32>, vector<8x392xf32>, vector<16x392xf32> -> vector<16x392xf32>
    %20 = arith.addf %15, %19 : vector<16x392xf32>
    %21 = vector.extract_strided_slice %14 {offsets = [0, 1], sizes = [8, 392], strides = [1, 1]} : vector<8x512xf32> to vector<8x392xf32>
    %c1 = arith.constant 1 : index
    %c0_11 = arith.constant 0 : index
    %c0_12 = arith.constant 0 : index
    %22 = vector.load %arg3[%c1, %c0_11, %c0_12] : memref<25x16x8xf32, #tpu.memory_space<vmem>>, vector<1x16x8xf32>
    %23 = vector.shape_cast %22 : vector<1x16x8xf32> to vector<16x8xf32>
    %cst_13 = arith.constant dense<0.000000e+00> : vector<16x392xf32>
    %24 = tpu.matmul %23, %21, %cst_13 {dimension_numbers = #tpu.dot_dimension_numbers<[1], [0], [0], [1], [0, 0, 1, 1], [], []>} : vector<16x8xf32>, vector<8x392xf32>, vector<16x392xf32> -> vector<16x392xf32>
    %25 = arith.addf %20, %24 : vector<16x392xf32>
    %26 = vector.extract_strided_slice %14 {offsets = [0, 2], sizes = [8, 392], strides = [1, 1]} : vector<8x512xf32> to vector<8x392xf32>
    %c2 = arith.constant 2 : index
    %c0_14 = arith.constant 0 : index
    %c0_15 = arith.constant 0 : index
    %27 = vector.load %arg3[%c2, %c0_14, %c0_15] : memref<25x16x8xf32, #tpu.memory_space<vmem>>, vector<1x16x8xf32>
    %28 = vector.shape_cast %27 : vector<1x16x8xf32> to vector<16x8xf32>
    %cst_16 = arith.constant dense<0.000000e+00> : vector<16x392xf32>
    %29 = tpu.matmul %28, %26, %cst_16 {dimension_numbers = #tpu.dot_dimension_numbers<[1], [0], [0], [1], [0, 0, 1, 1], [], []>} : vector<16x8xf32>, vector<8x392xf32>, vector<16x392xf32> -> vector<16x392xf32>
    %30 = arith.addf %25, %29 : vector<16x392xf32>
    %31 = vector.extract_strided_slice %14 {offsets = [0, 3], sizes = [8, 392], strides = [1, 1]} : vector<8x512xf32> to vector<8x392xf32>
    %c3 = arith.constant 3 : index
    %c0_17 = arith.constant 0 : index
    %c0_18 = arith.constant 0 : index
    %32 = vector.load %arg3[%c3, %c0_17, %c0_18] : memref<25x16x8xf32, #tpu.memory_space<vmem>>, vector<1x16x8xf32>
    %33 = vector.shape_cast %32 : vector<1x16x8xf32> to vector<16x8xf32>
    %cst_19 = arith.constant dense<0.000000e+00> : vector<16x392xf32>
    %34 = tpu.matmul %33, %31, %cst_19 {dimension_numbers = #tpu.dot_dimension_numbers<[1], [0], [0], [1], [0, 0, 1, 1], [], []>} : vector<16x8xf32>, vector<8x392xf32>, vector<16x392xf32> -> vector<16x392xf32>
    %35 = arith.addf %30, %34 : vector<16x392xf32>
    %36 = vector.extract_strided_slice %14 {offsets = [0, 4], sizes = [8, 392], strides = [1, 1]} : vector<8x512xf32> to vector<8x392xf32>
    %c4 = arith.constant 4 : index
    %c0_20 = arith.constant 0 : index
    %c0_21 = arith.constant 0 : index
    %37 = vector.load %arg3[%c4, %c0_20, %c0_21] : memref<25x16x8xf32, #tpu.memory_space<vmem>>, vector<1x16x8xf32>
    %38 = vector.shape_cast %37 : vector<1x16x8xf32> to vector<16x8xf32>
    %cst_22 = arith.constant dense<0.000000e+00> : vector<16x392xf32>
    %39 = tpu.matmul %38, %36, %cst_22 {dimension_numbers = #tpu.dot_dimension_numbers<[1], [0], [0], [1], [0, 0, 1, 1], [], []>} : vector<16x8xf32>, vector<8x392xf32>, vector<16x392xf32> -> vector<16x392xf32>
    %40 = arith.addf %35, %39 : vector<16x392xf32>
    %41 = vector.extract_strided_slice %14 {offsets = [0, 14], sizes = [8, 392], strides = [1, 1]} : vector<8x512xf32> to vector<8x392xf32>
    %c5 = arith.constant 5 : index
    %c0_23 = arith.constant 0 : index
    %c0_24 = arith.constant 0 : index
    %42 = vector.load %arg3[%c5, %c0_23, %c0_24] : memref<25x16x8xf32, #tpu.memory_space<vmem>>, vector<1x16x8xf32>
    %43 = vector.shape_cast %42 : vector<1x16x8xf32> to vector<16x8xf32>
    %cst_25 = arith.constant dense<0.000000e+00> : vector<16x392xf32>
    %44 = tpu.matmul %43, %41, %cst_25 {dimension_numbers = #tpu.dot_dimension_numbers<[1], [0], [0], [1], [0, 0, 1, 1], [], []>} : vector<16x8xf32>, vector<8x392xf32>, vector<16x392xf32> -> vector<16x392xf32>
    %45 = arith.addf %40, %44 : vector<16x392xf32>
    %46 = vector.extract_strided_slice %14 {offsets = [0, 15], sizes = [8, 392], strides = [1, 1]} : vector<8x512xf32> to vector<8x392xf32>
    %c6 = arith.constant 6 : index
    %c0_26 = arith.constant 0 : index
    %c0_27 = arith.constant 0 : index
    %47 = vector.load %arg3[%c6, %c0_26, %c0_27] : memref<25x16x8xf32, #tpu.memory_space<vmem>>, vector<1x16x8xf32>
    %48 = vector.shape_cast %47 : vector<1x16x8xf32> to vector<16x8xf32>
    %cst_28 = arith.constant dense<0.000000e+00> : vector<16x392xf32>
    %49 = tpu.matmul %48, %46, %cst_28 {dimension_numbers = #tpu.dot_dimension_numbers<[1], [0], [0], [1], [0, 0, 1, 1], [], []>} : vector<16x8xf32>, vector<8x392xf32>, vector<16x392xf32> -> vector<16x392xf32>
    %50 = arith.addf %45, %49 : vector<16x392xf32>
    %51 = vector.extract_strided_slice %14 {offsets = [0, 16], sizes = [8, 392], strides = [1, 1]} : vector<8x512xf32> to vector<8x392xf32>
    %c7 = arith.constant 7 : index
    %c0_29 = arith.constant 0 : index
    %c0_30 = arith.constant 0 : index
    %52 = vector.load %arg3[%c7, %c0_29, %c0_30] : memref<25x16x8xf32, #tpu.memory_space<vmem>>, vector<1x16x8xf32>
    %53 = vector.shape_cast %52 : vector<1x16x8xf32> to vector<16x8xf32>
    %cst_31 = arith.constant dense<0.000000e+00> : vector<16x392xf32>
    %54 = tpu.matmul %53, %51, %cst_31 {dimension_numbers = #tpu.dot_dimension_numbers<[1], [0], [0], [1], [0, 0, 1, 1], [], []>} : vector<16x8xf32>, vector<8x392xf32>, vector<16x392xf32> -> vector<16x392xf32>
    %55 = arith.addf %50, %54 : vector<16x392xf32>
    %56 = vector.extract_strided_slice %14 {offsets = [0, 17], sizes = [8, 392], strides = [1, 1]} : vector<8x512xf32> to vector<8x392xf32>
    %c8 = arith.constant 8 : index
    %c0_32 = arith.constant 0 : index
    %c0_33 = arith.constant 0 : index
    %57 = vector.load %arg3[%c8, %c0_32, %c0_33] : memref<25x16x8xf32, #tpu.memory_space<vmem>>, vector<1x16x8xf32>
    %58 = vector.shape_cast %57 : vector<1x16x8xf32> to vector<16x8xf32>
    %cst_34 = arith.constant dense<0.000000e+00> : vector<16x392xf32>
    %59 = tpu.matmul %58, %56, %cst_34 {dimension_numbers = #tpu.dot_dimension_numbers<[1], [0], [0], [1], [0, 0, 1, 1], [], []>} : vector<16x8xf32>, vector<8x392xf32>, vector<16x392xf32> -> vector<16x392xf32>
    %60 = arith.addf %55, %59 : vector<16x392xf32>
    %61 = vector.extract_strided_slice %14 {offsets = [0, 18], sizes = [8, 392], strides = [1, 1]} : vector<8x512xf32> to vector<8x392xf32>
    %c9 = arith.constant 9 : index
    %c0_35 = arith.constant 0 : index
    %c0_36 = arith.constant 0 : index
    %62 = vector.load %arg3[%c9, %c0_35, %c0_36] : memref<25x16x8xf32, #tpu.memory_space<vmem>>, vector<1x16x8xf32>
    %63 = vector.shape_cast %62 : vector<1x16x8xf32> to vector<16x8xf32>
    %cst_37 = arith.constant dense<0.000000e+00> : vector<16x392xf32>
    %64 = tpu.matmul %63, %61, %cst_37 {dimension_numbers = #tpu.dot_dimension_numbers<[1], [0], [0], [1], [0, 0, 1, 1], [], []>} : vector<16x8xf32>, vector<8x392xf32>, vector<16x392xf32> -> vector<16x392xf32>
    %65 = arith.addf %60, %64 : vector<16x392xf32>
    %66 = vector.extract_strided_slice %14 {offsets = [0, 28], sizes = [8, 392], strides = [1, 1]} : vector<8x512xf32> to vector<8x392xf32>
    %c10 = arith.constant 10 : index
    %c0_38 = arith.constant 0 : index
    %c0_39 = arith.constant 0 : index
    %67 = vector.load %arg3[%c10, %c0_38, %c0_39] : memref<25x16x8xf32, #tpu.memory_space<vmem>>, vector<1x16x8xf32>
    %68 = vector.shape_cast %67 : vector<1x16x8xf32> to vector<16x8xf32>
    %cst_40 = arith.constant dense<0.000000e+00> : vector<16x392xf32>
    %69 = tpu.matmul %68, %66, %cst_40 {dimension_numbers = #tpu.dot_dimension_numbers<[1], [0], [0], [1], [0, 0, 1, 1], [], []>} : vector<16x8xf32>, vector<8x392xf32>, vector<16x392xf32> -> vector<16x392xf32>
    %70 = arith.addf %65, %69 : vector<16x392xf32>
    %71 = vector.extract_strided_slice %14 {offsets = [0, 29], sizes = [8, 392], strides = [1, 1]} : vector<8x512xf32> to vector<8x392xf32>
    %c11 = arith.constant 11 : index
    %c0_41 = arith.constant 0 : index
    %c0_42 = arith.constant 0 : index
    %72 = vector.load %arg3[%c11, %c0_41, %c0_42] : memref<25x16x8xf32, #tpu.memory_space<vmem>>, vector<1x16x8xf32>
    %73 = vector.shape_cast %72 : vector<1x16x8xf32> to vector<16x8xf32>
    %cst_43 = arith.constant dense<0.000000e+00> : vector<16x392xf32>
    %74 = tpu.matmul %73, %71, %cst_43 {dimension_numbers = #tpu.dot_dimension_numbers<[1], [0], [0], [1], [0, 0, 1, 1], [], []>} : vector<16x8xf32>, vector<8x392xf32>, vector<16x392xf32> -> vector<16x392xf32>
    %75 = arith.addf %70, %74 : vector<16x392xf32>
    %76 = vector.extract_strided_slice %14 {offsets = [0, 30], sizes = [8, 392], strides = [1, 1]} : vector<8x512xf32> to vector<8x392xf32>
    %c12 = arith.constant 12 : index
    %c0_44 = arith.constant 0 : index
    %c0_45 = arith.constant 0 : index
    %77 = vector.load %arg3[%c12, %c0_44, %c0_45] : memref<25x16x8xf32, #tpu.memory_space<vmem>>, vector<1x16x8xf32>
    %78 = vector.shape_cast %77 : vector<1x16x8xf32> to vector<16x8xf32>
    %cst_46 = arith.constant dense<0.000000e+00> : vector<16x392xf32>
    %79 = tpu.matmul %78, %76, %cst_46 {dimension_numbers = #tpu.dot_dimension_numbers<[1], [0], [0], [1], [0, 0, 1, 1], [], []>} : vector<16x8xf32>, vector<8x392xf32>, vector<16x392xf32> -> vector<16x392xf32>
    %80 = arith.addf %75, %79 : vector<16x392xf32>
    %81 = vector.extract_strided_slice %14 {offsets = [0, 31], sizes = [8, 392], strides = [1, 1]} : vector<8x512xf32> to vector<8x392xf32>
    %c13 = arith.constant 13 : index
    %c0_47 = arith.constant 0 : index
    %c0_48 = arith.constant 0 : index
    %82 = vector.load %arg3[%c13, %c0_47, %c0_48] : memref<25x16x8xf32, #tpu.memory_space<vmem>>, vector<1x16x8xf32>
    %83 = vector.shape_cast %82 : vector<1x16x8xf32> to vector<16x8xf32>
    %cst_49 = arith.constant dense<0.000000e+00> : vector<16x392xf32>
    %84 = tpu.matmul %83, %81, %cst_49 {dimension_numbers = #tpu.dot_dimension_numbers<[1], [0], [0], [1], [0, 0, 1, 1], [], []>} : vector<16x8xf32>, vector<8x392xf32>, vector<16x392xf32> -> vector<16x392xf32>
    %85 = arith.addf %80, %84 : vector<16x392xf32>
    %86 = vector.extract_strided_slice %14 {offsets = [0, 32], sizes = [8, 392], strides = [1, 1]} : vector<8x512xf32> to vector<8x392xf32>
    %c14 = arith.constant 14 : index
    %c0_50 = arith.constant 0 : index
    %c0_51 = arith.constant 0 : index
    %87 = vector.load %arg3[%c14, %c0_50, %c0_51] : memref<25x16x8xf32, #tpu.memory_space<vmem>>, vector<1x16x8xf32>
    %88 = vector.shape_cast %87 : vector<1x16x8xf32> to vector<16x8xf32>
    %cst_52 = arith.constant dense<0.000000e+00> : vector<16x392xf32>
    %89 = tpu.matmul %88, %86, %cst_52 {dimension_numbers = #tpu.dot_dimension_numbers<[1], [0], [0], [1], [0, 0, 1, 1], [], []>} : vector<16x8xf32>, vector<8x392xf32>, vector<16x392xf32> -> vector<16x392xf32>
    %90 = arith.addf %85, %89 : vector<16x392xf32>
    %91 = vector.extract_strided_slice %14 {offsets = [0, 42], sizes = [8, 392], strides = [1, 1]} : vector<8x512xf32> to vector<8x392xf32>
    %c15 = arith.constant 15 : index
    %c0_53 = arith.constant 0 : index
    %c0_54 = arith.constant 0 : index
    %92 = vector.load %arg3[%c15, %c0_53, %c0_54] : memref<25x16x8xf32, #tpu.memory_space<vmem>>, vector<1x16x8xf32>
    %93 = vector.shape_cast %92 : vector<1x16x8xf32> to vector<16x8xf32>
    %cst_55 = arith.constant dense<0.000000e+00> : vector<16x392xf32>
    %94 = tpu.matmul %93, %91, %cst_55 {dimension_numbers = #tpu.dot_dimension_numbers<[1], [0], [0], [1], [0, 0, 1, 1], [], []>} : vector<16x8xf32>, vector<8x392xf32>, vector<16x392xf32> -> vector<16x392xf32>
    %95 = arith.addf %90, %94 : vector<16x392xf32>
    %96 = vector.extract_strided_slice %14 {offsets = [0, 43], sizes = [8, 392], strides = [1, 1]} : vector<8x512xf32> to vector<8x392xf32>
    %c16 = arith.constant 16 : index
    %c0_56 = arith.constant 0 : index
    %c0_57 = arith.constant 0 : index
    %97 = vector.load %arg3[%c16, %c0_56, %c0_57] : memref<25x16x8xf32, #tpu.memory_space<vmem>>, vector<1x16x8xf32>
    %98 = vector.shape_cast %97 : vector<1x16x8xf32> to vector<16x8xf32>
    %cst_58 = arith.constant dense<0.000000e+00> : vector<16x392xf32>
    %99 = tpu.matmul %98, %96, %cst_58 {dimension_numbers = #tpu.dot_dimension_numbers<[1], [0], [0], [1], [0, 0, 1, 1], [], []>} : vector<16x8xf32>, vector<8x392xf32>, vector<16x392xf32> -> vector<16x392xf32>
    %100 = arith.addf %95, %99 : vector<16x392xf32>
    %101 = vector.extract_strided_slice %14 {offsets = [0, 44], sizes = [8, 392], strides = [1, 1]} : vector<8x512xf32> to vector<8x392xf32>
    %c17 = arith.constant 17 : index
    %c0_59 = arith.constant 0 : index
    %c0_60 = arith.constant 0 : index
    %102 = vector.load %arg3[%c17, %c0_59, %c0_60] : memref<25x16x8xf32, #tpu.memory_space<vmem>>, vector<1x16x8xf32>
    %103 = vector.shape_cast %102 : vector<1x16x8xf32> to vector<16x8xf32>
    %cst_61 = arith.constant dense<0.000000e+00> : vector<16x392xf32>
    %104 = tpu.matmul %103, %101, %cst_61 {dimension_numbers = #tpu.dot_dimension_numbers<[1], [0], [0], [1], [0, 0, 1, 1], [], []>} : vector<16x8xf32>, vector<8x392xf32>, vector<16x392xf32> -> vector<16x392xf32>
    %105 = arith.addf %100, %104 : vector<16x392xf32>
    %106 = vector.extract_strided_slice %14 {offsets = [0, 45], sizes = [8, 392], strides = [1, 1]} : vector<8x512xf32> to vector<8x392xf32>
    %c18 = arith.constant 18 : index
    %c0_62 = arith.constant 0 : index
    %c0_63 = arith.constant 0 : index
    %107 = vector.load %arg3[%c18, %c0_62, %c0_63] : memref<25x16x8xf32, #tpu.memory_space<vmem>>, vector<1x16x8xf32>
    %108 = vector.shape_cast %107 : vector<1x16x8xf32> to vector<16x8xf32>
    %cst_64 = arith.constant dense<0.000000e+00> : vector<16x392xf32>
    %109 = tpu.matmul %108, %106, %cst_64 {dimension_numbers = #tpu.dot_dimension_numbers<[1], [0], [0], [1], [0, 0, 1, 1], [], []>} : vector<16x8xf32>, vector<8x392xf32>, vector<16x392xf32> -> vector<16x392xf32>
    %110 = arith.addf %105, %109 : vector<16x392xf32>
    %111 = vector.extract_strided_slice %14 {offsets = [0, 46], sizes = [8, 392], strides = [1, 1]} : vector<8x512xf32> to vector<8x392xf32>
    %c19 = arith.constant 19 : index
    %c0_65 = arith.constant 0 : index
    %c0_66 = arith.constant 0 : index
    %112 = vector.load %arg3[%c19, %c0_65, %c0_66] : memref<25x16x8xf32, #tpu.memory_space<vmem>>, vector<1x16x8xf32>
    %113 = vector.shape_cast %112 : vector<1x16x8xf32> to vector<16x8xf32>
    %cst_67 = arith.constant dense<0.000000e+00> : vector<16x392xf32>
    %114 = tpu.matmul %113, %111, %cst_67 {dimension_numbers = #tpu.dot_dimension_numbers<[1], [0], [0], [1], [0, 0, 1, 1], [], []>} : vector<16x8xf32>, vector<8x392xf32>, vector<16x392xf32> -> vector<16x392xf32>
    %115 = arith.addf %110, %114 : vector<16x392xf32>
    %116 = vector.extract_strided_slice %14 {offsets = [0, 56], sizes = [8, 392], strides = [1, 1]} : vector<8x512xf32> to vector<8x392xf32>
    %c20 = arith.constant 20 : index
    %c0_68 = arith.constant 0 : index
    %c0_69 = arith.constant 0 : index
    %117 = vector.load %arg3[%c20, %c0_68, %c0_69] : memref<25x16x8xf32, #tpu.memory_space<vmem>>, vector<1x16x8xf32>
    %118 = vector.shape_cast %117 : vector<1x16x8xf32> to vector<16x8xf32>
    %cst_70 = arith.constant dense<0.000000e+00> : vector<16x392xf32>
    %119 = tpu.matmul %118, %116, %cst_70 {dimension_numbers = #tpu.dot_dimension_numbers<[1], [0], [0], [1], [0, 0, 1, 1], [], []>} : vector<16x8xf32>, vector<8x392xf32>, vector<16x392xf32> -> vector<16x392xf32>
    %120 = arith.addf %115, %119 : vector<16x392xf32>
    %121 = vector.extract_strided_slice %14 {offsets = [0, 57], sizes = [8, 392], strides = [1, 1]} : vector<8x512xf32> to vector<8x392xf32>
    %c21 = arith.constant 21 : index
    %c0_71 = arith.constant 0 : index
    %c0_72 = arith.constant 0 : index
    %122 = vector.load %arg3[%c21, %c0_71, %c0_72] : memref<25x16x8xf32, #tpu.memory_space<vmem>>, vector<1x16x8xf32>
    %123 = vector.shape_cast %122 : vector<1x16x8xf32> to vector<16x8xf32>
    %cst_73 = arith.constant dense<0.000000e+00> : vector<16x392xf32>
    %124 = tpu.matmul %123, %121, %cst_73 {dimension_numbers = #tpu.dot_dimension_numbers<[1], [0], [0], [1], [0, 0, 1, 1], [], []>} : vector<16x8xf32>, vector<8x392xf32>, vector<16x392xf32> -> vector<16x392xf32>
    %125 = arith.addf %120, %124 : vector<16x392xf32>
    %126 = vector.extract_strided_slice %14 {offsets = [0, 58], sizes = [8, 392], strides = [1, 1]} : vector<8x512xf32> to vector<8x392xf32>
    %c22 = arith.constant 22 : index
    %c0_74 = arith.constant 0 : index
    %c0_75 = arith.constant 0 : index
    %127 = vector.load %arg3[%c22, %c0_74, %c0_75] : memref<25x16x8xf32, #tpu.memory_space<vmem>>, vector<1x16x8xf32>
    %128 = vector.shape_cast %127 : vector<1x16x8xf32> to vector<16x8xf32>
    %cst_76 = arith.constant dense<0.000000e+00> : vector<16x392xf32>
    %129 = tpu.matmul %128, %126, %cst_76 {dimension_numbers = #tpu.dot_dimension_numbers<[1], [0], [0], [1], [0, 0, 1, 1], [], []>} : vector<16x8xf32>, vector<8x392xf32>, vector<16x392xf32> -> vector<16x392xf32>
    %130 = arith.addf %125, %129 : vector<16x392xf32>
    %131 = vector.extract_strided_slice %14 {offsets = [0, 59], sizes = [8, 392], strides = [1, 1]} : vector<8x512xf32> to vector<8x392xf32>
    %c23 = arith.constant 23 : index
    %c0_77 = arith.constant 0 : index
    %c0_78 = arith.constant 0 : index
    %132 = vector.load %arg3[%c23, %c0_77, %c0_78] : memref<25x16x8xf32, #tpu.memory_space<vmem>>, vector<1x16x8xf32>
    %133 = vector.shape_cast %132 : vector<1x16x8xf32> to vector<16x8xf32>
    %cst_79 = arith.constant dense<0.000000e+00> : vector<16x392xf32>
    %134 = tpu.matmul %133, %131, %cst_79 {dimension_numbers = #tpu.dot_dimension_numbers<[1], [0], [0], [1], [0, 0, 1, 1], [], []>} : vector<16x8xf32>, vector<8x392xf32>, vector<16x392xf32> -> vector<16x392xf32>
    %135 = arith.addf %130, %134 : vector<16x392xf32>
    %136 = vector.extract_strided_slice %14 {offsets = [0, 60], sizes = [8, 392], strides = [1, 1]} : vector<8x512xf32> to vector<8x392xf32>
    %c24 = arith.constant 24 : index
    %c0_80 = arith.constant 0 : index
    %c0_81 = arith.constant 0 : index
    %137 = vector.load %arg3[%c24, %c0_80, %c0_81] : memref<25x16x8xf32, #tpu.memory_space<vmem>>, vector<1x16x8xf32>
    %138 = vector.shape_cast %137 : vector<1x16x8xf32> to vector<16x8xf32>
    %cst_82 = arith.constant dense<0.000000e+00> : vector<16x392xf32>
    %139 = tpu.matmul %138, %136, %cst_82 {dimension_numbers = #tpu.dot_dimension_numbers<[1], [0], [0], [1], [0, 0, 1, 1], [], []>} : vector<16x8xf32>, vector<8x392xf32>, vector<16x392xf32> -> vector<16x392xf32>
    %140 = arith.addf %135, %139 : vector<16x392xf32>
    %c0_83 = arith.constant 0 : index
    %c0_84 = arith.constant 0 : index
    %141 = vector.load %arg4[%c0_83, %c0_84] : memref<16x1xf32, #tpu.memory_space<vmem>>, vector<16x1xf32>
    %142 = vector.broadcast %141 : vector<16x1xf32> to vector<16x392xf32>
    %143 = arith.addf %140, %142 : vector<16x392xf32>
    %cst_85 = arith.constant 0.000000e+00 : f32
    %144 = vector.broadcast %cst_85 : f32 to vector<16x392xf32>
    %145 = arith.maximumf %143, %144 : vector<16x392xf32>
    %146 = vector.extract_strided_slice %145 {offsets = [0, 0], sizes = [16, 391], strides = [1, 1]} : vector<16x392xf32> to vector<16x391xf32>
    %147 = vector.extract_strided_slice %145 {offsets = [0, 1], sizes = [16, 391], strides = [1, 1]} : vector<16x392xf32> to vector<16x391xf32>
    %148 = arith.maximumf %146, %147 : vector<16x391xf32>
    %149 = vector.extract_strided_slice %148 {offsets = [0, 0], sizes = [16, 377], strides = [1, 1]} : vector<16x391xf32> to vector<16x377xf32>
    %150 = vector.extract_strided_slice %148 {offsets = [0, 14], sizes = [16, 377], strides = [1, 1]} : vector<16x391xf32> to vector<16x377xf32>
    %151 = arith.maximumf %149, %150 : vector<16x377xf32>
    %cst_86 = arith.constant 0.000000e+00 : f32
    %152 = vector.broadcast %cst_86 : f32 to vector<512x8xf32>
    %c0_87 = arith.constant 0 : index
    %c0_88 = arith.constant 0 : index
    %153 = vector.load %arg12[%c0_87, %c0_88] : memref<512x8xf32, #tpu.memory_space<vmem>>, vector<512x8xf32>
    tpu.vector_store %arg12[%c0_87, %c0_88], %152 {strides = array<i32>} : memref<512x8xf32, #tpu.memory_space<vmem>>, vector<512x8xf32>,
    %154 = vector.extract_strided_slice %151 {offsets = [0, 0], sizes = [16, 1], strides = [1, 1]} : vector<16x377xf32> to vector<16x1xf32>
    %c0_89 = arith.constant 0 : index
    %c0_90 = arith.constant 0 : index
    %155 = vector.load %arg12[%c0_89, %c0_90] : memref<512x8xf32, #tpu.memory_space<vmem>>, vector<16x1xf32>
    tpu.vector_store %arg12[%c0_89, %c0_90], %154 {strides = array<i32>} : memref<512x8xf32, #tpu.memory_space<vmem>>, vector<16x1xf32>,
    %156 = vector.extract_strided_slice %151 {offsets = [0, 2], sizes = [16, 1], strides = [1, 1]} : vector<16x377xf32> to vector<16x1xf32>
    %c16_91 = arith.constant 16 : index
    %c0_92 = arith.constant 0 : index
    %157 = vector.load %arg12[%c16_91, %c0_92] : memref<512x8xf32, #tpu.memory_space<vmem>>, vector<16x1xf32>
    tpu.vector_store %arg12[%c16_91, %c0_92], %156 {strides = array<i32>} : memref<512x8xf32, #tpu.memory_space<vmem>>, vector<16x1xf32>,
    %158 = vector.extract_strided_slice %151 {offsets = [0, 4], sizes = [16, 1], strides = [1, 1]} : vector<16x377xf32> to vector<16x1xf32>
    %c32 = arith.constant 32 : index
    %c0_93 = arith.constant 0 : index
    %159 = vector.load %arg12[%c32, %c0_93] : memref<512x8xf32, #tpu.memory_space<vmem>>, vector<16x1xf32>
    tpu.vector_store %arg12[%c32, %c0_93], %158 {strides = array<i32>} : memref<512x8xf32, #tpu.memory_space<vmem>>, vector<16x1xf32>,
    %160 = vector.extract_strided_slice %151 {offsets = [0, 6], sizes = [16, 1], strides = [1, 1]} : vector<16x377xf32> to vector<16x1xf32>
    %c48 = arith.constant 48 : index
    %c0_94 = arith.constant 0 : index
    %161 = vector.load %arg12[%c48, %c0_94] : memref<512x8xf32, #tpu.memory_space<vmem>>, vector<16x1xf32>
    tpu.vector_store %arg12[%c48, %c0_94], %160 {strides = array<i32>} : memref<512x8xf32, #tpu.memory_space<vmem>>, vector<16x1xf32>,
    %162 = vector.extract_strided_slice %151 {offsets = [0, 8], sizes = [16, 1], strides = [1, 1]} : vector<16x377xf32> to vector<16x1xf32>
    %c64 = arith.constant 64 : index
    %c0_95 = arith.constant 0 : index
    %163 = vector.load %arg12[%c64, %c0_95] : memref<512x8xf32, #tpu.memory_space<vmem>>, vector<16x1xf32>
    tpu.vector_store %arg12[%c64, %c0_95], %162 {strides = array<i32>} : memref<512x8xf32, #tpu.memory_space<vmem>>, vector<16x1xf32>,
    %164 = vector.extract_strided_slice %151 {offsets = [0, 28], sizes = [16, 1], strides = [1, 1]} : vector<16x377xf32> to vector<16x1xf32>
    %c80 = arith.constant 80 : index
    %c0_96 = arith.constant 0 : index
    %165 = vector.load %arg12[%c80, %c0_96] : memref<512x8xf32, #tpu.memory_space<vmem>>, vector<16x1xf32>
    tpu.vector_store %arg12[%c80, %c0_96], %164 {strides = array<i32>} : memref<512x8xf32, #tpu.memory_space<vmem>>, vector<16x1xf32>,
    %166 = vector.extract_strided_slice %151 {offsets = [0, 30], sizes = [16, 1], strides = [1, 1]} : vector<16x377xf32> to vector<16x1xf32>
    %c96 = arith.constant 96 : index
    %c0_97 = arith.constant 0 : index
    %167 = vector.load %arg12[%c96, %c0_97] : memref<512x8xf32, #tpu.memory_space<vmem>>, vector<16x1xf32>
    tpu.vector_store %arg12[%c96, %c0_97], %166 {strides = array<i32>} : memref<512x8xf32, #tpu.memory_space<vmem>>, vector<16x1xf32>,
    %168 = vector.extract_strided_slice %151 {offsets = [0, 32], sizes = [16, 1], strides = [1, 1]} : vector<16x377xf32> to vector<16x1xf32>
    %c112 = arith.constant 112 : index
    %c0_98 = arith.constant 0 : index
    %169 = vector.load %arg12[%c112, %c0_98] : memref<512x8xf32, #tpu.memory_space<vmem>>, vector<16x1xf32>
    tpu.vector_store %arg12[%c112, %c0_98], %168 {strides = array<i32>} : memref<512x8xf32, #tpu.memory_space<vmem>>, vector<16x1xf32>,
    %170 = vector.extract_strided_slice %151 {offsets = [0, 34], sizes = [16, 1], strides = [1, 1]} : vector<16x377xf32> to vector<16x1xf32>
    %c128 = arith.constant 128 : index
    %c0_99 = arith.constant 0 : index
    %171 = vector.load %arg12[%c128, %c0_99] : memref<512x8xf32, #tpu.memory_space<vmem>>, vector<16x1xf32>
    tpu.vector_store %arg12[%c128, %c0_99], %170 {strides = array<i32>} : memref<512x8xf32, #tpu.memory_space<vmem>>, vector<16x1xf32>,
    %172 = vector.extract_strided_slice %151 {offsets = [0, 36], sizes = [16, 1], strides = [1, 1]} : vector<16x377xf32> to vector<16x1xf32>
    %c144 = arith.constant 144 : index
    %c0_100 = arith.constant 0 : index
    %173 = vector.load %arg12[%c144, %c0_100] : memref<512x8xf32, #tpu.memory_space<vmem>>, vector<16x1xf32>
    tpu.vector_store %arg12[%c144, %c0_100], %172 {strides = array<i32>} : memref<512x8xf32, #tpu.memory_space<vmem>>, vector<16x1xf32>,
    %174 = vector.extract_strided_slice %151 {offsets = [0, 56], sizes = [16, 1], strides = [1, 1]} : vector<16x377xf32> to vector<16x1xf32>
    %c160 = arith.constant 160 : index
    %c0_101 = arith.constant 0 : index
    %175 = vector.load %arg12[%c160, %c0_101] : memref<512x8xf32, #tpu.memory_space<vmem>>, vector<16x1xf32>
    tpu.vector_store %arg12[%c160, %c0_101], %174 {strides = array<i32>} : memref<512x8xf32, #tpu.memory_space<vmem>>, vector<16x1xf32>,
    %176 = vector.extract_strided_slice %151 {offsets = [0, 58], sizes = [16, 1], strides = [1, 1]} : vector<16x377xf32> to vector<16x1xf32>
    %c176 = arith.constant 176 : index
    %c0_102 = arith.constant 0 : index
    %177 = vector.load %arg12[%c176, %c0_102] : memref<512x8xf32, #tpu.memory_space<vmem>>, vector<16x1xf32>
    tpu.vector_store %arg12[%c176, %c0_102], %176 {strides = array<i32>} : memref<512x8xf32, #tpu.memory_space<vmem>>, vector<16x1xf32>,
    %178 = vector.extract_strided_slice %151 {offsets = [0, 60], sizes = [16, 1], strides = [1, 1]} : vector<16x377xf32> to vector<16x1xf32>
    %c192 = arith.constant 192 : index
    %c0_103 = arith.constant 0 : index
    %179 = vector.load %arg12[%c192, %c0_103] : memref<512x8xf32, #tpu.memory_space<vmem>>, vector<16x1xf32>
    tpu.vector_store %arg12[%c192, %c0_103], %178 {strides = array<i32>} : memref<512x8xf32, #tpu.memory_space<vmem>>, vector<16x1xf32>,
    %180 = vector.extract_strided_slice %151 {offsets = [0, 62], sizes = [16, 1], strides = [1, 1]} : vector<16x377xf32> to vector<16x1xf32>
    %c208 = arith.constant 208 : index
    %c0_104 = arith.constant 0 : index
    %181 = vector.load %arg12[%c208, %c0_104] : memref<512x8xf32, #tpu.memory_space<vmem>>, vector<16x1xf32>
    tpu.vector_store %arg12[%c208, %c0_104], %180 {strides = array<i32>} : memref<512x8xf32, #tpu.memory_space<vmem>>, vector<16x1xf32>,
    %182 = vector.extract_strided_slice %151 {offsets = [0, 64], sizes = [16, 1], strides = [1, 1]} : vector<16x377xf32> to vector<16x1xf32>
    %c224 = arith.constant 224 : index
    %c0_105 = arith.constant 0 : index
    %183 = vector.load %arg12[%c224, %c0_105] : memref<512x8xf32, #tpu.memory_space<vmem>>, vector<16x1xf32>
    tpu.vector_store %arg12[%c224, %c0_105], %182 {strides = array<i32>} : memref<512x8xf32, #tpu.memory_space<vmem>>, vector<16x1xf32>,
    %184 = vector.extract_strided_slice %151 {offsets = [0, 84], sizes = [16, 1], strides = [1, 1]} : vector<16x377xf32> to vector<16x1xf32>
    %c240 = arith.constant 240 : index
    %c0_106 = arith.constant 0 : index
    %185 = vector.load %arg12[%c240, %c0_106] : memref<512x8xf32, #tpu.memory_space<vmem>>, vector<16x1xf32>
    tpu.vector_store %arg12[%c240, %c0_106], %184 {strides = array<i32>} : memref<512x8xf32, #tpu.memory_space<vmem>>, vector<16x1xf32>,
    %186 = vector.extract_strided_slice %151 {offsets = [0, 86], sizes = [16, 1], strides = [1, 1]} : vector<16x377xf32> to vector<16x1xf32>
    %c256 = arith.constant 256 : index
    %c0_107 = arith.constant 0 : index
    %187 = vector.load %arg12[%c256, %c0_107] : memref<512x8xf32, #tpu.memory_space<vmem>>, vector<16x1xf32>
    tpu.vector_store %arg12[%c256, %c0_107], %186 {strides = array<i32>} : memref<512x8xf32, #tpu.memory_space<vmem>>, vector<16x1xf32>,
    %188 = vector.extract_strided_slice %151 {offsets = [0, 88], sizes = [16, 1], strides = [1, 1]} : vector<16x377xf32> to vector<16x1xf32>
    %c272 = arith.constant 272 : index
    %c0_108 = arith.constant 0 : index
    %189 = vector.load %arg12[%c272, %c0_108] : memref<512x8xf32, #tpu.memory_space<vmem>>, vector<16x1xf32>
    tpu.vector_store %arg12[%c272, %c0_108], %188 {strides = array<i32>} : memref<512x8xf32, #tpu.memory_space<vmem>>, vector<16x1xf32>,
    %190 = vector.extract_strided_slice %151 {offsets = [0, 90], sizes = [16, 1], strides = [1, 1]} : vector<16x377xf32> to vector<16x1xf32>
    %c288 = arith.constant 288 : index
    %c0_109 = arith.constant 0 : index
    %191 = vector.load %arg12[%c288, %c0_109] : memref<512x8xf32, #tpu.memory_space<vmem>>, vector<16x1xf32>
    tpu.vector_store %arg12[%c288, %c0_109], %190 {strides = array<i32>} : memref<512x8xf32, #tpu.memory_space<vmem>>, vector<16x1xf32>,
    %192 = vector.extract_strided_slice %151 {offsets = [0, 92], sizes = [16, 1], strides = [1, 1]} : vector<16x377xf32> to vector<16x1xf32>
    %c304 = arith.constant 304 : index
    %c0_110 = arith.constant 0 : index
    %193 = vector.load %arg12[%c304, %c0_110] : memref<512x8xf32, #tpu.memory_space<vmem>>, vector<16x1xf32>
    tpu.vector_store %arg12[%c304, %c0_110], %192 {strides = array<i32>} : memref<512x8xf32, #tpu.memory_space<vmem>>, vector<16x1xf32>,
    %194 = vector.extract_strided_slice %151 {offsets = [0, 112], sizes = [16, 1], strides = [1, 1]} : vector<16x377xf32> to vector<16x1xf32>
    %c320 = arith.constant 320 : index
    %c0_111 = arith.constant 0 : index
    %195 = vector.load %arg12[%c320, %c0_111] : memref<512x8xf32, #tpu.memory_space<vmem>>, vector<16x1xf32>
    tpu.vector_store %arg12[%c320, %c0_111], %194 {strides = array<i32>} : memref<512x8xf32, #tpu.memory_space<vmem>>, vector<16x1xf32>,
    %196 = vector.extract_strided_slice %151 {offsets = [0, 114], sizes = [16, 1], strides = [1, 1]} : vector<16x377xf32> to vector<16x1xf32>
    %c336 = arith.constant 336 : index
    %c0_112 = arith.constant 0 : index
    %197 = vector.load %arg12[%c336, %c0_112] : memref<512x8xf32, #tpu.memory_space<vmem>>, vector<16x1xf32>
    tpu.vector_store %arg12[%c336, %c0_112], %196 {strides = array<i32>} : memref<512x8xf32, #tpu.memory_space<vmem>>, vector<16x1xf32>,
    %198 = vector.extract_strided_slice %151 {offsets = [0, 116], sizes = [16, 1], strides = [1, 1]} : vector<16x377xf32> to vector<16x1xf32>
    %c352 = arith.constant 352 : index
    %c0_113 = arith.constant 0 : index
    %199 = vector.load %arg12[%c352, %c0_113] : memref<512x8xf32, #tpu.memory_space<vmem>>, vector<16x1xf32>
    tpu.vector_store %arg12[%c352, %c0_113], %198 {strides = array<i32>} : memref<512x8xf32, #tpu.memory_space<vmem>>, vector<16x1xf32>,
    %200 = vector.extract_strided_slice %151 {offsets = [0, 118], sizes = [16, 1], strides = [1, 1]} : vector<16x377xf32> to vector<16x1xf32>
    %c368 = arith.constant 368 : index
    %c0_114 = arith.constant 0 : index
    %201 = vector.load %arg12[%c368, %c0_114] : memref<512x8xf32, #tpu.memory_space<vmem>>, vector<16x1xf32>
    tpu.vector_store %arg12[%c368, %c0_114], %200 {strides = array<i32>} : memref<512x8xf32, #tpu.memory_space<vmem>>, vector<16x1xf32>,
    %202 = vector.extract_strided_slice %151 {offsets = [0, 120], sizes = [16, 1], strides = [1, 1]} : vector<16x377xf32> to vector<16x1xf32>
    %c384 = arith.constant 384 : index
    %c0_115 = arith.constant 0 : index
    %203 = vector.load %arg12[%c384, %c0_115] : memref<512x8xf32, #tpu.memory_space<vmem>>, vector<16x1xf32>
    tpu.vector_store %arg12[%c384, %c0_115], %202 {strides = array<i32>} : memref<512x8xf32, #tpu.memory_space<vmem>>, vector<16x1xf32>,
    %204 = vector.extract_strided_slice %151 {offsets = [0, 196], sizes = [16, 1], strides = [1, 1]} : vector<16x377xf32> to vector<16x1xf32>
    %c0_116 = arith.constant 0 : index
    %c1_117 = arith.constant 1 : index
    %205 = vector.load %arg12[%c0_116, %c1_117] : memref<512x8xf32, #tpu.memory_space<vmem>>, vector<16x1xf32>
    tpu.vector_store %arg12[%c0_116, %c1_117], %204 {strides = array<i32>} : memref<512x8xf32, #tpu.memory_space<vmem>>, vector<16x1xf32>,
    %206 = vector.extract_strided_slice %151 {offsets = [0, 198], sizes = [16, 1], strides = [1, 1]} : vector<16x377xf32> to vector<16x1xf32>
    %c16_118 = arith.constant 16 : index
    %c1_119 = arith.constant 1 : index
    %207 = vector.load %arg12[%c16_118, %c1_119] : memref<512x8xf32, #tpu.memory_space<vmem>>, vector<16x1xf32>
    tpu.vector_store %arg12[%c16_118, %c1_119], %206 {strides = array<i32>} : memref<512x8xf32, #tpu.memory_space<vmem>>, vector<16x1xf32>,
    %208 = vector.extract_strided_slice %151 {offsets = [0, 200], sizes = [16, 1], strides = [1, 1]} : vector<16x377xf32> to vector<16x1xf32>
    %c32_120 = arith.constant 32 : index
    %c1_121 = arith.constant 1 : index
    %209 = vector.load %arg12[%c32_120, %c1_121] : memref<512x8xf32, #tpu.memory_space<vmem>>, vector<16x1xf32>
    tpu.vector_store %arg12[%c32_120, %c1_121], %208 {strides = array<i32>} : memref<512x8xf32, #tpu.memory_space<vmem>>, vector<16x1xf32>,
    %210 = vector.extract_strided_slice %151 {offsets = [0, 202], sizes = [16, 1], strides = [1, 1]} : vector<16x377xf32> to vector<16x1xf32>
    %c48_122 = arith.constant 48 : index
    %c1_123 = arith.constant 1 : index
    %211 = vector.load %arg12[%c48_122, %c1_123] : memref<512x8xf32, #tpu.memory_space<vmem>>, vector<16x1xf32>
    tpu.vector_store %arg12[%c48_122, %c1_123], %210 {strides = array<i32>} : memref<512x8xf32, #tpu.memory_space<vmem>>, vector<16x1xf32>,
    %212 = vector.extract_strided_slice %151 {offsets = [0, 204], sizes = [16, 1], strides = [1, 1]} : vector<16x377xf32> to vector<16x1xf32>
    %c64_124 = arith.constant 64 : index
    %c1_125 = arith.constant 1 : index
    %213 = vector.load %arg12[%c64_124, %c1_125] : memref<512x8xf32, #tpu.memory_space<vmem>>, vector<16x1xf32>
    tpu.vector_store %arg12[%c64_124, %c1_125], %212 {strides = array<i32>} : memref<512x8xf32, #tpu.memory_space<vmem>>, vector<16x1xf32>,
    %214 = vector.extract_strided_slice %151 {offsets = [0, 224], sizes = [16, 1], strides = [1, 1]} : vector<16x377xf32> to vector<16x1xf32>
    %c80_126 = arith.constant 80 : index
    %c1_127 = arith.constant 1 : index
    %215 = vector.load %arg12[%c80_126, %c1_127] : memref<512x8xf32, #tpu.memory_space<vmem>>, vector<16x1xf32>
    tpu.vector_store %arg12[%c80_126, %c1_127], %214 {strides = array<i32>} : memref<512x8xf32, #tpu.memory_space<vmem>>, vector<16x1xf32>,
    %216 = vector.extract_strided_slice %151 {offsets = [0, 226], sizes = [16, 1], strides = [1, 1]} : vector<16x377xf32> to vector<16x1xf32>
    %c96_128 = arith.constant 96 : index
    %c1_129 = arith.constant 1 : index
    %217 = vector.load %arg12[%c96_128, %c1_129] : memref<512x8xf32, #tpu.memory_space<vmem>>, vector<16x1xf32>
    tpu.vector_store %arg12[%c96_128, %c1_129], %216 {strides = array<i32>} : memref<512x8xf32, #tpu.memory_space<vmem>>, vector<16x1xf32>,
    %218 = vector.extract_strided_slice %151 {offsets = [0, 228], sizes = [16, 1], strides = [1, 1]} : vector<16x377xf32> to vector<16x1xf32>
    %c112_130 = arith.constant 112 : index
    %c1_131 = arith.constant 1 : index
    %219 = vector.load %arg12[%c112_130, %c1_131] : memref<512x8xf32, #tpu.memory_space<vmem>>, vector<16x1xf32>
    tpu.vector_store %arg12[%c112_130, %c1_131], %218 {strides = array<i32>} : memref<512x8xf32, #tpu.memory_space<vmem>>, vector<16x1xf32>,
    %220 = vector.extract_strided_slice %151 {offsets = [0, 230], sizes = [16, 1], strides = [1, 1]} : vector<16x377xf32> to vector<16x1xf32>
    %c128_132 = arith.constant 128 : index
    %c1_133 = arith.constant 1 : index
    %221 = vector.load %arg12[%c128_132, %c1_133] : memref<512x8xf32, #tpu.memory_space<vmem>>, vector<16x1xf32>
    tpu.vector_store %arg12[%c128_132, %c1_133], %220 {strides = array<i32>} : memref<512x8xf32, #tpu.memory_space<vmem>>, vector<16x1xf32>,
    %222 = vector.extract_strided_slice %151 {offsets = [0, 232], sizes = [16, 1], strides = [1, 1]} : vector<16x377xf32> to vector<16x1xf32>
    %c144_134 = arith.constant 144 : index
    %c1_135 = arith.constant 1 : index
    %223 = vector.load %arg12[%c144_134, %c1_135] : memref<512x8xf32, #tpu.memory_space<vmem>>, vector<16x1xf32>
    tpu.vector_store %arg12[%c144_134, %c1_135], %222 {strides = array<i32>} : memref<512x8xf32, #tpu.memory_space<vmem>>, vector<16x1xf32>,
    %224 = vector.extract_strided_slice %151 {offsets = [0, 252], sizes = [16, 1], strides = [1, 1]} : vector<16x377xf32> to vector<16x1xf32>
    %c160_136 = arith.constant 160 : index
    %c1_137 = arith.constant 1 : index
    %225 = vector.load %arg12[%c160_136, %c1_137] : memref<512x8xf32, #tpu.memory_space<vmem>>, vector<16x1xf32>
    tpu.vector_store %arg12[%c160_136, %c1_137], %224 {strides = array<i32>} : memref<512x8xf32, #tpu.memory_space<vmem>>, vector<16x1xf32>,
    %226 = vector.extract_strided_slice %151 {offsets = [0, 254], sizes = [16, 1], strides = [1, 1]} : vector<16x377xf32> to vector<16x1xf32>
    %c176_138 = arith.constant 176 : index
    %c1_139 = arith.constant 1 : index
    %227 = vector.load %arg12[%c176_138, %c1_139] : memref<512x8xf32, #tpu.memory_space<vmem>>, vector<16x1xf32>
    tpu.vector_store %arg12[%c176_138, %c1_139], %226 {strides = array<i32>} : memref<512x8xf32, #tpu.memory_space<vmem>>, vector<16x1xf32>,
    %228 = vector.extract_strided_slice %151 {offsets = [0, 256], sizes = [16, 1], strides = [1, 1]} : vector<16x377xf32> to vector<16x1xf32>
    %c192_140 = arith.constant 192 : index
    %c1_141 = arith.constant 1 : index
    %229 = vector.load %arg12[%c192_140, %c1_141] : memref<512x8xf32, #tpu.memory_space<vmem>>, vector<16x1xf32>
    tpu.vector_store %arg12[%c192_140, %c1_141], %228 {strides = array<i32>} : memref<512x8xf32, #tpu.memory_space<vmem>>, vector<16x1xf32>,
    %230 = vector.extract_strided_slice %151 {offsets = [0, 258], sizes = [16, 1], strides = [1, 1]} : vector<16x377xf32> to vector<16x1xf32>
    %c208_142 = arith.constant 208 : index
    %c1_143 = arith.constant 1 : index
    %231 = vector.load %arg12[%c208_142, %c1_143] : memref<512x8xf32, #tpu.memory_space<vmem>>, vector<16x1xf32>
    tpu.vector_store %arg12[%c208_142, %c1_143], %230 {strides = array<i32>} : memref<512x8xf32, #tpu.memory_space<vmem>>, vector<16x1xf32>,
    %232 = vector.extract_strided_slice %151 {offsets = [0, 260], sizes = [16, 1], strides = [1, 1]} : vector<16x377xf32> to vector<16x1xf32>
    %c224_144 = arith.constant 224 : index
    %c1_145 = arith.constant 1 : index
    %233 = vector.load %arg12[%c224_144, %c1_145] : memref<512x8xf32, #tpu.memory_space<vmem>>, vector<16x1xf32>
    tpu.vector_store %arg12[%c224_144, %c1_145], %232 {strides = array<i32>} : memref<512x8xf32, #tpu.memory_space<vmem>>, vector<16x1xf32>,
    %234 = vector.extract_strided_slice %151 {offsets = [0, 280], sizes = [16, 1], strides = [1, 1]} : vector<16x377xf32> to vector<16x1xf32>
    %c240_146 = arith.constant 240 : index
    %c1_147 = arith.constant 1 : index
    %235 = vector.load %arg12[%c240_146, %c1_147] : memref<512x8xf32, #tpu.memory_space<vmem>>, vector<16x1xf32>
    tpu.vector_store %arg12[%c240_146, %c1_147], %234 {strides = array<i32>} : memref<512x8xf32, #tpu.memory_space<vmem>>, vector<16x1xf32>,
    %236 = vector.extract_strided_slice %151 {offsets = [0, 282], sizes = [16, 1], strides = [1, 1]} : vector<16x377xf32> to vector<16x1xf32>
    %c256_148 = arith.constant 256 : index
    %c1_149 = arith.constant 1 : index
    %237 = vector.load %arg12[%c256_148, %c1_149] : memref<512x8xf32, #tpu.memory_space<vmem>>, vector<16x1xf32>
    tpu.vector_store %arg12[%c256_148, %c1_149], %236 {strides = array<i32>} : memref<512x8xf32, #tpu.memory_space<vmem>>, vector<16x1xf32>,
    %238 = vector.extract_strided_slice %151 {offsets = [0, 284], sizes = [16, 1], strides = [1, 1]} : vector<16x377xf32> to vector<16x1xf32>
    %c272_150 = arith.constant 272 : index
    %c1_151 = arith.constant 1 : index
    %239 = vector.load %arg12[%c272_150, %c1_151] : memref<512x8xf32, #tpu.memory_space<vmem>>, vector<16x1xf32>
    tpu.vector_store %arg12[%c272_150, %c1_151], %238 {strides = array<i32>} : memref<512x8xf32, #tpu.memory_space<vmem>>, vector<16x1xf32>,
    %240 = vector.extract_strided_slice %151 {offsets = [0, 286], sizes = [16, 1], strides = [1, 1]} : vector<16x377xf32> to vector<16x1xf32>
    %c288_152 = arith.constant 288 : index
    %c1_153 = arith.constant 1 : index
    %241 = vector.load %arg12[%c288_152, %c1_153] : memref<512x8xf32, #tpu.memory_space<vmem>>, vector<16x1xf32>
    tpu.vector_store %arg12[%c288_152, %c1_153], %240 {strides = array<i32>} : memref<512x8xf32, #tpu.memory_space<vmem>>, vector<16x1xf32>,
    %242 = vector.extract_strided_slice %151 {offsets = [0, 288], sizes = [16, 1], strides = [1, 1]} : vector<16x377xf32> to vector<16x1xf32>
    %c304_154 = arith.constant 304 : index
    %c1_155 = arith.constant 1 : index
    %243 = vector.load %arg12[%c304_154, %c1_155] : memref<512x8xf32, #tpu.memory_space<vmem>>, vector<16x1xf32>
    tpu.vector_store %arg12[%c304_154, %c1_155], %242 {strides = array<i32>} : memref<512x8xf32, #tpu.memory_space<vmem>>, vector<16x1xf32>,
    %244 = vector.extract_strided_slice %151 {offsets = [0, 308], sizes = [16, 1], strides = [1, 1]} : vector<16x377xf32> to vector<16x1xf32>
    %c320_156 = arith.constant 320 : index
    %c1_157 = arith.constant 1 : index
    %245 = vector.load %arg12[%c320_156, %c1_157] : memref<512x8xf32, #tpu.memory_space<vmem>>, vector<16x1xf32>
    tpu.vector_store %arg12[%c320_156, %c1_157], %244 {strides = array<i32>} : memref<512x8xf32, #tpu.memory_space<vmem>>, vector<16x1xf32>,
    %246 = vector.extract_strided_slice %151 {offsets = [0, 310], sizes = [16, 1], strides = [1, 1]} : vector<16x377xf32> to vector<16x1xf32>
    %c336_158 = arith.constant 336 : index
    %c1_159 = arith.constant 1 : index
    %247 = vector.load %arg12[%c336_158, %c1_159] : memref<512x8xf32, #tpu.memory_space<vmem>>, vector<16x1xf32>
    tpu.vector_store %arg12[%c336_158, %c1_159], %246 {strides = array<i32>} : memref<512x8xf32, #tpu.memory_space<vmem>>, vector<16x1xf32>,
    %248 = vector.extract_strided_slice %151 {offsets = [0, 312], sizes = [16, 1], strides = [1, 1]} : vector<16x377xf32> to vector<16x1xf32>
    %c352_160 = arith.constant 352 : index
    %c1_161 = arith.constant 1 : index
    %249 = vector.load %arg12[%c352_160, %c1_161] : memref<512x8xf32, #tpu.memory_space<vmem>>, vector<16x1xf32>
    tpu.vector_store %arg12[%c352_160, %c1_161], %248 {strides = array<i32>} : memref<512x8xf32, #tpu.memory_space<vmem>>, vector<16x1xf32>,
    %250 = vector.extract_strided_slice %151 {offsets = [0, 314], sizes = [16, 1], strides = [1, 1]} : vector<16x377xf32> to vector<16x1xf32>
    %c368_162 = arith.constant 368 : index
    %c1_163 = arith.constant 1 : index
    %251 = vector.load %arg12[%c368_162, %c1_163] : memref<512x8xf32, #tpu.memory_space<vmem>>, vector<16x1xf32>
    tpu.vector_store %arg12[%c368_162, %c1_163], %250 {strides = array<i32>} : memref<512x8xf32, #tpu.memory_space<vmem>>, vector<16x1xf32>,
    %252 = vector.extract_strided_slice %151 {offsets = [0, 316], sizes = [16, 1], strides = [1, 1]} : vector<16x377xf32> to vector<16x1xf32>
    %c384_164 = arith.constant 384 : index
    %c1_165 = arith.constant 1 : index
    %253 = vector.load %arg12[%c384_164, %c1_165] : memref<512x8xf32, #tpu.memory_space<vmem>>, vector<16x1xf32>
    tpu.vector_store %arg12[%c384_164, %c1_165], %252 {strides = array<i32>} : memref<512x8xf32, #tpu.memory_space<vmem>>, vector<16x1xf32>,
    %c0_166 = arith.constant 0 : index
    %c0_167 = arith.constant 0 : index
    %254 = vector.load %arg5[%c0_166, %c0_167] : memref<128x512xf32, #tpu.memory_space<vmem>>, vector<128x512xf32>
    %c0_168 = arith.constant 0 : index
    %c0_169 = arith.constant 0 : index
    %255 = vector.load %arg12[%c0_168, %c0_169] : memref<512x8xf32, #tpu.memory_space<vmem>>, vector<512x8xf32>
    %cst_170 = arith.constant dense<0.000000e+00> : vector<128x8xf32>
    %256 = tpu.matmul %254, %255, %cst_170 {dimension_numbers = #tpu.dot_dimension_numbers<[1], [0], [0], [1], [0, 0, 1, 1], [], []>} : vector<128x512xf32>, vector<512x8xf32>, vector<128x8xf32> -> vector<128x8xf32>
    %c0_171 = arith.constant 0 : index
    %c0_172 = arith.constant 0 : index
    %257 = vector.load %arg6[%c0_171, %c0_172] : memref<128x1xf32, #tpu.memory_space<vmem>>, vector<128x1xf32>
    %258 = vector.broadcast %257 : vector<128x1xf32> to vector<128x8xf32>
    %259 = arith.addf %256, %258 : vector<128x8xf32>
    %cst_173 = arith.constant 0.000000e+00 : f32
    %260 = vector.broadcast %cst_173 : f32 to vector<128x8xf32>
    %261 = arith.maximumf %259, %260 : vector<128x8xf32>
    %c0_174 = arith.constant 0 : index
    %c0_175 = arith.constant 0 : index
    %262 = vector.load %arg7[%c0_174, %c0_175] : memref<128x128xf32, #tpu.memory_space<vmem>>, vector<128x128xf32>
    %cst_176 = arith.constant dense<0.000000e+00> : vector<128x8xf32>
    %263 = tpu.matmul %262, %261, %cst_176 {dimension_numbers = #tpu.dot_dimension_numbers<[1], [0], [0], [1], [0, 0, 1, 1], [], []>} : vector<128x128xf32>, vector<128x8xf32>, vector<128x8xf32> -> vector<128x8xf32>
    %c0_177 = arith.constant 0 : index
    %c0_178 = arith.constant 0 : index
    %264 = vector.load %arg8[%c0_177, %c0_178] : memref<128x1xf32, #tpu.memory_space<vmem>>, vector<128x1xf32>
    %265 = vector.broadcast %264 : vector<128x1xf32> to vector<128x8xf32>
    %266 = arith.addf %263, %265 : vector<128x8xf32>
    %cst_179 = arith.constant 0.000000e+00 : f32
    %267 = vector.broadcast %cst_179 : f32 to vector<128x8xf32>
    %268 = arith.maximumf %266, %267 : vector<128x8xf32>
    %c0_180 = arith.constant 0 : index
    %c0_181 = arith.constant 0 : index
    %269 = vector.load %arg9[%c0_180, %c0_181] : memref<128x128xf32, #tpu.memory_space<vmem>>, vector<128x128xf32>
    %cst_182 = arith.constant dense<0.000000e+00> : vector<128x8xf32>
    %270 = tpu.matmul %269, %268, %cst_182 {dimension_numbers = #tpu.dot_dimension_numbers<[1], [0], [0], [1], [0, 0, 1, 1], [], []>} : vector<128x128xf32>, vector<128x8xf32>, vector<128x8xf32> -> vector<128x8xf32>
    %c0_183 = arith.constant 0 : index
    %c0_184 = arith.constant 0 : index
    %271 = vector.load %arg10[%c0_183, %c0_184] : memref<128x1xf32, #tpu.memory_space<vmem>>, vector<128x1xf32>
    %272 = vector.broadcast %271 : vector<128x1xf32> to vector<128x8xf32>
    %273 = arith.addf %270, %272 : vector<128x8xf32>
    %c0_185 = arith.constant 0 : index
    %c0_186 = arith.constant 0 : index
    %274 = vector.load %arg11[%c0_185, %c0_186] : memref<128x8xf32, #tpu.memory_space<vmem>>, vector<128x8xf32>
    tpu.vector_store %arg11[%c0_185, %c0_186], %273 {strides = array<i32>} : memref<128x8xf32, #tpu.memory_space<vmem>>, vector<128x8xf32>,
    return
  }
}

</mosaic_0001>

<bundles_post_ra>
// kernel: forward.1
= control target key start
LH: loop header
LB: loop body
LE: loop exit
PB: predicated region body
PF: predicated region fallthrough
CT: control target
= control target key end

     0   :  { %v7753_v3 = vmov 0.0   ;;  %vm922_vm0 = vcmask 64512   ;;  %s10697_s15 = smov 126   ;;  %s7757_s16 = smov 125   ;;  %vm914_vm1 = vcmask 1039360   ;;  %vm1254_vm2 = vcmask 1031168   ;;  %s10664_s0 = inlined_call_operand.vmem [shape: f32[128,2048], index: 0, kind: input, shape index: {}]   ;;  %s10665_s1 = inlined_call_operand.vmem [shape: f32[8,128], index: 1, kind: input, shape index: {}]   ;;  %s10666_s2 = inlined_call_operand.vmem [shape: f32[8,1], index: 2, kind: input, shape index: {}]   ;;  %s10667_s3 = inlined_call_operand.vmem [shape: f32[25,16,8], index: 3, kind: input, shape index: {}]   ;;  %s10668_s4 = inlined_call_operand.vmem [shape: f32[16,1], index: 4, kind: input, shape index: {}]   ;;  %s10669_s5 = inlined_call_operand.vmem [shape: f32[128,512], index: 5, kind: input, shape index: {}]   ;;  %s10670_s6 = inlined_call_operand.vmem [shape: f32[128,1], index: 6, kind: input, shape index: {}]   ;;  %s10671_s8 = inlined_call_operand.vmem [shape: f32[128,1], index: 8, kind: input, shape index: {}]   ;;  %s10672_s10 = inlined_call_operand.vmem [shape: f32[128,1], index: 10, kind: input, shape index: {}]   ;;  %s10673_s7 = inlined_call_operand.vmem [shape: f32[128,128], index: 7, kind: input, shape index: {}]   ;;  %s10674_s9 = inlined_call_operand.vmem [shape: f32[128,128], index: 9, kind: input, shape index: {}]   ;;  %s10675_s11 = inlined_call_operand.vmem [shape: f32[128,8], index: 11, kind: output, shape index: {}]  }
   0x1   :  { %v280_v0 = vld [vmem:[%s10664_s0 + $0x788] sm:$0xff]  ;;  %v282_v1 = vld [vmem:[%s10664_s0 + $0x798] sm:$0xff]  ;;  %v279_v2 = vld [vmem:[%s10664_s0 + $0x780] sm:$0xff]  ;;  %365 = vmatprep.mubr.f32.mxu0 %v7753_v3  ;;  %436 = vmatprep.mubr.f32.mxu1 %v7753_v3  ;;  %5660 = vst.msk [vmem:[#allocation2] sm:$0xff] %vm922_vm0, %v7753_v3  ;;  %s7758_s17 = smov 124   ;;  %s7759_s18 = smov 114  }
   0x2   :  { %301 = vmatprep.subr.mxu0 %v280_v0  ;;  %372 = vmatprep.subr.mxu1 %v282_v1  ;;  %v281_v4 = vld [vmem:[%s10664_s0 + $0x790] sm:$0xff]  ;;  %v264_v5 = vld [vmem:[%s10664_s0 + $0x708] sm:$0xff]  ;;  %v266_v6 = vld [vmem:[%s10664_s0 + $0x718] sm:$0xff]  ;;  %5661 = vst.msk [vmem:[#allocation2 + $0x8] sm:$0xff] %vm922_vm0, %v7753_v3  ;;  %s7760_s19 = smov 113   ;;  %s7761_s20 = smov 112  }
   0x3   :  { %302 = vmatpush1.msra.mxu0 %v279_v2  ;;  %373 = vmatpush1.msra.mxu1 %v281_v4  ;;  %v263_v7 = vld [vmem:[%s10664_s0 + $0x700] sm:$0xff]  ;;  %v265_v8 = vld [vmem:[%s10664_s0 + $0x710] sm:$0xff]  ;;  %v248_v9 = vld [vmem:[%s10664_s0 + $0x688] sm:$0xff]  ;;  %5662 = vst.msk [vmem:[#allocation2 + $0x10] sm:$0xff] %vm922_vm0, %v7753_v3  ;;  %s7762_s21 = smov 111   ;;  %s7765_s22 = smov 99  }
   0x4   :  { %303 = vmatprep.subr.mxu0 %v264_v5  ;;  %374 = vmatprep.subr.mxu1 %v266_v6  ;;  %v250_v10 = vld [vmem:[%s10664_s0 + $0x698] sm:$0xff]  ;;  %v247_v11 = vld [vmem:[%s10664_s0 + $0x680] sm:$0xff]  ;;  %v249_v12 = vld [vmem:[%s10664_s0 + $0x690] sm:$0xff]  ;;  %5663 = vst.msk [vmem:[#allocation2 + $0x18] sm:$0xff] %vm922_vm0, %v7753_v3  ;;  %s7766_s23 = smov 98   ;;  %s7767_s24 = smov 97  }
   0x5   :  { %304 = vmatpush1.msra.mxu0 %v263_v7  ;;  %375 = vmatpush1.msra.mxu1 %v265_v8  ;;  %v232_v13 = vld [vmem:[%s10664_s0 + $0x608] sm:$0xff]  ;;  %v234_v14 = vld [vmem:[%s10664_s0 + $0x618] sm:$0xff]  ;;  %v231_v15 = vld [vmem:[%s10664_s0 + $0x600] sm:$0xff]  ;;  %5664 = vst.msk [vmem:[#allocation2 + $0x20] sm:$0xff] %vm922_vm0, %v7753_v3  ;;  %s10677_s25 = smov 96   ;;  %s7769_s26 = smov 86  }
   0x6   :  { %305 = vmatprep.subr.mxu0 %v248_v9  ;;  %376 = vmatprep.subr.mxu1 %v250_v10  ;;  %v233_v16 = vld [vmem:[%s10664_s0 + $0x610] sm:$0xff]  ;;  %v216_v17 = vld [vmem:[%s10664_s0 + $0x588] sm:$0xff]  ;;  %v218_v18 = vld [vmem:[%s10664_s0 + $0x598] sm:$0xff]  ;;  %5665 = vst.msk [vmem:[#allocation2 + $0x28] sm:$0xff] %vm922_vm0, %v7753_v3  ;;  %s7770_s29 = smov 85   ;;  %vm1441_vm3 = vcmask 1022976  }
   0x7   :  { %306 = vmatpush1.msra.mxu0 %v247_v11  ;;  %377 = vmatpush1.msra.mxu1 %v249_v12  ;;  %v215_v19 = vld [vmem:[%s10664_s0 + $0x580] sm:$0xff]  ;;  %v217_v20 = vld [vmem:[%s10664_s0 + $0x590] sm:$0xff]  ;;  %v200_v21 = vld [vmem:[%s10664_s0 + $0x508] sm:$0xff]  ;;  %5666 = vst.msk [vmem:[#allocation2 + $0x30] sm:$0xff] %vm922_vm0, %v7753_v3  ;;  %s7772_s27 = smov 83   ;;  %vm1628_vm4 = vcmask 1014784  }
   0x8   :  { %307 = vmatprep.subr.mxu0 %v232_v13  ;;  %378 = vmatprep.subr.mxu1 %v234_v14  ;;  %v202_v22 = vld [vmem:[%s10664_s0 + $0x518] sm:$0xff]  ;;  %v199_v23 = vld [vmem:[%s10664_s0 + $0x500] sm:$0xff]  ;;  %v201_v24 = vld [vmem:[%s10664_s0 + $0x510] sm:$0xff]  ;;  %5667 = vst.msk [vmem:[#allocation2 + $0x38] sm:$0xff] %vm922_vm0, %v7753_v3  ;;  %s7773_s13 = smov 82   ;;  %vm1815_vm5 = vcmask 932864  }
   0x9   :  { %308 = vmatpush1.msra.mxu0 %v231_v15  ;;  %379 = vmatpush1.msra.mxu1 %v233_v16  ;;  %v184_v25 = vld [vmem:[%s10664_s0 + $0x488] sm:$0xff]  ;;  %v186_v26 = vld [vmem:[%s10664_s0 + $0x498] sm:$0xff]  ;;  %v183_v27 = vld [vmem:[%s10664_s0 + $0x480] sm:$0xff]  ;;  %5668 = vst.msk [vmem:[#allocation2 + $0x40] sm:$0xff] %vm922_vm0, %v7753_v3  ;;  %vm2002_vm6 = vcmask 924672   ;;  %s7775_s30 = smov 71  }
   0xa   :  { %309 = vmatprep.subr.mxu0 %v216_v17  ;;  %380 = vmatprep.subr.mxu1 %v218_v18  ;;  %v185_v28 = vld [vmem:[%s10664_s0 + $0x490] sm:$0xff]  ;;  %v168_v29 = vld [vmem:[%s10664_s0 + $0x408] sm:$0xff]  ;;  %v170_v30 = vld [vmem:[%s10664_s0 + $0x418] sm:$0xff]  ;;  %5669 = vst.msk [vmem:[#allocation2 + $0x48] sm:$0xff] %vm922_vm0, %v7753_v3  ;;  %vm2189_vm7 = vcmask 916480   ;;  %vm2376_vm8 = vcmask 908288  }
   0xb   :  { %310 = vmatpush1.msra.mxu0 %v215_v19  ;;  %381 = vmatpush1.msra.mxu1 %v217_v20  ;;  %v167_v31 = vld [vmem:[%s10664_s0 + $0x400] sm:$0xff]  ;;  %v169_v32 = vld [vmem:[%s10664_s0 + $0x410] sm:$0xff]  ;;  %v152_v33 = vld [vmem:[%s10664_s0 + $0x388] sm:$0xff]  ;;  %5670 = vst.msk [vmem:[#allocation2 + $0x50] sm:$0xff] %vm922_vm0, %v7753_v3  ;;  %vm2563_vm9 = vcmask 900096   ;;  %vm2750_vm10 = vcmask 818176  }
   0xc   :  { %311 = vmatprep.subr.mxu0 %v200_v21  ;;  %382 = vmatprep.subr.mxu1 %v202_v22  ;;  %v154_v34 = vld [vmem:[%s10664_s0 + $0x398] sm:$0xff]  ;;  %v151_v35 = vld [vmem:[%s10664_s0 + $0x380] sm:$0xff]  ;;  %v153_v36 = vld [vmem:[%s10664_s0 + $0x390] sm:$0xff]  ;;  %5671 = vst.msk [vmem:[#allocation2 + $0x58] sm:$0xff] %vm922_vm0, %v7753_v3  ;;  %vm2937_vm11 = vcmask 809984   ;;  %vm3124_vm12 = vcmask 801792  }
   0xd   :  { %312 = vmatpush1.msra.mxu0 %v199_v23  ;;  %383 = vmatpush1.msra.mxu1 %v201_v24  ;;  %v136_v37 = vld [vmem:[%s10664_s0 + $0x308] sm:$0xff]  ;;  %v138_v38 = vld [vmem:[%s10664_s0 + $0x318] sm:$0xff]  ;;  %v135_v39 = vld [vmem:[%s10664_s0 + $0x300] sm:$0xff]  ;;  %5672 = vst.msk [vmem:[#allocation2 + $0x60] sm:$0xff] %vm922_vm0, %v7753_v3  ;;  %vm3311_vm13 = vcmask 793600   ;;  %vm3498_vm14 = vcmask 785408  }
   0xe   :  { %313 = vmatprep.subr.mxu0 %v184_v25  ;;  %384 = vmatprep.subr.mxu1 %v186_v26  ;;  %v137_v40 = vld [vmem:[%s10664_s0 + $0x310] sm:$0xff]  ;;  %v120_v41 = vld [vmem:[%s10664_s0 + $0x288] sm:$0xff]  ;;  %v122_v42 = vld [vmem:[%s10664_s0 + $0x298] sm:$0xff]  ;;  %5673 = vst.msk [vmem:[#allocation2 + $0x68] sm:$0xff] %vm922_vm0, %v7753_v3  ;;  %vm3685_vm15 = vcmask 703488   ;;  %s7781_s12 = smov 75  }
   0xf   :  { %314 = vmatpush1.msra.mxu0 %v183_v27  ;;  %385 = vmatpush1.msra.mxu1 %v185_v28  ;;  %v119_v43 = vld [vmem:[%s10664_s0 + $0x280] sm:$0xff]  ;;  %v121_v44 = vld [vmem:[%s10664_s0 + $0x290] sm:$0xff]  ;;  %v104_v45 = vld [vmem:[%s10664_s0 + $0x208] sm:$0xff]  ;;  %5674 = vst.msk [vmem:[#allocation2 + $0x70] sm:$0xff] %vm922_vm0, %v7753_v3  ;;  %s7783_s14 = smov 1   ;;  %s10680_s28 = smov 64  }
  0x10   :  { %315 = vmatprep.subr.mxu0 %v168_v29  ;;  %386 = vmatprep.subr.mxu1 %v170_v30  ;;  %v106_v46 = vld [vmem:[%s10664_s0 + $0x218] sm:$0xff]  ;;  %v103_v47 = vld [vmem:[%s10664_s0 + $0x200] sm:$0xff]  ;;  %v105_v48 = vld [vmem:[%s10664_s0 + $0x210] sm:$0xff]  ;;  %5675 = vst.msk [vmem:[#allocation2 + $0x78] sm:$0xff] %vm922_vm0, %v7753_v3 }
  0x11   :  { %316 = vmatpush1.msra.mxu0 %v167_v31  ;;  %387 = vmatpush1.msra.mxu1 %v169_v32  ;;  %v88_v49 = vld [vmem:[%s10664_s0 + $0x188] sm:$0xff]  ;;  %v90_v50 = vld [vmem:[%s10664_s0 + $0x198] sm:$0xff]  ;;  %v87_v51 = vld [vmem:[%s10664_s0 + $0x180] sm:$0xff]  ;;  %5676 = vst.msk [vmem:[#allocation2 + $0x80] sm:$0xff] %vm922_vm0, %v7753_v3 }
  0x12   :  { %317 = vmatprep.subr.mxu0 %v152_v33  ;;  %388 = vmatprep.subr.mxu1 %v154_v34  ;;  %v89_v52 = vld [vmem:[%s10664_s0 + $0x190] sm:$0xff]  ;;  %v72_v53 = vld [vmem:[%s10664_s0 + $0x108] sm:$0xff]  ;;  %v74_v54 = vld [vmem:[%s10664_s0 + $0x118] sm:$0xff]  ;;  %5677 = vst.msk [vmem:[#allocation2 + $0x88] sm:$0xff] %vm922_vm0, %v7753_v3 }
  0x13   :  { %318 = vmatpush1.msra.mxu0 %v151_v35  ;;  %389 = vmatpush1.msra.mxu1 %v153_v36  ;;  %v71_v55 = vld [vmem:[%s10664_s0 + $0x100] sm:$0xff]  ;;  %v73_v56 = vld [vmem:[%s10664_s0 + $0x110] sm:$0xff]  ;;  %v56_v57 = vld [vmem:[%s10664_s0 + $0x88] sm:$0xff]  ;;  %5678 = vst.msk [vmem:[#allocation2 + $0x90] sm:$0xff] %vm922_vm0, %v7753_v3 }
  0x14   :  { %319 = vmatprep.subr.mxu0 %v136_v37  ;;  %390 = vmatprep.subr.mxu1 %v138_v38  ;;  %v58_v58 = vld [vmem:[%s10664_s0 + $0x98] sm:$0xff]  ;;  %v55_v59 = vld [vmem:[%s10664_s0 + $0x80] sm:$0xff]  ;;  %v57_v60 = vld [vmem:[%s10664_s0 + $0x90] sm:$0xff]  ;;  %5679 = vst.msk [vmem:[#allocation2 + $0x98] sm:$0xff] %vm922_vm0, %v7753_v3 }
  0x15   :  { %320 = vmatpush1.msra.mxu0 %v135_v39  ;;  %391 = vmatpush1.msra.mxu1 %v137_v40  ;;  %v40_v61 = vld [vmem:[%s10664_s0 + $0x8] sm:$0xff]  ;;  %v42_v62 = vld [vmem:[%s10664_s0 + $0x18] sm:$0xff]  ;;  %v39_v63 = vld [vmem:[%s10664_s0] sm:$0xff]  ;;  %5680 = vst.msk [vmem:[#allocation2 + $0xa0] sm:$0xff] %vm922_vm0, %v7753_v3 }
  0x16   :  { %321 = vmatprep.subr.mxu0 %v120_v41  ;;  %392 = vmatprep.subr.mxu1 %v122_v42  ;;  %v41_v0 = vld [vmem:[%s10664_s0 + $0x10] sm:$0xff]  ;;  %v8071_v1 = vld [vmem:[%s10665_s1] sm:$0xff]  ;;  %v284_v2 = vld [vmem:[%s10664_s0 + $0x7a8] sm:$0xff]  ;;  %5681 = vst.msk [vmem:[#allocation2 + $0xa8] sm:$0xff] %vm922_vm0, %v7753_v3  ;;  %s7763_s1 = smov 110  }
  0x17   :  { %322 = vmatpush1.msra.mxu0 %v119_v43  ;;  %393 = vmatpush1.msra.mxu1 %v121_v44  ;;  %v286_v4 = vld [vmem:[%s10664_s0 + $0x7b8] sm:$0xff]  ;;  %v283_v5 = vld [vmem:[%s10664_s0 + $0x7a0] sm:$0xff]  ;;  %v285_v6 = vld [vmem:[%s10664_s0 + $0x7b0] sm:$0xff]  ;;  %5682 = vst.msk [vmem:[#allocation2 + $0xb0] sm:$0xff] %vm922_vm0, %v7753_v3 }
  0x18   :  { %323 = vmatprep.subr.mxu0 %v104_v45  ;;  %394 = vmatprep.subr.mxu1 %v106_v46  ;;  %v268_v7 = vld [vmem:[%s10664_s0 + $0x728] sm:$0xff]  ;;  %v270_v8 = vld [vmem:[%s10664_s0 + $0x738] sm:$0xff]  ;;  %v267_v9 = vld [vmem:[%s10664_s0 + $0x720] sm:$0xff]  ;;  %5683 = vst.msk [vmem:[#allocation2 + $0xb8] sm:$0xff] %vm922_vm0, %v7753_v3 }
  0x19   :  { %324 = vmatpush1.msra.mxu0 %v103_v47  ;;  %395 = vmatpush1.msra.mxu1 %v105_v48  ;;  %v269_v10 = vld [vmem:[%s10664_s0 + $0x730] sm:$0xff]  ;;  %v252_v11 = vld [vmem:[%s10664_s0 + $0x6a8] sm:$0xff]  ;;  %v254_v12 = vld [vmem:[%s10664_s0 + $0x6b8] sm:$0xff]  ;;  %5684 = vst.msk [vmem:[#allocation2 + $0xc0] sm:$0xff] %vm922_vm0, %v7753_v3 }
  0x1a   :  { %325 = vmatprep.subr.mxu0 %v88_v49  ;;  %396 = vmatprep.subr.mxu1 %v90_v50  ;;  %v251_v13 = vld [vmem:[%s10664_s0 + $0x6a0] sm:$0xff]  ;;  %v253_v14 = vld [vmem:[%s10664_s0 + $0x6b0] sm:$0xff]  ;;  %v236_v15 = vld [vmem:[%s10664_s0 + $0x628] sm:$0xff]  ;;  %5685 = vst.msk [vmem:[#allocation2 + $0xc8] sm:$0xff] %vm922_vm0, %v7753_v3 }
  0x1b   :  { %326 = vmatpush1.msra.mxu0 %v87_v51  ;;  %397 = vmatpush1.msra.mxu1 %v89_v52  ;;  %v238_v16 = vld [vmem:[%s10664_s0 + $0x638] sm:$0xff]  ;;  %v235_v17 = vld [vmem:[%s10664_s0 + $0x620] sm:$0xff]  ;;  %v237_v18 = vld [vmem:[%s10664_s0 + $0x630] sm:$0xff]  ;;  %5686 = vst.msk [vmem:[#allocation2 + $0xd0] sm:$0xff] %vm922_vm0, %v7753_v3 }
  0x1c   :  { %327 = vmatprep.subr.mxu0 %v72_v53  ;;  %398 = vmatprep.subr.mxu1 %v74_v54  ;;  %v220_v19 = vld [vmem:[%s10664_s0 + $0x5a8] sm:$0xff]  ;;  %v222_v20 = vld [vmem:[%s10664_s0 + $0x5b8] sm:$0xff]  ;;  %v219_v21 = vld [vmem:[%s10664_s0 + $0x5a0] sm:$0xff]  ;;  %5687 = vst.msk [vmem:[#allocation2 + $0xd8] sm:$0xff] %vm922_vm0, %v7753_v3 }
  0x1d   :  { %328 = vmatpush1.msra.mxu0 %v71_v55  ;;  %399 = vmatpush1.msra.mxu1 %v73_v56  ;;  %v221_v22 = vld [vmem:[%s10664_s0 + $0x5b0] sm:$0xff]  ;;  %v204_v23 = vld [vmem:[%s10664_s0 + $0x528] sm:$0xff]  ;;  %v206_v24 = vld [vmem:[%s10664_s0 + $0x538] sm:$0xff]  ;;  %5688 = vst.msk [vmem:[#allocation2 + $0xe0] sm:$0xff] %vm922_vm0, %v7753_v3 }
  0x1e   :  { %329 = vmatprep.subr.mxu0 %v56_v57  ;;  %400 = vmatprep.subr.mxu1 %v58_v58  ;;  %v203_v25 = vld [vmem:[%s10664_s0 + $0x520] sm:$0xff]  ;;  %v205_v26 = vld [vmem:[%s10664_s0 + $0x530] sm:$0xff]  ;;  %v188_v27 = vld [vmem:[%s10664_s0 + $0x4a8] sm:$0xff]  ;;  %5689 = vst.msk [vmem:[#allocation2 + $0xe8] sm:$0xff] %vm922_vm0, %v7753_v3 }
  0x1f   :  { %330 = vmatpush1.msra.mxu0 %v55_v59  ;;  %401 = vmatpush1.msra.mxu1 %v57_v60  ;;  %v190_v28 = vld [vmem:[%s10664_s0 + $0x4b8] sm:$0xff]  ;;  %v187_v29 = vld [vmem:[%s10664_s0 + $0x4a0] sm:$0xff]  ;;  %v189_v30 = vld [vmem:[%s10664_s0 + $0x4b0] sm:$0xff]  ;;  %5690 = vst.msk [vmem:[#allocation2 + $0xf0] sm:$0xff] %vm922_vm0, %v7753_v3 }
  0x20   :  { %331 = vmatprep.subr.mxu0 %v40_v61  ;;  %402 = vmatprep.subr.mxu1 %v42_v62  ;;  %v172_v31 = vld [vmem:[%s10664_s0 + $0x428] sm:$0xff]  ;;  %v174_v32 = vld [vmem:[%s10664_s0 + $0x438] sm:$0xff]  ;;  %v171_v33 = vld [vmem:[%s10664_s0 + $0x420] sm:$0xff]  ;;  %5691 = vst.msk [vmem:[#allocation2 + $0xf8] sm:$0xff] %vm922_vm0, %v7753_v3 }
  0x21   :  { %332 = vmatpush1.msra.mxu0 %v39_v63  ;;  %403 = vmatpush1.msra.mxu1 %v41_v0  ;;  %v173_v34 = vld [vmem:[%s10664_s0 + $0x430] sm:$0xff]  ;;  %v156_v35 = vld [vmem:[%s10664_s0 + $0x3a8] sm:$0xff]  ;;  %v158_v36 = vld [vmem:[%s10664_s0 + $0x3b8] sm:$0xff]  ;;  %5692 = vst.msk [vmem:[#allocation2 + $0x100] sm:$0xff] %vm922_vm0, %v7753_v3 }
  0x22   :  { %366 = vmatmul.mubr.f32.vlgmr.msra.gmra.mxu0 %v8071_v1  ;;  %443 = vmatprep.subr.mxu0 %v284_v2  ;;  %v155_v37 = vld [vmem:[%s10664_s0 + $0x3a0] sm:$0xff]  ;;  %v157_v38 = vld [vmem:[%s10664_s0 + $0x3b0] sm:$0xff]  ;;  %v140_v39 = vld [vmem:[%s10664_s0 + $0x328] sm:$0xff]  ;;  %5693 = vst.msk [vmem:[#allocation2 + $0x108] sm:$0xff] %vm922_vm0, %v7753_v3 }
  0x23   :  { %514 = vmatprep.subr.mxu1 %v286_v4  ;;  %437 = vmatmul.mubr.f32.vlgmr.msra.gmra.mxu1 %v8071_v1  ;;  %v142_v40 = vld [vmem:[%s10664_s0 + $0x338] sm:$0xff]  ;;  %v139_v41 = vld [vmem:[%s10664_s0 + $0x320] sm:$0xff]  ;;  %v141_v42 = vld [vmem:[%s10664_s0 + $0x330] sm:$0xff]  ;;  %5694 = vst.msk [vmem:[#allocation2 + $0x110] sm:$0xff] %vm922_vm0, %v7753_v3 }
  0x24   :  { %444 = vmatpush1.msra.mxu0 %v283_v5  ;;  %515 = vmatpush1.msra.mxu1 %v285_v6  ;;  %v124_v43 = vld [vmem:[%s10664_s0 + $0x2a8] sm:$0xff]  ;;  %v126_v44 = vld [vmem:[%s10664_s0 + $0x2b8] sm:$0xff]  ;;  %v123_v45 = vld [vmem:[%s10664_s0 + $0x2a0] sm:$0xff]  ;;  %5695 = vst.msk [vmem:[#allocation2 + $0x118] sm:$0xff] %vm922_vm0, %v7753_v3 }
  0x25   :  { %445 = vmatprep.subr.mxu0 %v268_v7  ;;  %516 = vmatprep.subr.mxu1 %v270_v8  ;;  %v125_v46 = vld [vmem:[%s10664_s0 + $0x2b0] sm:$0xff]  ;;  %v108_v47 = vld [vmem:[%s10664_s0 + $0x228] sm:$0xff]  ;;  %v110_v48 = vld [vmem:[%s10664_s0 + $0x238] sm:$0xff]  ;;  %5696 = vst.msk [vmem:[#allocation2 + $0x120] sm:$0xff] %vm922_vm0, %v7753_v3 }
  0x26   :  { %446 = vmatpush1.msra.mxu0 %v267_v9  ;;  %517 = vmatpush1.msra.mxu1 %v269_v10  ;;  %v107_v49 = vld [vmem:[%s10664_s0 + $0x220] sm:$0xff]  ;;  %v109_v50 = vld [vmem:[%s10664_s0 + $0x230] sm:$0xff]  ;;  %v92_v51 = vld [vmem:[%s10664_s0 + $0x1a8] sm:$0xff]  ;;  %5697 = vst.msk [vmem:[#allocation2 + $0x128] sm:$0xff] %vm922_vm0, %v7753_v3 }
  0x27   :  { %447 = vmatprep.subr.mxu0 %v252_v11  ;;  %518 = vmatprep.subr.mxu1 %v254_v12  ;;  %v94_v52 = vld [vmem:[%s10664_s0 + $0x1b8] sm:$0xff]  ;;  %v91_v53 = vld [vmem:[%s10664_s0 + $0x1a0] sm:$0xff]  ;;  %v93_v54 = vld [vmem:[%s10664_s0 + $0x1b0] sm:$0xff]  ;;  %5698 = vst.msk [vmem:[#allocation2 + $0x130] sm:$0xff] %vm922_vm0, %v7753_v3 }
  0x28   :  { %448 = vmatpush1.msra.mxu0 %v251_v13  ;;  %519 = vmatpush1.msra.mxu1 %v253_v14  ;;  %v76_v55 = vld [vmem:[%s10664_s0 + $0x128] sm:$0xff]  ;;  %v78_v56 = vld [vmem:[%s10664_s0 + $0x138] sm:$0xff]  ;;  %v75_v57 = vld [vmem:[%s10664_s0 + $0x120] sm:$0xff]  ;;  %5699 = vst.msk [vmem:[#allocation2 + $0x138] sm:$0xff] %vm922_vm0, %v7753_v3 }
  0x29   :  { %449 = vmatprep.subr.mxu0 %v236_v15  ;;  %520 = vmatprep.subr.mxu1 %v238_v16  ;;  %v77_v58 = vld [vmem:[%s10664_s0 + $0x130] sm:$0xff]  ;;  %v60_v59 = vld [vmem:[%s10664_s0 + $0xa8] sm:$0xff]  ;;  %v62_v60 = vld [vmem:[%s10664_s0 + $0xb8] sm:$0xff]  ;;  %5700 = vst.msk [vmem:[#allocation2 + $0x140] sm:$0xff] %vm922_vm0, %v7753_v3 }
  0x2a   :  { %450 = vmatpush1.msra.mxu0 %v235_v17  ;;  %521 = vmatpush1.msra.mxu1 %v237_v18  ;;  %v59_v61 = vld [vmem:[%s10664_s0 + $0xa0] sm:$0xff]  ;;  %v61_v62 = vld [vmem:[%s10664_s0 + $0xb0] sm:$0xff]  ;;  %v44_v63 = vld [vmem:[%s10664_s0 + $0x28] sm:$0xff]  ;;  %5701 = vst.msk [vmem:[#allocation2 + $0x148] sm:$0xff] %vm922_vm0, %v7753_v3 }
  0x2b   :  { %451 = vmatprep.subr.mxu0 %v220_v19  ;;  %522 = vmatprep.subr.mxu1 %v222_v20  ;;  %v46_v0 = vld [vmem:[%s10664_s0 + $0x38] sm:$0xff]  ;;  %v43_v2 = vld [vmem:[%s10664_s0 + $0x20] sm:$0xff]  ;;  %v45_v4 = vld [vmem:[%s10664_s0 + $0x30] sm:$0xff]  ;;  %5702 = vst.msk [vmem:[#allocation2 + $0x150] sm:$0xff] %vm922_vm0, %v7753_v3 }
  0x2c   :  { %452 = vmatpush1.msra.mxu0 %v219_v21  ;;  %523 = vmatpush1.msra.mxu1 %v221_v22  ;;  %v288_v5 = vld [vmem:[%s10664_s0 + $0x7c8] sm:$0xff]  ;;  %v290_v6 = vld [vmem:[%s10664_s0 + $0x7d8] sm:$0xff]  ;;  %v287_v7 = vld [vmem:[%s10664_s0 + $0x7c0] sm:$0xff]  ;;  %5703 = vst.msk [vmem:[#allocation2 + $0x158] sm:$0xff] %vm922_vm0, %v7753_v3 }
  0x2d   :  { %453 = vmatprep.subr.mxu0 %v204_v23  ;;  %524 = vmatprep.subr.mxu1 %v206_v24  ;;  %v289_v8 = vld [vmem:[%s10664_s0 + $0x7d0] sm:$0xff]  ;;  %v272_v9 = vld [vmem:[%s10664_s0 + $0x748] sm:$0xff]  ;;  %v274_v10 = vld [vmem:[%s10664_s0 + $0x758] sm:$0xff]  ;;  %5704 = vst.msk [vmem:[#allocation2 + $0x160] sm:$0xff] %vm922_vm0, %v7753_v3 }
  0x2e   :  { %454 = vmatpush1.msra.mxu0 %v203_v25  ;;  %525 = vmatpush1.msra.mxu1 %v205_v26  ;;  %v271_v11 = vld [vmem:[%s10664_s0 + $0x740] sm:$0xff]  ;;  %v273_v12 = vld [vmem:[%s10664_s0 + $0x750] sm:$0xff]  ;;  %v256_v13 = vld [vmem:[%s10664_s0 + $0x6c8] sm:$0xff]  ;;  %5705 = vst.msk [vmem:[#allocation2 + $0x168] sm:$0xff] %vm922_vm0, %v7753_v3 }
  0x2f   :  { %455 = vmatprep.subr.mxu0 %v188_v27  ;;  %526 = vmatprep.subr.mxu1 %v190_v28  ;;  %v258_v14 = vld [vmem:[%s10664_s0 + $0x6d8] sm:$0xff]  ;;  %v255_v15 = vld [vmem:[%s10664_s0 + $0x6c0] sm:$0xff]  ;;  %v257_v16 = vld [vmem:[%s10664_s0 + $0x6d0] sm:$0xff]  ;;  %5706 = vst.msk [vmem:[#allocation2 + $0x170] sm:$0xff] %vm922_vm0, %v7753_v3 }
  0x30   :  { %456 = vmatpush1.msra.mxu0 %v187_v29  ;;  %527 = vmatpush1.msra.mxu1 %v189_v30  ;;  %v240_v17 = vld [vmem:[%s10664_s0 + $0x648] sm:$0xff]  ;;  %v242_v18 = vld [vmem:[%s10664_s0 + $0x658] sm:$0xff]  ;;  %v239_v19 = vld [vmem:[%s10664_s0 + $0x640] sm:$0xff]  ;;  %5707 = vst.msk [vmem:[#allocation2 + $0x178] sm:$0xff] %vm922_vm0, %v7753_v3 }
  0x31   :  { %457 = vmatprep.subr.mxu0 %v172_v31  ;;  %528 = vmatprep.subr.mxu1 %v174_v32  ;;  %v241_v20 = vld [vmem:[%s10664_s0 + $0x650] sm:$0xff]  ;;  %v224_v21 = vld [vmem:[%s10664_s0 + $0x5c8] sm:$0xff]  ;;  %v226_v22 = vld [vmem:[%s10664_s0 + $0x5d8] sm:$0xff]  ;;  %5708 = vst.msk [vmem:[#allocation2 + $0x180] sm:$0xff] %vm922_vm0, %v7753_v3 }
  0x32   :  { %458 = vmatpush1.msra.mxu0 %v171_v33  ;;  %529 = vmatpush1.msra.mxu1 %v173_v34  ;;  %v223_v23 = vld [vmem:[%s10664_s0 + $0x5c0] sm:$0xff]  ;;  %v225_v24 = vld [vmem:[%s10664_s0 + $0x5d0] sm:$0xff]  ;;  %v208_v25 = vld [vmem:[%s10664_s0 + $0x548] sm:$0xff]  ;;  %5709 = vst.msk [vmem:[#allocation2 + $0x188] sm:$0xff] %vm922_vm0, %v7753_v3 }
  0x33   :  { %459 = vmatprep.subr.mxu0 %v156_v35  ;;  %530 = vmatprep.subr.mxu1 %v158_v36  ;;  %v210_v26 = vld [vmem:[%s10664_s0 + $0x558] sm:$0xff]  ;;  %v207_v27 = vld [vmem:[%s10664_s0 + $0x540] sm:$0xff]  ;;  %v209_v28 = vld [vmem:[%s10664_s0 + $0x550] sm:$0xff]  ;;  %5710 = vst.msk [vmem:[#allocation2 + $0x190] sm:$0xff] %vm922_vm0, %v7753_v3 }
  0x34   :  { %460 = vmatpush1.msra.mxu0 %v155_v37  ;;  %531 = vmatpush1.msra.mxu1 %v157_v38  ;;  %v192_v29 = vld [vmem:[%s10664_s0 + $0x4c8] sm:$0xff]  ;;  %v194_v30 = vld [vmem:[%s10664_s0 + $0x4d8] sm:$0xff]  ;;  %v191_v31 = vld [vmem:[%s10664_s0 + $0x4c0] sm:$0xff]  ;;  %5711 = vst.msk [vmem:[#allocation2 + $0x198] sm:$0xff] %vm922_vm0, %v7753_v3 }
  0x35   :  { %461 = vmatprep.subr.mxu0 %v140_v39  ;;  %532 = vmatprep.subr.mxu1 %v142_v40  ;;  %v193_v32 = vld [vmem:[%s10664_s0 + $0x4d0] sm:$0xff]  ;;  %v176_v33 = vld [vmem:[%s10664_s0 + $0x448] sm:$0xff]  ;;  %v178_v34 = vld [vmem:[%s10664_s0 + $0x458] sm:$0xff]  ;;  %5712 = vst.msk [vmem:[#allocation2 + $0x1a0] sm:$0xff] %vm922_vm0, %v7753_v3 }
  0x36   :  { %462 = vmatpush1.msra.mxu0 %v139_v41  ;;  %533 = vmatpush1.msra.mxu1 %v141_v42  ;;  %v175_v35 = vld [vmem:[%s10664_s0 + $0x440] sm:$0xff]  ;;  %v177_v36 = vld [vmem:[%s10664_s0 + $0x450] sm:$0xff]  ;;  %v160_v37 = vld [vmem:[%s10664_s0 + $0x3c8] sm:$0xff]  ;;  %5713 = vst.msk [vmem:[#allocation2 + $0x1a8] sm:$0xff] %vm922_vm0, %v7753_v3 }
  0x37   :  { %463 = vmatprep.subr.mxu0 %v124_v43  ;;  %534 = vmatprep.subr.mxu1 %v126_v44  ;;  %v162_v38 = vld [vmem:[%s10664_s0 + $0x3d8] sm:$0xff]  ;;  %v159_v39 = vld [vmem:[%s10664_s0 + $0x3c0] sm:$0xff]  ;;  %v161_v40 = vld [vmem:[%s10664_s0 + $0x3d0] sm:$0xff]  ;;  %5714 = vst.msk [vmem:[#allocation2 + $0x1b0] sm:$0xff] %vm922_vm0, %v7753_v3 }
  0x38   :  { %464 = vmatpush1.msra.mxu0 %v123_v45  ;;  %535 = vmatpush1.msra.mxu1 %v125_v46  ;;  %v144_v41 = vld [vmem:[%s10664_s0 + $0x348] sm:$0xff]  ;;  %v146_v42 = vld [vmem:[%s10664_s0 + $0x358] sm:$0xff]  ;;  %v143_v43 = vld [vmem:[%s10664_s0 + $0x340] sm:$0xff]  ;;  %5715 = vst.msk [vmem:[#allocation2 + $0x1b8] sm:$0xff] %vm922_vm0, %v7753_v3 }
  0x39   :  { %465 = vmatprep.subr.mxu0 %v108_v47  ;;  %536 = vmatprep.subr.mxu1 %v110_v48  ;;  %v145_v44 = vld [vmem:[%s10664_s0 + $0x350] sm:$0xff]  ;;  %v128_v45 = vld [vmem:[%s10664_s0 + $0x2c8] sm:$0xff]  ;;  %v130_v46 = vld [vmem:[%s10664_s0 + $0x2d8] sm:$0xff]  ;;  %5716 = vst.msk [vmem:[#allocation2 + $0x1c0] sm:$0xff] %vm922_vm0, %v7753_v3 }
  0x3a   :  { %466 = vmatpush1.msra.mxu0 %v107_v49  ;;  %537 = vmatpush1.msra.mxu1 %v109_v50  ;;  %v127_v47 = vld [vmem:[%s10664_s0 + $0x2c0] sm:$0xff]  ;;  %v129_v48 = vld [vmem:[%s10664_s0 + $0x2d0] sm:$0xff]  ;;  %v112_v49 = vld [vmem:[%s10664_s0 + $0x248] sm:$0xff]  ;;  %5717 = vst.msk [vmem:[#allocation2 + $0x1c8] sm:$0xff] %vm922_vm0, %v7753_v3 }
  0x3b   :  { %467 = vmatprep.subr.mxu0 %v92_v51  ;;  %538 = vmatprep.subr.mxu1 %v94_v52  ;;  %v114_v50 = vld [vmem:[%s10664_s0 + $0x258] sm:$0xff]  ;;  %v111_v51 = vld [vmem:[%s10664_s0 + $0x240] sm:$0xff]  ;;  %v113_v52 = vld [vmem:[%s10664_s0 + $0x250] sm:$0xff]  ;;  %5718 = vst.msk [vmem:[#allocation2 + $0x1d0] sm:$0xff] %vm922_vm0, %v7753_v3 }
  0x3c   :  { %468 = vmatpush1.msra.mxu0 %v91_v53  ;;  %539 = vmatpush1.msra.mxu1 %v93_v54  ;;  %v96_v53 = vld [vmem:[%s10664_s0 + $0x1c8] sm:$0xff]  ;;  %v98_v54 = vld [vmem:[%s10664_s0 + $0x1d8] sm:$0xff]  ;;  %5719 = vst.msk [vmem:[#allocation2 + $0x1d8] sm:$0xff] %vm922_vm0, %v7753_v3  ;;  %5720 = vst.msk [vmem:[#allocation2 + $0x1e0] sm:$0xff] %vm922_vm0, %v7753_v3 }
  0x3d   :  { %469 = vmatprep.subr.mxu0 %v76_v55  ;;  %540 = vmatprep.subr.mxu1 %v78_v56  ;;  %v95_v55 = vld [vmem:[%s10664_s0 + $0x1c0] sm:$0xff]  ;;  %v97_v56 = vld [vmem:[%s10664_s0 + $0x1d0] sm:$0xff]  ;;  %5721 = vst.msk [vmem:[#allocation2 + $0x1e8] sm:$0xff] %vm922_vm0, %v7753_v3  ;;  %5722 = vst.msk [vmem:[#allocation2 + $0x1f0] sm:$0xff] %vm922_vm0, %v7753_v3 }
  0x3e   :  { %470 = vmatpush1.msra.mxu0 %v75_v57  ;;  %541 = vmatpush1.msra.mxu1 %v77_v58  ;;  %v80_v57 = vld [vmem:[%s10664_s0 + $0x148] sm:$0xff]  ;;  %v82_v58 = vld [vmem:[%s10664_s0 + $0x158] sm:$0xff]  ;;  %5723 = vst.msk [vmem:[#allocation2 + $0x1f8] sm:$0xff] %vm922_vm0, %v7753_v3 }
  0x3f   :  { %471 = vmatprep.subr.mxu0 %v60_v59  ;;  %542 = vmatprep.subr.mxu1 %v62_v60  ;;  %v79_v59 = vld [vmem:[%s10664_s0 + $0x140] sm:$0xff]  ;;  %v81_v60 = vld [vmem:[%s10664_s0 + $0x150] sm:$0xff] }
  0x40   :  { %472 = vmatpush1.msra.mxu0 %v59_v61  ;;  %543 = vmatpush1.msra.mxu1 %v61_v62  ;;  %v64_v61 = vld [vmem:[%s10664_s0 + $0xc8] sm:$0xff]  ;;  %v66_v62 = vld [vmem:[%s10664_s0 + $0xd8] sm:$0xff] }
  0x41   :  { %473 = vmatprep.subr.mxu0 %v44_v63  ;;  %544 = vmatprep.subr.mxu1 %v46_v0  ;;  %v63_v63 = vld [vmem:[%s10664_s0 + $0xc0] sm:$0xff]  ;;  %v65_v0 = vld [vmem:[%s10664_s0 + $0xd0] sm:$0xff] }
  0x42   :  { %474 = vmatpush1.msra.mxu0 %v43_v2  ;;  %507 = vmatprep.mubr.f32.mxu0 %v7753_v3  ;;  %v48_v2 = vld [vmem:[%s10664_s0 + $0x48] sm:$0xff] }
  0x43   :  { %545 = vmatpush1.msra.mxu1 %v45_v4  ;;  %578 = vmatprep.mubr.f32.mxu1 %v7753_v3  ;;  %v50_v4 = vld [vmem:[%s10664_s0 + $0x58] sm:$0xff] }
  0x44   :  { %508 = vmatmul.mubr.f32.vlgmr.msra.gmra.mxu0 %v8071_v1  ;;  %579 = vmatmul.mubr.f32.vlgmr.msra.gmra.mxu1 %v8071_v1 }
  0x45   :  { %585 = vmatprep.subr.mxu0 %v288_v5  ;;  %656 = vmatprep.subr.mxu1 %v290_v6  ;;  %v47_v5 = vld [vmem:[%s10664_s0 + $0x40] sm:$0xff]  ;;  %v49_v6 = vld [vmem:[%s10664_s0 + $0x50] sm:$0xff] }
  0x46   :  { %586 = vmatpush1.msra.mxu0 %v287_v7  ;;  %657 = vmatpush1.msra.mxu1 %v289_v8  ;;  %v292_v7 = vld [vmem:[%s10664_s0 + $0x7e8] sm:$0xff]  ;;  %v294_v8 = vld [vmem:[%s10664_s0 + $0x7f8] sm:$0xff] }
  0x47   :  { %587 = vmatprep.subr.mxu0 %v272_v9  ;;  %658 = vmatprep.subr.mxu1 %v274_v10  ;;  %v291_v9 = vld [vmem:[%s10664_s0 + $0x7e0] sm:$0xff]  ;;  %v293_v10 = vld [vmem:[%s10664_s0 + $0x7f0] sm:$0xff] }
  0x48   :  { %588 = vmatpush1.msra.mxu0 %v271_v11  ;;  %659 = vmatpush1.msra.mxu1 %v273_v12  ;;  %v276_v11 = vld [vmem:[%s10664_s0 + $0x768] sm:$0xff]  ;;  %v278_v12 = vld [vmem:[%s10664_s0 + $0x778] sm:$0xff] }
  0x49   :  { %589 = vmatprep.subr.mxu0 %v256_v13  ;;  %660 = vmatprep.subr.mxu1 %v258_v14  ;;  %v275_v13 = vld [vmem:[%s10664_s0 + $0x760] sm:$0xff]  ;;  %v277_v14 = vld [vmem:[%s10664_s0 + $0x770] sm:$0xff] }
  0x4a   :  { %590 = vmatpush1.msra.mxu0 %v255_v15  ;;  %661 = vmatpush1.msra.mxu1 %v257_v16  ;;  %v260_v15 = vld [vmem:[%s10664_s0 + $0x6e8] sm:$0xff]  ;;  %v262_v16 = vld [vmem:[%s10664_s0 + $0x6f8] sm:$0xff] }
  0x4b   :  { %591 = vmatprep.subr.mxu0 %v240_v17  ;;  %662 = vmatprep.subr.mxu1 %v242_v18  ;;  %v259_v17 = vld [vmem:[%s10664_s0 + $0x6e0] sm:$0xff]  ;;  %v261_v18 = vld [vmem:[%s10664_s0 + $0x6f0] sm:$0xff] }
  0x4c   :  { %592 = vmatpush1.msra.mxu0 %v239_v19  ;;  %663 = vmatpush1.msra.mxu1 %v241_v20  ;;  %v295_v19 = vld [vmem:[%s10666_s2] sm:$0xff]  ;;  %v244_v20 = vld [vmem:[%s10664_s0 + $0x668] sm:$0xff]  ;;  %s7764_s2 = smov 100  }
  0x4d   :  { %593 = vmatprep.subr.mxu0 %v224_v21  ;;  %664 = vmatprep.subr.mxu1 %v226_v22  ;;  %v246_v21 = vld [vmem:[%s10664_s0 + $0x678] sm:$0xff]  ;;  %v7754_v22 = vmov 0  }
  0x4e   :  { %594 = vmatpush1.msra.mxu0 %v223_v23  ;;  %665 = vmatpush1.msra.mxu1 %v225_v24  ;;  %v243_v23 = vld [vmem:[%s10664_s0 + $0x660] sm:$0xff]  ;;  %v245_v24 = vld [vmem:[%s10664_s0 + $0x670] sm:$0xff] }
  0x4f   :  { %595 = vmatprep.subr.mxu0 %v208_v25  ;;  %666 = vmatprep.subr.mxu1 %v210_v26  ;;  %v228_v25 = vld [vmem:[%s10664_s0 + $0x5e8] sm:$0xff]  ;;  %v230_v26 = vld [vmem:[%s10664_s0 + $0x5f8] sm:$0xff] }
  0x50   :  { %596 = vmatpush1.msra.mxu0 %v207_v27  ;;  %667 = vmatpush1.msra.mxu1 %v209_v28  ;;  %v227_v27 = vld [vmem:[%s10664_s0 + $0x5e0] sm:$0xff]  ;;  %v229_v28 = vld [vmem:[%s10664_s0 + $0x5f0] sm:$0xff] }
  0x51   :  { %597 = vmatprep.subr.mxu0 %v192_v29  ;;  %668 = vmatprep.subr.mxu1 %v194_v30  ;;  %v212_v29 = vld [vmem:[%s10664_s0 + $0x568] sm:$0xff]  ;;  %v214_v30 = vld [vmem:[%s10664_s0 + $0x578] sm:$0xff] }
  0x52   :  { %598 = vmatpush1.msra.mxu0 %v191_v31  ;;  %669 = vmatpush1.msra.mxu1 %v193_v32  ;;  %v211_v31 = vld [vmem:[%s10664_s0 + $0x560] sm:$0xff]  ;;  %v213_v32 = vld [vmem:[%s10664_s0 + $0x570] sm:$0xff] }
  0x53   :  { %599 = vmatprep.subr.mxu0 %v176_v33  ;;  %670 = vmatprep.subr.mxu1 %v178_v34  ;;  %v196_v33 = vld [vmem:[%s10664_s0 + $0x4e8] sm:$0xff]  ;;  %v198_v34 = vld [vmem:[%s10664_s0 + $0x4f8] sm:$0xff] }
  0x54   :  { %600 = vmatpush1.msra.mxu0 %v175_v35  ;;  %671 = vmatpush1.msra.mxu1 %v177_v36  ;;  %v195_v35 = vld [vmem:[%s10664_s0 + $0x4e0] sm:$0xff]  ;;  %v197_v36 = vld [vmem:[%s10664_s0 + $0x4f0] sm:$0xff] }
  0x55   :  { %601 = vmatprep.subr.mxu0 %v160_v37  ;;  %672 = vmatprep.subr.mxu1 %v162_v38  ;;  %v180_v37 = vld [vmem:[%s10664_s0 + $0x468] sm:$0xff]  ;;  %v182_v38 = vld [vmem:[%s10664_s0 + $0x478] sm:$0xff] }
  0x56   :  { %602 = vmatpush1.msra.mxu0 %v159_v39  ;;  %673 = vmatpush1.msra.mxu1 %v161_v40  ;;  %v179_v39 = vld [vmem:[%s10664_s0 + $0x460] sm:$0xff]  ;;  %v181_v40 = vld [vmem:[%s10664_s0 + $0x470] sm:$0xff] }
  0x57   :  { %603 = vmatprep.subr.mxu0 %v144_v41  ;;  %674 = vmatprep.subr.mxu1 %v146_v42  ;;  %v164_v41 = vld [vmem:[%s10664_s0 + $0x3e8] sm:$0xff]  ;;  %v166_v42 = vld [vmem:[%s10664_s0 + $0x3f8] sm:$0xff] }
  0x58   :  { %604 = vmatpush1.msra.mxu0 %v143_v43  ;;  %675 = vmatpush1.msra.mxu1 %v145_v44  ;;  %v163_v43 = vld [vmem:[%s10664_s0 + $0x3e0] sm:$0xff]  ;;  %v165_v44 = vld [vmem:[%s10664_s0 + $0x3f0] sm:$0xff] }
  0x59   :  { %605 = vmatprep.subr.mxu0 %v128_v45  ;;  %676 = vmatprep.subr.mxu1 %v130_v46  ;;  %v148_v45 = vld [vmem:[%s10664_s0 + $0x368] sm:$0xff]  ;;  %v150_v46 = vld [vmem:[%s10664_s0 + $0x378] sm:$0xff] }
  0x5a   :  { %606 = vmatpush1.msra.mxu0 %v127_v47  ;;  %677 = vmatpush1.msra.mxu1 %v129_v48  ;;  %v147_v47 = vld [vmem:[%s10664_s0 + $0x360] sm:$0xff]  ;;  %v149_v48 = vld [vmem:[%s10664_s0 + $0x370] sm:$0xff] }
  0x5b   :  { %607 = vmatprep.subr.mxu0 %v112_v49  ;;  %678 = vmatprep.subr.mxu1 %v114_v50  ;;  %v132_v49 = vld [vmem:[%s10664_s0 + $0x2e8] sm:$0xff]  ;;  %v134_v50 = vld [vmem:[%s10664_s0 + $0x2f8] sm:$0xff] }
  0x5c   :  { %608 = vmatpush1.msra.mxu0 %v111_v51  ;;  %679 = vmatpush1.msra.mxu1 %v113_v52  ;;  %v131_v51 = vld [vmem:[%s10664_s0 + $0x2e0] sm:$0xff]  ;;  %v133_v52 = vld [vmem:[%s10664_s0 + $0x2f0] sm:$0xff] }
  0x5d   :  { %609 = vmatprep.subr.mxu0 %v96_v53  ;;  %680 = vmatprep.subr.mxu1 %v98_v54  ;;  %v116_v53 = vld [vmem:[%s10664_s0 + $0x268] sm:$0xff]  ;;  %v118_v54 = vld [vmem:[%s10664_s0 + $0x278] sm:$0xff] }
  0x5e   :  { %610 = vmatpush1.msra.mxu0 %v95_v55  ;;  %681 = vmatpush1.msra.mxu1 %v97_v56  ;;  %v115_v55 = vld [vmem:[%s10664_s0 + $0x260] sm:$0xff]  ;;  %v117_v56 = vld [vmem:[%s10664_s0 + $0x270] sm:$0xff] }
  0x5f   :  { %611 = vmatprep.subr.mxu0 %v80_v57  ;;  %682 = vmatprep.subr.mxu1 %v82_v58  ;;  %v100_v57 = vld [vmem:[%s10664_s0 + $0x1e8] sm:$0xff]  ;;  %v102_v58 = vld [vmem:[%s10664_s0 + $0x1f8] sm:$0xff] }
  0x60   :  { %612 = vmatpush1.msra.mxu0 %v79_v59  ;;  %683 = vmatpush1.msra.mxu1 %v81_v60  ;;  %v99_v59 = vld [vmem:[%s10664_s0 + $0x1e0] sm:$0xff]  ;;  %v101_v60 = vld [vmem:[%s10664_s0 + $0x1f0] sm:$0xff] }
  0x61   :  { %613 = vmatprep.subr.mxu0 %v64_v61  ;;  %684 = vmatprep.subr.mxu1 %v66_v62  ;;  %v84_v61 = vld [vmem:[%s10664_s0 + $0x168] sm:$0xff]  ;;  %v86_v62 = vld [vmem:[%s10664_s0 + $0x178] sm:$0xff] }
  0x62   :  { %614 = vmatpush1.msra.mxu0 %v63_v63  ;;  %685 = vmatpush1.msra.mxu1 %v65_v0  ;;  %v83_v63 = vld [vmem:[%s10664_s0 + $0x160] sm:$0xff]  ;;  %v85_v0 = vld [vmem:[%s10664_s0 + $0x170] sm:$0xff] }
  0x63   :  { %615 = vmatprep.subr.mxu0 %v48_v2  ;;  %686 = vmatprep.subr.mxu1 %v50_v4  ;;  %v68_v2 = vld [vmem:[%s10664_s0 + $0xe8] sm:$0xff]  ;;  %v70_v4 = vld [vmem:[%s10664_s0 + $0xf8] sm:$0xff] }
  0x64   :  { %616 = vmatpush1.msra.mxu0 %v47_v5  ;;  %649 = vmatprep.mubr.f32.mxu0 %v7753_v3  ;;  %v67_v5 = vld [vmem:[%s10664_s0 + $0xe0] sm:$0xff] }
  0x65   :  { %687 = vmatpush1.msra.mxu1 %v49_v6  ;;  %650 = vmatmul.mubr.f32.vlgmr.msra.gmra.mxu0 %v8071_v1  ;;  %v69_v6 = vld [vmem:[%s10664_s0 + $0xf0] sm:$0xff] }
  0x66   :  { %720 = vmatprep.mubr.f32.mxu1 %v7753_v3  ;;  %727 = vmatprep.subr.mxu0 %v292_v7  ;;  %v52_v7 = vld [vmem:[%s10664_s0 + $0x68] sm:$0xff] }
  0x67   :  { %798 = vmatprep.subr.mxu1 %v294_v8  ;;  %721 = vmatmul.mubr.f32.vlgmr.msra.gmra.mxu1 %v8071_v1  ;;  %v54_v8 = vld [vmem:[%s10664_s0 + $0x78] sm:$0xff] }
  0x68   :  { %728 = vmatpush1.msra.mxu0 %v291_v9  ;;  %799 = vmatpush1.msra.mxu1 %v293_v10  ;;  %v51_v9 = vld [vmem:[%s10664_s0 + $0x60] sm:$0xff]  ;;  %v53_v10 = vld [vmem:[%s10664_s0 + $0x70] sm:$0xff]  ;;  %s7755_s0 = smov 127  }
  0x69   :  { %729 = vmatprep.subr.mxu0 %v276_v11  ;;  %800 = vmatprep.subr.mxu1 %v278_v12 }
  0x6a   :  { %730 = vmatpush1.msra.mxu0 %v275_v13  ;;  %801 = vmatpush1.msra.mxu1 %v277_v14 }
  0x6b   :  { %731 = vmatprep.subr.mxu0 %v260_v15  ;;  %802 = vmatprep.subr.mxu1 %v262_v16 }
  0x6c   :  { %7751 = vset.pattern.permute.xlu0 %v7754_v22  ;;  %732 = vmatpush1.msra.mxu0 %v259_v17 }
  0x6d   :  { %803 = vmatpush1.msra.mxu1 %v261_v18  ;;  %298 = vperm.xlu0 %7751, %v295_v19  }
  0x6e   :  { %733 = vmatprep.subr.mxu0 %v244_v20  ;;  %804 = vmatprep.subr.mxu1 %v246_v21 }
  0x6f   :  { %734 = vmatpush1.msra.mxu0 %v243_v23  ;;  %805 = vmatpush1.msra.mxu1 %v245_v24 }
  0x70   :  { %735 = vmatprep.subr.mxu0 %v228_v25  ;;  %806 = vmatprep.subr.mxu1 %v230_v26 }
  0x71   :  { %736 = vmatpush1.msra.mxu0 %v227_v27  ;;  %807 = vmatpush1.msra.mxu1 %v229_v28 }
  0x72   :  { %737 = vmatprep.subr.mxu0 %v212_v29  ;;  %808 = vmatprep.subr.mxu1 %v214_v30 }
  0x73   :  { %738 = vmatpush1.msra.mxu0 %v211_v31  ;;  %809 = vmatpush1.msra.mxu1 %v213_v32 }
  0x74   :  { %739 = vmatprep.subr.mxu0 %v196_v33  ;;  %810 = vmatprep.subr.mxu1 %v198_v34 }
  0x75   :  { %740 = vmatpush1.msra.mxu0 %v195_v35  ;;  %811 = vmatpush1.msra.mxu1 %v197_v36 }
  0x76   :  { %741 = vmatprep.subr.mxu0 %v180_v37  ;;  %812 = vmatprep.subr.mxu1 %v182_v38 }
  0x77   :  { %742 = vmatpush1.msra.mxu0 %v179_v39  ;;  %813 = vmatpush1.msra.mxu1 %v181_v40 }
  0x78   :  { %743 = vmatprep.subr.mxu0 %v164_v41  ;;  %814 = vmatprep.subr.mxu1 %v166_v42 }
  0x79   :  { %744 = vmatpush1.msra.mxu0 %v163_v43  ;;  %815 = vmatpush1.msra.mxu1 %v165_v44 }
  0x7a   :  { %745 = vmatprep.subr.mxu0 %v148_v45  ;;  %816 = vmatprep.subr.mxu1 %v150_v46 }
  0x7b   :  { %746 = vmatpush1.msra.mxu0 %v147_v47  ;;  %817 = vmatpush1.msra.mxu1 %v149_v48 }
  0x7c   :  { %747 = vmatprep.subr.mxu0 %v132_v49  ;;  %818 = vmatprep.subr.mxu1 %v134_v50 }
  0x7d   :  { %748 = vmatpush1.msra.mxu0 %v131_v51  ;;  %819 = vmatpush1.msra.mxu1 %v133_v52 }
  0x7e   :  { %749 = vmatprep.subr.mxu0 %v116_v53  ;;  %820 = vmatprep.subr.mxu1 %v118_v54 }
  0x7f   :  { %750 = vmatpush1.msra.mxu0 %v115_v55  ;;  %821 = vmatpush1.msra.mxu1 %v117_v56 }
  0x80   :  { %751 = vmatprep.subr.mxu0 %v100_v57  ;;  %822 = vmatprep.subr.mxu1 %v102_v58 }
  0x81   :  { %752 = vmatpush1.msra.mxu0 %v99_v59  ;;  %823 = vmatpush1.msra.mxu1 %v101_v60 }
  0x82   :  { %753 = vmatprep.subr.mxu0 %v84_v61  ;;  %824 = vmatprep.subr.mxu1 %v86_v62 }
  0x83   :  { %754 = vmatpush1.msra.mxu0 %v83_v63  ;;  %825 = vmatpush1.msra.mxu1 %v85_v0 }
  0x84   :  { %755 = vmatprep.subr.mxu0 %v68_v2  ;;  %826 = vmatprep.subr.mxu1 %v70_v4 }
  0x85   :  { %756 = vmatpush1.msra.mxu0 %v67_v5  ;;  %827 = vmatpush1.msra.mxu1 %v69_v6 }
  0x86   :  { %757 = vmatprep.subr.mxu0 %v52_v7  ;;  %828 = vmatprep.subr.mxu1 %v54_v8 }
  0x87   :  { %758 = vmatpush1.msra.mxu0 %v51_v9  ;;  %791 = vmatprep.mubr.f32.mxu0 %v7753_v3 }
  0x88   :  { %829 = vmatpush1.msra.mxu1 %v53_v10  ;;  %862 = vmatprep.mubr.f32.mxu1 %v7753_v3 }
  0x89   :  { %792 = vmatmul.mubr.f32.vlgmr.msra.gmra.mxu0 %v8071_v1  ;;  %863 = vmatmul.mubr.f32.vlgmr.msra.gmra.mxu1 %v8071_v1 }
  0x8a   :  { %993 = vmatprep.mubr.f32.mxu0 %v7753_v3  ;;  %1070 = vmatprep.mubr.f32.mxu1 %v7753_v3 }
  0x8b   :  { %7752 = vset.pattern.permute.xlu1 %v7754_v22 }
  0xe2   :  { %v367_v11 = vpop.f32.mrf.mxu0 }
  0xe3   :  { %v438_v12 = vpop.f32.mrf.mxu1 }
  0xe4   :  { %v369_v13 = vpop.f32.mrf.mxu0 }
  0xe5   :  { %v440_v14 = vpop.f32.mrf.mxu1 }
  0xe8   :  { %v8670_v21 = vpop.permute.xlu0 %298 }
  0xe9   :  { %v8673_v1 = vadd.f32 %v438_v12, %v8670_v21  ;;  %v8685_v27 = vadd.f32 %v369_v13, %v8670_v21  ;;  %v8688_v28 = vadd.f32 %v440_v14, %v8670_v21  ;;  %v8691_v29 = vadd.f32 %v367_v11, %v8670_v21  ;;  %v7206_v13 = vld [vmem:[%s10667_s3 + $0x10] sm:$0xff] }
  0xeb   :  { %v871_v30 = vmax.f32 %v8673_v1, 0.0  ;;  %v870_v49 = vmax.f32 %v8685_v27, 0.0  ;;  %v869_v57 = vmax.f32 %v8691_v29, 0.0  ;;  %v872_v0 = vmax.f32 %v8688_v28, 0.0  ;;  %v898_v27 = vld [vmem:[%s10667_s3 + $0x8] sm:$0xff] }
 0x104   :  { %v509_v15 = vpop.f32.mrf.mxu0  ;;  %v580_v16 = vpop.f32.mrf.mxu1 }
 0x105   :  { %v8676_v23 = vadd.f32 %v580_v16, %v8670_v21  ;;  %v8695_v31 = vadd.f32 %v509_v15, %v8670_v21 }
 0x106   :  { %v511_v17 = vpop.f32.mrf.mxu0  ;;  %v582_v18 = vpop.f32.mrf.mxu1 }
 0x107   :  { %v8679_v22 = vadd.f32 %v511_v17, %v8670_v21  ;;  %v875_v32 = vmax.f32 %v8676_v23, 0.0  ;;  %v8712_v40 = vadd.f32 %v582_v18, %v8670_v21  ;;  %v873_v50 = vmax.f32 %v8695_v31, 0.0  ;;  %v897_v23 = vld [vmem:[%s10667_s3] sm:$0xff] }
 0x108   :  { %v7216_v31 = vld [vmem:[%s10667_s3 + $0x20] sm:$0xff] }
 0x109   :  { %v874_v39 = vmax.f32 %v8679_v22, 0.0  ;;  %v887_v51 = vmax.f32 %v871_v30, %v875_v32  ;;  %v876_v59 = vmax.f32 %v8712_v40, 0.0  ;;  %v885_v2 = vmax.f32 %v869_v57, %v873_v50  ;;  %v7222_v40 = vld [vmem:[%s10667_s3 + $0x30] sm:$0xff] }
 0x10b   :  { %v886_v58 = vmax.f32 %v870_v49, %v874_v39  ;;  %v888_v6 = vmax.f32 %v872_v0, %v876_v59  ;;  %v7228_v49 = vld [vmem:[%s10667_s3 + $0x40] sm:$0xff]  ;;  %v7235_v0 = vld [vmem:[%s10667_s3 + $0x58] sm:$0xff] }
 0x125   :  { %v651_v19 = vpop.f32.mrf.mxu0 }
 0x126   :  { %v8699_v33 = vadd.f32 %v651_v19, %v8670_v21  ;;  %v7207_v19 = vld [vmem:[%s10667_s3 + $0x18] sm:$0xff] }
 0x127   :  { %v722_v20 = vpop.f32.mrf.mxu1  ;;  %v653_v24 = vpop.f32.mrf.mxu0 }
 0x128   :  { %v8682_v25 = vadd.f32 %v722_v20, %v8670_v21  ;;  %v8702_v36 = vadd.f32 %v653_v24, %v8670_v21  ;;  %v877_v52 = vmax.f32 %v8699_v33, 0.0 }
 0x129   :  { %v724_v26 = vpop.f32.mrf.mxu1 }
 0x12a   :  { %v879_v41 = vmax.f32 %v8682_v25, 0.0  ;;  %v8716_v42 = vadd.f32 %v724_v26, %v8670_v21  ;;  %v878_v53 = vmax.f32 %v8702_v36, 0.0  ;;  %v7217_v36 = vld [vmem:[%s10667_s3 + $0x28] sm:$0xff] }
 0x12c   :  { %v880_v60 = vmax.f32 %v8716_v42, 0.0 }
 0x149   :  { %v793_v34 = vpop.f32.mrf.mxu0  ;;  %v864_v35 = vpop.f32.mrf.mxu1 }
 0x14a   :  { %v8705_v37 = vadd.f32 %v793_v34, %v8670_v21  ;;  %v8708_v38 = vadd.f32 %v864_v35, %v8670_v21 }
 0x14b   :  { %v8718_v43 = vpop.f32.mrf.mxu0  ;;  %v8720_v44 = vpop.f32.mrf.mxu1 }
 0x14c   :  { %v881_v45 = vmax.f32 %v8705_v37, 0.0  ;;  %v883_v46 = vmax.f32 %v8708_v38, 0.0  ;;  %v796_v47 = vadd.f32 %v8718_v43, %v8670_v21  ;;  %v867_v48 = vadd.f32 %v8720_v44, %v8670_v21 }
 0x14e   :  { %v891_v54 = vmax.f32 %v879_v41, %v883_v46  ;;  %v882_v55 = vmax.f32 %v796_v47, 0.0  ;;  %v884_v56 = vmax.f32 %v867_v48, 0.0  ;;  %v889_v61 = vmax.f32 %v877_v52, %v881_v45  ;;  %v7223_v45 = vld [vmem:[%s10667_s3 + $0x38] sm:$0xff] }
 0x150   :  { %v8871_v62 = vmax.f32 %v887_v51, %v891_v54  ;;  %v890_v63 = vmax.f32 %v878_v53, %v882_v55  ;;  %v892_v5 = vmax.f32 %v880_v60, %v884_v56  ;;  %v8878_v7 = vmax.f32 %v885_v2, %v889_v61  ;;  %v7229_v54 = vld [vmem:[%s10667_s3 + $0x48] sm:$0xff] }
 0x152   :  { %v8874_v4 = vmax.f32 %v886_v58, %v890_v63  ;;  %910 = vrot.lane.b32.xlu1 %v8871_v62, %s7755_s0  ;;  %v8882_v8 = vmax.f32 %v888_v6, %v892_v5  ;;  %v7234_v58 = vld [vmem:[%s10667_s3 + $0x50] sm:$0xff] }
 0x154   :  { %908 = vrot.lane.b32.xlu0 %v8874_v4, %s7755_s0 }
 0x156   :  { %906 = vrot.lane.b32.xlu1 %v8878_v7, %s7755_s0 }
 0x158   :  { %912 = vrot.lane.b32.xlu0 %v8882_v8, %s7755_s0 }
 0x15a   :  { %1248 = vrot.lane.b32.xlu1 %v8874_v4, %s10697_s15 }
 0x15c   :  { %1250 = vrot.lane.b32.xlu0 %v8871_v62, %s10697_s15 }
 0x15e   :  { %1246 = vrot.lane.b32.xlu1 %v8878_v7, %s10697_s15 }
 0x160   :  { %1252 = vrot.lane.b32.xlu0 %v8882_v8, %s10697_s15 }
 0x162   :  { %1435 = vrot.lane.b32.xlu1 %v8874_v4, %s7757_s16 }
 0x164   :  { %1437 = vrot.lane.b32.xlu0 %v8871_v62, %s7757_s16 }
 0x166   :  { %1433 = vrot.lane.b32.xlu1 %v8878_v7, %s7757_s16 }
 0x168   :  { %1439 = vrot.lane.b32.xlu0 %v8882_v8, %s7757_s16 }
 0x16a   :  { %1622 = vrot.lane.b32.xlu1 %v8874_v4, %s7758_s17 }
 0x16c   :  { %1624 = vrot.lane.b32.xlu0 %v8871_v62, %s7758_s17 }
 0x16e   :  { %1620 = vrot.lane.b32.xlu1 %v8878_v7, %s7758_s17 }
 0x170   :  { %1626 = vrot.lane.b32.xlu0 %v8882_v8, %s7758_s17 }
 0x172   :  { %1809 = vrot.lane.b32.xlu1 %v8874_v4, %s7759_s18 }
 0x174   :  { %1811 = vrot.lane.b32.xlu0 %v8871_v62, %s7759_s18 }
 0x176   :  { %1807 = vrot.lane.b32.xlu1 %v8878_v7, %s7759_s18 }
 0x178   :  { %1813 = vrot.lane.b32.xlu0 %v8882_v8, %s7759_s18 }
 0x17a   :  { %1996 = vrot.lane.b32.xlu1 %v8874_v4, %s7760_s19 }
 0x17c   :  { %1998 = vrot.lane.b32.xlu0 %v8871_v62, %s7760_s19 }
 0x17e   :  { %1994 = vrot.lane.b32.xlu1 %v8878_v7, %s7760_s19 }
 0x180   :  { %2000 = vrot.lane.b32.xlu0 %v8882_v8, %s7760_s19  ;;  %s7771_s19 = smov 84  }
 0x182   :  { %2183 = vrot.lane.b32.xlu1 %v8874_v4, %s7761_s20 }
 0x184   :  { %2185 = vrot.lane.b32.xlu0 %v8871_v62, %s7761_s20 }
 0x186   :  { %2181 = vrot.lane.b32.xlu1 %v8878_v7, %s7761_s20 }
 0x188   :  { %2187 = vrot.lane.b32.xlu0 %v8882_v8, %s7761_s20  ;;  %s10689_s20 = smov 70  }
 0x18a   :  { %2370 = vrot.lane.b32.xlu1 %v8874_v4, %s7762_s21 }
 0x18c   :  { %2372 = vrot.lane.b32.xlu0 %v8871_v62, %s7762_s21 }
 0x18e   :  { %2368 = vrot.lane.b32.xlu1 %v8878_v7, %s7762_s21 }
 0x190   :  { %2374 = vrot.lane.b32.xlu0 %v8882_v8, %s7762_s21  ;;  %s10686_s21 = smov 68  }
 0x192   :  { %2557 = vrot.lane.b32.xlu1 %v8874_v4, %s7763_s1 }
 0x194   :  { %2559 = vrot.lane.b32.xlu0 %v8871_v62, %s7763_s1 }
 0x196   :  { %2555 = vrot.lane.b32.xlu1 %v8878_v7, %s7763_s1 }
 0x198   :  { %2561 = vrot.lane.b32.xlu0 %v8882_v8, %s7763_s1  ;;  %s10692_s1 = smov 72  }
 0x19a   :  { %2744 = vrot.lane.b32.xlu1 %v8874_v4, %s7764_s2 }
 0x19c   :  { %2746 = vrot.lane.b32.xlu0 %v8871_v62, %s7764_s2 }
 0x19e   :  { %2742 = vrot.lane.b32.xlu1 %v8878_v7, %s7764_s2 }
 0x1a0   :  { %2748 = vrot.lane.b32.xlu0 %v8882_v8, %s7764_s2 }
 0x1a2   :  { %2931 = vrot.lane.b32.xlu1 %v8874_v4, %s7765_s22 }
 0x1a4   :  { %2933 = vrot.lane.b32.xlu0 %v8871_v62, %s7765_s22 }
 0x1a6   :  { %2929 = vrot.lane.b32.xlu1 %v8878_v7, %s7765_s22 }
 0x1a8   :  { %2935 = vrot.lane.b32.xlu0 %v8882_v8, %s7765_s22 }
 0x1aa   :  { %3118 = vrot.lane.b32.xlu1 %v8874_v4, %s7766_s23 }
 0x1ac   :  { %3120 = vrot.lane.b32.xlu0 %v8871_v62, %s7766_s23 }
 0x1ae   :  { %3116 = vrot.lane.b32.xlu1 %v8878_v7, %s7766_s23 }
 0x1b0   :  { %3122 = vrot.lane.b32.xlu0 %v8882_v8, %s7766_s23 }
 0x1b2   :  { %3305 = vrot.lane.b32.xlu1 %v8874_v4, %s7767_s24 }
 0x1b4   :  { %3307 = vrot.lane.b32.xlu0 %v8871_v62, %s7767_s24 }
 0x1b6   :  { %3303 = vrot.lane.b32.xlu1 %v8878_v7, %s7767_s24 }
 0x1b8   :  { %3309 = vrot.lane.b32.xlu0 %v8882_v8, %s7767_s24 }
 0x1ba   :  { %3492 = vrot.lane.b32.xlu1 %v8874_v4, %s10677_s25 }
 0x1bc   :  { %3494 = vrot.lane.b32.xlu0 %v8871_v62, %s10677_s25 }
 0x1be   :  { %3490 = vrot.lane.b32.xlu1 %v8878_v7, %s10677_s25 }
 0x1c0   :  { %3496 = vrot.lane.b32.xlu0 %v8882_v8, %s10677_s25 }
 0x1c2   :  { %3679 = vrot.lane.b32.xlu1 %v8874_v4, %s7769_s26 }
 0x1c4   :  { %v911_v9 = vpop.permute.xlu1 %910  ;;  %3681 = vrot.lane.b32.xlu0 %v8871_v62, %s7769_s26 }
 0x1c6   :  { %v909_v10 = vpop.permute.xlu0 %908  ;;  %3677 = vrot.lane.b32.xlu1 %v8878_v7, %s7769_s26 }
 0x1c7   :  { %v916_v11 = vsel %vm914_vm1, %v909_v10, %v911_v9 }
 0x1c8   :  { %3683 = vrot.lane.b32.xlu0 %v8882_v8, %s7769_s26  ;;  %959 = vmatprep.subr.mxu0 %v916_v11  ;;  %v907_v12 = vpop.permute.xlu1 %906  ;;  %s7785_s26 = smov 101  }
 0x1c9   :  { %v915_v14 = vsel %vm914_vm1, %v907_v12, %v909_v10 }
 0x1ca   :  { %v913_v15 = vpop.permute.xlu0 %912  ;;  %3866 = vrot.lane.b32.xlu1 %v8874_v4, %s7770_s29  ;;  %960 = vmatpush1.msra.mxu0 %v915_v14  ;;  %v7241_v14 = vld [vmem:[%s10667_s3 + $0x68] sm:$0xff] }
 0x1cb   :  { %7208 = vmatmul.mubr.msk.f32.vlgmr.msra.gmra.mxu0 %vm922_vm0, %v7206_v13  ;;  %1036 = vmatprep.subr.mxu1 %v913_v15  ;;  %v917_v16 = vsel %vm914_vm1, %v911_v9, %v913_v15  ;;  %v7240_v9 = vld [vmem:[%s10667_s3 + $0x60] sm:$0xff] }
 0x1cc   :  { %1119 = vmatprep.subr.mxu0 %v8874_v4  ;;  %3868 = vrot.lane.b32.xlu0 %v8871_v62, %s7770_s29  ;;  %v1249_v17 = vpop.permute.xlu1 %1248 }
 0x1cd   :  { %1037 = vmatpush1.msra.mxu1 %v917_v16  ;;  %1120 = vmatpush1.msra.mxu0 %v8878_v7 }
 0x1ce   :  { %7210 = vmatmul.mubr.msk.f32.vlgmr.msra.gmra.mxu1 %vm922_vm0, %v7206_v13  ;;  %1196 = vmatprep.subr.mxu1 %v8882_v8  ;;  %v1251_v18 = vpop.permute.xlu0 %1250 }
 0x1cf   :  { %1197 = vmatpush1.msra.mxu1 %v8871_v62  ;;  %3864 = vrot.lane.b32.xlu1 %v8878_v7, %s7770_s29  ;;  %v1256_v20 = vsel %vm1254_vm2, %v1249_v17, %v1251_v18 }
 0x1d0   :  { %999 = vmatprep.mubr.f32.mxu0 %v7753_v3  ;;  %3870 = vrot.lane.b32.xlu0 %v8882_v8, %s7770_s29  ;;  %v1247_v21 = vpop.permute.xlu1 %1246  ;;  %s7777_s29 = smov 69  }
 0x1d1   :  { %7209 = vmatmul.mubr.msk.f32.gmra.mxu0 %vm922_vm0, %v7207_v19  ;;  %1076 = vmatprep.mubr.f32.mxu1 %v7753_v3  ;;  %v1255_v22 = vsel %vm1254_vm2, %v1247_v21, %v1249_v17 }
 0x1d2   :  { %1298 = vmatprep.subr.mxu0 %v1256_v20  ;;  %7211 = vmatmul.mubr.msk.f32.gmra.mxu1 %vm922_vm0, %v7207_v19  ;;  %v1253_v1 = vpop.permute.xlu0 %1252 }
 0x1d3   :  { %4053 = vrot.lane.b32.xlu1 %v8874_v4, %s7771_s19  ;;  %1153 = vmatprep.mubr.f32.mxu0 %v7753_v3  ;;  %v1257_v25 = vsel %vm1254_vm2, %v1251_v18, %v1253_v1  ;;  %v7246_v18 = vld [vmem:[%s10667_s3 + $0x70] sm:$0xff]  ;;  %vm3872_vm2 = vcmask 695296  }
 0x1d4   :  { %1375 = vmatprep.subr.mxu1 %v1253_v1  ;;  %4055 = vrot.lane.b32.xlu0 %v8871_v62, %s7771_s19  ;;  %v1436_v24 = vpop.permute.xlu1 %1435 }
 0x1d5   :  { %7212 = vmatmul.mubr.msk.f32.vlgmr.msra.gmra.mxu0 %vm922_vm0, %v897_v23  ;;  %1230 = vmatprep.mubr.f32.mxu1 %v7753_v3 }
 0x1d6   :  { %1299 = vmatpush1.msra.mxu0 %v1255_v22  ;;  %7214 = vmatmul.mubr.msk.f32.vlgmr.msra.gmra.mxu1 %vm922_vm0, %v897_v23  ;;  %v1438_v26 = vpop.permute.xlu0 %1437  ;;  %v7247_v23 = vld [vmem:[%s10667_s3 + $0x78] sm:$0xff] }
 0x1d7   :  { %1376 = vmatpush1.msra.mxu1 %v1257_v25  ;;  %4051 = vrot.lane.b32.xlu1 %v8878_v7, %s7771_s19  ;;  %v1443_v28 = vsel %vm1441_vm3, %v1436_v24, %v1438_v26 }
 0x1d8   :  { %1159 = vmatprep.mubr.f32.mxu0 %v7753_v3  ;;  %4057 = vrot.lane.b32.xlu0 %v8882_v8, %s7771_s19  ;;  %v1434_v29 = vpop.permute.xlu1 %1433  ;;  %s10676_s19 = smov 44  }
 0x1d9   :  { %7213 = vmatmul.mubr.msk.f32.gmra.mxu0 %vm922_vm0, %v898_v27  ;;  %1236 = vmatprep.mubr.f32.mxu1 %v7753_v3  ;;  %v1442_v32 = vsel %vm1441_vm3, %v1434_v29, %v1436_v24 }
 0x1da   :  { %1485 = vmatprep.subr.mxu0 %v1443_v28  ;;  %7215 = vmatmul.mubr.msk.f32.gmra.mxu1 %vm922_vm0, %v898_v27  ;;  %v1440_v30 = vpop.permute.xlu0 %1439 }
 0x1db   :  { %4240 = vrot.lane.b32.xlu1 %v8874_v4, %s7772_s27  ;;  %1332 = vmatprep.mubr.f32.mxu0 %v7753_v3  ;;  %v1444_v34 = vsel %vm1441_vm3, %v1438_v26, %v1440_v30  ;;  %v7252_v26 = vld [vmem:[%s10667_s3 + $0x80] sm:$0xff]  ;;  %vm4059_vm3 = vcmask 687104  }
 0x1dc   :  { %1562 = vmatprep.subr.mxu1 %v1440_v30  ;;  %4242 = vrot.lane.b32.xlu0 %v8871_v62, %s7772_s27  ;;  %v1623_v33 = vpop.permute.xlu1 %1622 }
 0x1dd   :  { %7218 = vmatmul.mubr.msk.f32.vlgmr.msra.gmra.mxu0 %vm922_vm0, %v7216_v31  ;;  %1409 = vmatprep.mubr.f32.mxu1 %v7753_v3 }
 0x1de   :  { %1486 = vmatpush1.msra.mxu0 %v1442_v32  ;;  %7220 = vmatmul.mubr.msk.f32.vlgmr.msra.gmra.mxu1 %vm922_vm0, %v7216_v31  ;;  %v1625_v35 = vpop.permute.xlu0 %1624  ;;  %v5544_v32 = vld [vmem:[%s10668_s4] sm:$0xff] }
 0x1df   :  { %1563 = vmatpush1.msra.mxu1 %v1444_v34  ;;  %4238 = vrot.lane.b32.xlu1 %v8878_v7, %s7772_s27  ;;  %v1630_v37 = vsel %vm1628_vm4, %v1623_v33, %v1625_v35 }
 0x1e0   :  { %1338 = vmatprep.mubr.f32.mxu0 %v7753_v3  ;;  %4244 = vrot.lane.b32.xlu0 %v8882_v8, %s7772_s27  ;;  %v1621_v38 = vpop.permute.xlu1 %1620  ;;  %s10678_s27 = smov 29  }
 0x1e1   :  { %7219 = vmatmul.mubr.msk.f32.gmra.mxu0 %vm922_vm0, %v7217_v36  ;;  %1415 = vmatprep.mubr.f32.mxu1 %v7753_v3  ;;  %v1629_v41 = vsel %vm1628_vm4, %v1621_v38, %v1623_v33  ;;  %v7258_v33 = vld [vmem:[%s10667_s3 + $0x90] sm:$0xff] }
 0x1e2   :  { %1672 = vmatprep.subr.mxu0 %v1630_v37  ;;  %7221 = vmatmul.mubr.msk.f32.gmra.mxu1 %vm922_vm0, %v7217_v36  ;;  %v1627_v39 = vpop.permute.xlu0 %1626  ;;  %v7259_v37 = vld [vmem:[%s10667_s3 + $0x98] sm:$0xff] }
 0x1e3   :  { %4427 = vrot.lane.b32.xlu1 %v8874_v4, %s7773_s13  ;;  %1519 = vmatprep.mubr.f32.mxu0 %v7753_v3  ;;  %v1631_v43 = vsel %vm1628_vm4, %v1625_v35, %v1627_v39  ;;  %vm4246_vm4 = vcmask 678912  }
 0x1e4   :  { %1749 = vmatprep.subr.mxu1 %v1627_v39  ;;  %4429 = vrot.lane.b32.xlu0 %v8871_v62, %s7773_s13  ;;  %v1810_v42 = vpop.permute.xlu1 %1809 }
 0x1e5   :  { %7224 = vmatmul.mubr.msk.f32.vlgmr.msra.gmra.mxu0 %vm922_vm0, %v7222_v40  ;;  %1596 = vmatprep.mubr.f32.mxu1 %v7753_v3 }
 0x1e6   :  { %1673 = vmatpush1.msra.mxu0 %v1629_v41  ;;  %7226 = vmatmul.mubr.msk.f32.vlgmr.msra.gmra.mxu1 %vm922_vm0, %v7222_v40  ;;  %v1812_v44 = vpop.permute.xlu0 %1811  ;;  %v7264_v41 = vld [vmem:[%s10667_s3 + $0xa0] sm:$0xff] }
 0x1e7   :  { %1750 = vmatpush1.msra.mxu1 %v1631_v43  ;;  %4425 = vrot.lane.b32.xlu1 %v8878_v7, %s7773_s13  ;;  %v1817_v46 = vsel %vm1815_vm5, %v1810_v42, %v1812_v44 }
 0x1e8   :  { %1525 = vmatprep.mubr.f32.mxu0 %v7753_v3  ;;  %4431 = vrot.lane.b32.xlu0 %v8882_v8, %s7773_s13  ;;  %v1808_v47 = vpop.permute.xlu1 %1807  ;;  %s7782_s13 = smov 77  }
 0x1e9   :  { %7225 = vmatmul.mubr.msk.f32.gmra.mxu0 %vm922_vm0, %v7223_v45  ;;  %1602 = vmatprep.mubr.f32.mxu1 %v7753_v3  ;;  %v1816_v50 = vsel %vm1815_vm5, %v1808_v47, %v1810_v42 }
 0x1ea   :  { %1859 = vmatprep.subr.mxu0 %v1817_v46  ;;  %7227 = vmatmul.mubr.msk.f32.gmra.mxu1 %vm922_vm0, %v7223_v45  ;;  %v1814_v48 = vpop.permute.xlu0 %1813  ;;  %v7265_v46 = vld [vmem:[%s10667_s3 + $0xa8] sm:$0xff] }
 0x1eb   :  { %4614 = vrot.lane.b32.xlu1 %v8874_v4, %s10692_s1  ;;  %1706 = vmatprep.mubr.f32.mxu0 %v7753_v3  ;;  %v1818_v52 = vsel %vm1815_vm5, %v1812_v44, %v1814_v48 }
 0x1ec   :  { %1936 = vmatprep.subr.mxu1 %v1814_v48  ;;  %4616 = vrot.lane.b32.xlu0 %v8871_v62, %s10692_s1  ;;  %v1997_v51 = vpop.permute.xlu1 %1996 }
 0x1ed   :  { %7230 = vmatmul.mubr.msk.f32.vlgmr.msra.gmra.mxu0 %vm922_vm0, %v7228_v49  ;;  %1783 = vmatprep.mubr.f32.mxu1 %v7753_v3 }
 0x1ee   :  { %1860 = vmatpush1.msra.mxu0 %v1816_v50  ;;  %7232 = vmatmul.mubr.msk.f32.vlgmr.msra.gmra.mxu1 %vm922_vm0, %v7228_v49  ;;  %v1999_v53 = vpop.permute.xlu0 %1998  ;;  %v7270_v50 = vld [vmem:[%s10667_s3 + $0xb0] sm:$0xff] }
 0x1ef   :  { %1937 = vmatpush1.msra.mxu1 %v1818_v52  ;;  %4612 = vrot.lane.b32.xlu1 %v8878_v7, %s10692_s1  ;;  %v2004_v55 = vsel %vm2002_vm6, %v1997_v51, %v1999_v53 }
 0x1f0   :  { %1712 = vmatprep.mubr.f32.mxu0 %v7753_v3  ;;  %4618 = vrot.lane.b32.xlu0 %v8882_v8, %s10692_s1  ;;  %v1995_v56 = vpop.permute.xlu1 %1994 }
 0x1f1   :  { %7231 = vmatmul.mubr.msk.f32.gmra.mxu0 %vm922_vm0, %v7229_v54  ;;  %1789 = vmatprep.mubr.f32.mxu1 %v7753_v3  ;;  %v2003_v59 = vsel %vm2002_vm6, %v1995_v56, %v1997_v51 }
 0x1f2   :  { %2046 = vmatprep.subr.mxu0 %v2004_v55  ;;  %7233 = vmatmul.mubr.msk.f32.gmra.mxu1 %vm922_vm0, %v7229_v54  ;;  %v2001_v57 = vpop.permute.xlu0 %2000  ;;  %v7271_v55 = vld [vmem:[%s10667_s3 + $0xb8] sm:$0xff] }
 0x1f3   :  { %4801 = vrot.lane.b32.xlu1 %v8874_v4, %s7775_s30  ;;  %1893 = vmatprep.mubr.f32.mxu0 %v7753_v3  ;;  %v2005_v61 = vsel %vm2002_vm6, %v1999_v53, %v2001_v57  ;;  %vm4433_vm6 = vcmask 670720  }
 0x1f4   :  { %2123 = vmatprep.subr.mxu1 %v2001_v57  ;;  %4803 = vrot.lane.b32.xlu0 %v8871_v62, %s7775_s30  ;;  %v2184_v60 = vpop.permute.xlu1 %2183 }
 0x1f5   :  { %7236 = vmatmul.mubr.msk.f32.vlgmr.msra.gmra.mxu0 %vm922_vm0, %v7234_v58  ;;  %1970 = vmatprep.mubr.f32.mxu1 %v7753_v3 }
 0x1f6   :  { %2047 = vmatpush1.msra.mxu0 %v2003_v59  ;;  %7238 = vmatmul.mubr.msk.f32.vlgmr.msra.gmra.mxu1 %vm922_vm0, %v7234_v58  ;;  %v2186_v63 = vpop.permute.xlu0 %2185  ;;  %v7276_v59 = vld [vmem:[%s10667_s3 + $0xc0] sm:$0xff] }
 0x1f7   :  { %2124 = vmatpush1.msra.mxu1 %v2005_v61  ;;  %4799 = vrot.lane.b32.xlu1 %v8878_v7, %s7775_s30  ;;  %v2191_v2 = vsel %vm2189_vm7, %v2184_v60, %v2186_v63 }
 0x1f8   :  { %1899 = vmatprep.mubr.f32.mxu0 %v7753_v3  ;;  %4805 = vrot.lane.b32.xlu0 %v8882_v8, %s7775_s30  ;;  %v2182_v5 = vpop.permute.xlu1 %2181 }
 0x1f9   :  { %7237 = vmatmul.mubr.msk.f32.gmra.mxu0 %vm922_vm0, %v7235_v0  ;;  %1976 = vmatprep.mubr.f32.mxu1 %v7753_v3  ;;  %v2190_v10 = vsel %vm2189_vm7, %v2182_v5, %v2184_v60 }
 0x1fa   :  { %2233 = vmatprep.subr.mxu0 %v2191_v2  ;;  %7239 = vmatmul.mubr.msk.f32.gmra.mxu1 %vm922_vm0, %v7235_v0  ;;  %v2188_v6 = vpop.permute.xlu0 %2187  ;;  %v7277_v2 = vld [vmem:[%s10667_s3 + $0xc8] sm:$0xff] }
 0x1fb   :  { %4988 = vrot.lane.b32.xlu1 %v8874_v4, %s10689_s20  ;;  %2080 = vmatprep.mubr.f32.mxu0 %v7753_v3  ;;  %v2192_v12 = vsel %vm2189_vm7, %v2186_v63, %v2188_v6  ;;  %vm4620_vm7 = vcmask 588800  }
 0x1fc   :  { %2310 = vmatprep.subr.mxu1 %v2188_v6  ;;  %4990 = vrot.lane.b32.xlu0 %v8871_v62, %s10689_s20  ;;  %v2371_v11 = vpop.permute.xlu1 %2370 }
 0x1fd   :  { %7242 = vmatmul.mubr.msk.f32.vlgmr.msra.gmra.mxu0 %vm922_vm0, %v7240_v9  ;;  %2157 = vmatprep.mubr.f32.mxu1 %v7753_v3 }
 0x1fe   :  { %2234 = vmatpush1.msra.mxu0 %v2190_v10  ;;  %7244 = vmatmul.mubr.msk.f32.vlgmr.msra.gmra.mxu1 %vm922_vm0, %v7240_v9  ;;  %v2373_v13 = vpop.permute.xlu0 %2372  ;;  %v7282_v10 = vld [vmem:[%s10667_s3 + $0xd0] sm:$0xff] }
 0x1ff   :  { %2311 = vmatpush1.msra.mxu1 %v2192_v12  ;;  %4986 = vrot.lane.b32.xlu1 %v8878_v7, %s10689_s20  ;;  %v2378_v15 = vsel %vm2376_vm8, %v2371_v11, %v2373_v13 }
 0x200   :  { %2086 = vmatprep.mubr.f32.mxu0 %v7753_v3  ;;  %4992 = vrot.lane.b32.xlu0 %v8882_v8, %s10689_s20  ;;  %v2369_v16 = vpop.permute.xlu1 %2368 }
 0x201   :  { %7243 = vmatmul.mubr.msk.f32.gmra.mxu0 %vm922_vm0, %v7241_v14  ;;  %2163 = vmatprep.mubr.f32.mxu1 %v7753_v3  ;;  %v2377_v19 = vsel %vm2376_vm8, %v2369_v16, %v2371_v11 }
 0x202   :  { %2420 = vmatprep.subr.mxu0 %v2378_v15  ;;  %7245 = vmatmul.mubr.msk.f32.gmra.mxu1 %vm922_vm0, %v7241_v14  ;;  %v2375_v17 = vpop.permute.xlu0 %2374  ;;  %v7283_v15 = vld [vmem:[%s10667_s3 + $0xd8] sm:$0xff] }
 0x203   :  { %5175 = vrot.lane.b32.xlu1 %v8874_v4, %s7777_s29  ;;  %2267 = vmatprep.mubr.f32.mxu0 %v7753_v3  ;;  %v2379_v21 = vsel %vm2376_vm8, %v2373_v13, %v2375_v17  ;;  %vm4807_vm8 = vcmask 580608  }
 0x204   :  { %2497 = vmatprep.subr.mxu1 %v2375_v17  ;;  %5177 = vrot.lane.b32.xlu0 %v8871_v62, %s7777_s29  ;;  %v2558_v20 = vpop.permute.xlu1 %2557 }
 0x205   :  { %7248 = vmatmul.mubr.msk.f32.vlgmr.msra.gmra.mxu0 %vm922_vm0, %v7246_v18  ;;  %2344 = vmatprep.mubr.f32.mxu1 %v7753_v3 }
 0x206   :  { %2421 = vmatpush1.msra.mxu0 %v2377_v19  ;;  %7250 = vmatmul.mubr.msk.f32.vlgmr.msra.gmra.mxu1 %vm922_vm0, %v7246_v18  ;;  %v2560_v1 = vpop.permute.xlu0 %2559  ;;  %v7288_v19 = vld [vmem:[%s10667_s3 + $0xe0] sm:$0xff] }
 0x207   :  { %2498 = vmatpush1.msra.mxu1 %v2379_v21  ;;  %5173 = vrot.lane.b32.xlu1 %v8878_v7, %s7777_s29  ;;  %v2565_v22 = vsel %vm2563_vm9, %v2558_v20, %v2560_v1 }
 0x208   :  { %2273 = vmatprep.mubr.f32.mxu0 %v7753_v3  ;;  %5179 = vrot.lane.b32.xlu0 %v8882_v8, %s7777_s29  ;;  %v2556_v24 = vpop.permute.xlu1 %2555 }
 0x209   :  { %7249 = vmatmul.mubr.msk.f32.gmra.mxu0 %vm922_vm0, %v7247_v23  ;;  %2350 = vmatprep.mubr.f32.mxu1 %v7753_v3  ;;  %v2564_v27 = vsel %vm2563_vm9, %v2556_v24, %v2558_v20 }
 0x20a   :  { %2607 = vmatprep.subr.mxu0 %v2565_v22  ;;  %7251 = vmatmul.mubr.msk.f32.gmra.mxu1 %vm922_vm0, %v7247_v23  ;;  %v2562_v25 = vpop.permute.xlu0 %2561  ;;  %v7289_v22 = vld [vmem:[%s10667_s3 + $0xe8] sm:$0xff] }
 0x20b   :  { %5362 = vrot.lane.b32.xlu1 %v8874_v4, %s10686_s21  ;;  %2454 = vmatprep.mubr.f32.mxu0 %v7753_v3  ;;  %v2566_v29 = vsel %vm2563_vm9, %v2560_v1, %v2562_v25  ;;  %v7253_v4 = vld [vmem:[%s10667_s3 + $0x88] sm:$0xff]  ;;  %vm4994_vm9 = vcmask 572416  }
 0x20c   :  { %2684 = vmatprep.subr.mxu1 %v2562_v25  ;;  %5364 = vrot.lane.b32.xlu0 %v8871_v62, %s10686_s21  ;;  %v2745_v28 = vpop.permute.xlu1 %2744 }
 0x20d   :  { %7254 = vmatmul.mubr.msk.f32.vlgmr.msra.gmra.mxu0 %vm922_vm0, %v7252_v26  ;;  %2531 = vmatprep.mubr.f32.mxu1 %v7753_v3 }
 0x20e   :  { %2608 = vmatpush1.msra.mxu0 %v2564_v27  ;;  %7256 = vmatmul.mubr.msk.f32.vlgmr.msra.gmra.mxu1 %vm922_vm0, %v7252_v26  ;;  %v2747_v30 = vpop.permute.xlu0 %2746  ;;  %v7294_v27 = vld [vmem:[%s10667_s3 + $0xf0] sm:$0xff] }
 0x20f   :  { %2685 = vmatpush1.msra.mxu1 %v2566_v29  ;;  %5360 = vrot.lane.b32.xlu1 %v8878_v7, %s10686_s21  ;;  %v2752_v62 = vsel %vm2750_vm10, %v2745_v28, %v2747_v30 }
 0x210   :  { %2460 = vmatprep.mubr.f32.mxu0 %v7753_v3  ;;  %5366 = vrot.lane.b32.xlu0 %v8882_v8, %s10686_s21  ;;  %v2743_v31 = vpop.permute.xlu1 %2742 }
 0x211   :  { %7255 = vmatmul.mubr.msk.f32.gmra.mxu0 %vm922_vm0, %v7253_v4  ;;  %2537 = vmatprep.mubr.f32.mxu1 %v7753_v3  ;;  %v2751_v34 = vsel %vm2750_vm10, %v2743_v31, %v2745_v28 }
 0x212   :  { %2794 = vmatprep.subr.mxu0 %v2752_v62  ;;  %7257 = vmatmul.mubr.msk.f32.gmra.mxu1 %vm922_vm0, %v7253_v4  ;;  %v2749_v7 = vpop.permute.xlu0 %2748  ;;  %v7295_v62 = vld [vmem:[%s10667_s3 + $0xf8] sm:$0xff] }
 0x213   :  { %2641 = vmatprep.mubr.f32.mxu0 %v7753_v3  ;;  %2871 = vmatprep.subr.mxu1 %v2749_v7  ;;  %v2753_v35 = vsel %vm2750_vm10, %v2747_v30, %v2749_v7  ;;  %vm5181_vm10 = vcmask 564224  }
 0x214   :  { %5548 = vperm.xlu0 %7751, %v5544_v32   ;;  %2718 = vmatprep.mubr.f32.mxu1 %v7753_v3  ;;  %v2932_v8 = vpop.permute.xlu1 %2931 }
 0x215   :  { %7260 = vmatmul.mubr.msk.f32.vlgmr.msra.gmra.mxu0 %vm922_vm0, %v7258_v33 }
 0x216   :  { %2795 = vmatpush1.msra.mxu0 %v2751_v34  ;;  %7262 = vmatmul.mubr.msk.f32.vlgmr.msra.gmra.mxu1 %vm922_vm0, %v7258_v33  ;;  %v2934_v36 = vpop.permute.xlu0 %2933  ;;  %v7300_v33 = vld [vmem:[%s10667_s3 + $0x100] sm:$0xff] }
 0x217   :  { %2872 = vmatpush1.msra.mxu1 %v2753_v35  ;;  %2647 = vmatprep.mubr.f32.mxu0 %v7753_v3  ;;  %v2939_v38 = vsel %vm2937_vm11, %v2932_v8, %v2934_v36 }
 0x218   :  { %2724 = vmatprep.mubr.f32.mxu1 %v7753_v3  ;;  %2981 = vmatprep.subr.mxu0 %v2939_v38  ;;  %v2930_v39 = vpop.permute.xlu1 %2929 }
 0x219   :  { %7261 = vmatmul.mubr.msk.f32.gmra.mxu0 %vm922_vm0, %v7259_v37  ;;  %v2938_v42 = vsel %vm2937_vm11, %v2930_v39, %v2932_v8 }
 0x21a   :  { %7263 = vmatmul.mubr.msk.f32.gmra.mxu1 %vm922_vm0, %v7259_v37  ;;  %v2936_v40 = vpop.permute.xlu0 %2935  ;;  %2828 = vmatprep.mubr.f32.mxu0 %v7753_v3  ;;  %v7301_v37 = vld [vmem:[%s10667_s3 + $0x108] sm:$0xff] }
 0x21b   :  { %3058 = vmatprep.subr.mxu1 %v2936_v40  ;;  %2905 = vmatprep.mubr.f32.mxu1 %v7753_v3  ;;  %v2940_v44 = vsel %vm2937_vm11, %v2934_v36, %v2936_v40  ;;  %vm5368_vm11 = vcmask 556032  }
 0x21c   :  { %v3119_v43 = vpop.permute.xlu1 %3118 }
 0x21d   :  { %7266 = vmatmul.mubr.msk.f32.vlgmr.msra.gmra.mxu0 %vm922_vm0, %v7264_v41 }
 0x21e   :  { %2982 = vmatpush1.msra.mxu0 %v2938_v42  ;;  %7268 = vmatmul.mubr.msk.f32.vlgmr.msra.gmra.mxu1 %vm922_vm0, %v7264_v41  ;;  %v3121_v45 = vpop.permute.xlu0 %3120  ;;  %v7306_v41 = vld [vmem:[%s10667_s3 + $0x110] sm:$0xff] }
 0x21f   :  { %3059 = vmatpush1.msra.mxu1 %v2940_v44  ;;  %2834 = vmatprep.mubr.f32.mxu0 %v7753_v3  ;;  %v3126_v47 = vsel %vm3124_vm12, %v3119_v43, %v3121_v45 }
 0x220   :  { %2911 = vmatprep.mubr.f32.mxu1 %v7753_v3  ;;  %3168 = vmatprep.subr.mxu0 %v3126_v47  ;;  %v3117_v48 = vpop.permute.xlu1 %3116 }
 0x221   :  { %7267 = vmatmul.mubr.msk.f32.gmra.mxu0 %vm922_vm0, %v7265_v46  ;;  %v3125_v51 = vsel %vm3124_vm12, %v3117_v48, %v3119_v43  ;;  %v5545_v48 = vld [vmem:[%s10668_s4 + $0x8] sm:$0xff]  ;;  %s10679_s4 = smov 10  }
 0x222   :  { %7269 = vmatmul.mubr.msk.f32.gmra.mxu1 %vm922_vm0, %v7265_v46  ;;  %v3123_v49 = vpop.permute.xlu0 %3122  ;;  %3015 = vmatprep.mubr.f32.mxu0 %v7753_v3  ;;  %v7307_v46 = vld [vmem:[%s10667_s3 + $0x118] sm:$0xff] }
 0x223   :  { %3245 = vmatprep.subr.mxu1 %v3123_v49  ;;  %3092 = vmatprep.mubr.f32.mxu1 %v7753_v3  ;;  %v3127_v53 = vsel %vm3124_vm12, %v3121_v45, %v3123_v49 }
 0x224   :  { %v3306_v52 = vpop.permute.xlu1 %3305  ;;  %5553 = vperm.xlu1 %7752, %v5545_v48  }
 0x225   :  { %7272 = vmatmul.mubr.msk.f32.vlgmr.msra.gmra.mxu0 %vm922_vm0, %v7270_v50 }
 0x226   :  { %3169 = vmatpush1.msra.mxu0 %v3125_v51  ;;  %7274 = vmatmul.mubr.msk.f32.vlgmr.msra.gmra.mxu1 %vm922_vm0, %v7270_v50  ;;  %v3308_v54 = vpop.permute.xlu0 %3307  ;;  %v7312_v51 = vld [vmem:[%s10667_s3 + $0x120] sm:$0xff] }
 0x227   :  { %3246 = vmatpush1.msra.mxu1 %v3127_v53  ;;  %3021 = vmatprep.mubr.f32.mxu0 %v7753_v3  ;;  %v3313_v56 = vsel %vm3311_vm13, %v3306_v52, %v3308_v54 }
 0x228   :  { %3098 = vmatprep.mubr.f32.mxu1 %v7753_v3  ;;  %3355 = vmatprep.subr.mxu0 %v3313_v56  ;;  %v3304_v57 = vpop.permute.xlu1 %3303  ;;  %v7313_v56 = vld [vmem:[%s10667_s3 + $0x128] sm:$0xff] }
 0x229   :  { %7273 = vmatmul.mubr.msk.f32.gmra.mxu0 %vm922_vm0, %v7271_v55  ;;  %v3312_v60 = vsel %vm3311_vm13, %v3304_v57, %v3306_v52 }
 0x22a   :  { %7275 = vmatmul.mubr.msk.f32.gmra.mxu1 %vm922_vm0, %v7271_v55  ;;  %v3310_v58 = vpop.permute.xlu0 %3309  ;;  %3202 = vmatprep.mubr.f32.mxu0 %v7753_v3 }
 0x22b   :  { %3432 = vmatprep.subr.mxu1 %v3310_v58  ;;  %3279 = vmatprep.mubr.f32.mxu1 %v7753_v3  ;;  %v3314_v63 = vsel %vm3311_vm13, %v3308_v54, %v3310_v58 }
 0x22c   :  { %v3493_v61 = vpop.permute.xlu1 %3492 }
 0x22d   :  { %7278 = vmatmul.mubr.msk.f32.vlgmr.msra.gmra.mxu0 %vm922_vm0, %v7276_v59 }
 0x22e   :  { %3356 = vmatpush1.msra.mxu0 %v3312_v60  ;;  %7280 = vmatmul.mubr.msk.f32.vlgmr.msra.gmra.mxu1 %vm922_vm0, %v7276_v59  ;;  %v3495_v0 = vpop.permute.xlu0 %3494  ;;  %v7318_v60 = vld [vmem:[%s10667_s3 + $0x130] sm:$0xff] }
 0x22f   :  { %3433 = vmatpush1.msra.mxu1 %v3314_v63  ;;  %3208 = vmatprep.mubr.f32.mxu0 %v7753_v3  ;;  %v3500_v5 = vsel %vm3498_vm14, %v3493_v61, %v3495_v0 }
 0x230   :  { %3285 = vmatprep.mubr.f32.mxu1 %v7753_v3  ;;  %3542 = vmatprep.subr.mxu0 %v3500_v5  ;;  %v3491_v6 = vpop.permute.xlu1 %3490  ;;  %v7319_v5 = vld [vmem:[%s10667_s3 + $0x138] sm:$0xff] }
 0x231   :  { %7279 = vmatmul.mubr.msk.f32.gmra.mxu0 %vm922_vm0, %v7277_v2  ;;  %v3499_v11 = vsel %vm3498_vm14, %v3491_v6, %v3493_v61 }
 0x232   :  { %7281 = vmatmul.mubr.msk.f32.gmra.mxu1 %vm922_vm0, %v7277_v2  ;;  %v3497_v9 = vpop.permute.xlu0 %3496  ;;  %3389 = vmatprep.mubr.f32.mxu0 %v7753_v3 }
 0x233   :  { %3619 = vmatprep.subr.mxu1 %v3497_v9  ;;  %3466 = vmatprep.mubr.f32.mxu1 %v7753_v3  ;;  %v3501_v13 = vsel %vm3498_vm14, %v3495_v0, %v3497_v9 }
 0x234   :  { %v3680_v12 = vpop.permute.xlu1 %3679 }
 0x235   :  { %7284 = vmatmul.mubr.msk.f32.vlgmr.msra.gmra.mxu0 %vm922_vm0, %v7282_v10 }
 0x236   :  { %3543 = vmatpush1.msra.mxu0 %v3499_v11  ;;  %7286 = vmatmul.mubr.msk.f32.vlgmr.msra.gmra.mxu1 %vm922_vm0, %v7282_v10  ;;  %v3682_v14 = vpop.permute.xlu0 %3681  ;;  %v7324_v11 = vld [vmem:[%s10667_s3 + $0x140] sm:$0xff] }
 0x237   :  { %3620 = vmatpush1.msra.mxu1 %v3501_v13  ;;  %3395 = vmatprep.mubr.f32.mxu0 %v7753_v3  ;;  %v3687_v16 = vsel %vm3685_vm15, %v3680_v12, %v3682_v14 }
 0x238   :  { %3472 = vmatprep.mubr.f32.mxu1 %v7753_v3  ;;  %3729 = vmatprep.subr.mxu0 %v3687_v16  ;;  %v3678_v17 = vpop.permute.xlu1 %3677  ;;  %v7325_v16 = vld [vmem:[%s10667_s3 + $0x148] sm:$0xff] }
 0x239   :  { %7285 = vmatmul.mubr.msk.f32.gmra.mxu0 %vm922_vm0, %v7283_v15  ;;  %v3686_v20 = vsel %vm3685_vm15, %v3678_v17, %v3680_v12 }
 0x23a   :  { %7287 = vmatmul.mubr.msk.f32.gmra.mxu1 %vm922_vm0, %v7283_v15  ;;  %v3684_v18 = vpop.permute.xlu0 %3683  ;;  %3576 = vmatprep.mubr.f32.mxu0 %v7753_v3 }
 0x23b   :  { %3806 = vmatprep.subr.mxu1 %v3684_v18  ;;  %3653 = vmatprep.mubr.f32.mxu1 %v7753_v3  ;;  %v3688_v1 = vsel %vm3685_vm15, %v3682_v14, %v3684_v18 }
 0x23c   :  { %v3867_v21 = vpop.permute.xlu1 %3866 }
 0x23d   :  { %7290 = vmatmul.mubr.msk.f32.vlgmr.msra.gmra.mxu0 %vm922_vm0, %v7288_v19 }
 0x23e   :  { %3730 = vmatpush1.msra.mxu0 %v3686_v20  ;;  %7292 = vmatmul.mubr.msk.f32.vlgmr.msra.gmra.mxu1 %vm922_vm0, %v7288_v19  ;;  %v3869_v23 = vpop.permute.xlu0 %3868  ;;  %v7330_v20 = vld [vmem:[%s10667_s3 + $0x150] sm:$0xff] }
 0x23f   :  { %3807 = vmatpush1.msra.mxu1 %v3688_v1  ;;  %3582 = vmatprep.mubr.f32.mxu0 %v7753_v3  ;;  %v3874_v24 = vsel %vm3872_vm2, %v3867_v21, %v3869_v23 }
 0x240   :  { %3659 = vmatprep.mubr.f32.mxu1 %v7753_v3  ;;  %3916 = vmatprep.subr.mxu0 %v3874_v24  ;;  %v7331_v24 = vld [vmem:[%s10667_s3 + $0x158] sm:$0xff] }
 0x241   :  { %7291 = vmatmul.mubr.msk.f32.gmra.mxu0 %vm922_vm0, %v7289_v22  ;;  %v3865_v25 = vpop.permute.xlu1 %3864 }
 0x242   :  { %7293 = vmatmul.mubr.msk.f32.gmra.mxu1 %vm922_vm0, %v7289_v22  ;;  %v3871_v26 = vpop.permute.xlu0 %3870  ;;  %3763 = vmatprep.mubr.f32.mxu0 %v7753_v3  ;;  %v3873_v28 = vsel %vm3872_vm2, %v3865_v25, %v3867_v21 }
 0x243   :  { %3993 = vmatprep.subr.mxu1 %v3871_v26  ;;  %3840 = vmatprep.mubr.f32.mxu1 %v7753_v3  ;;  %v3875_v29 = vsel %vm3872_vm2, %v3869_v23, %v3871_v26 }
 0x245   :  { %7296 = vmatmul.mubr.msk.f32.vlgmr.msra.gmra.mxu0 %vm922_vm0, %v7294_v27  ;;  %v4054_v30 = vpop.permute.xlu1 %4053 }
 0x246   :  { %3917 = vmatpush1.msra.mxu0 %v3873_v28  ;;  %7298 = vmatmul.mubr.msk.f32.vlgmr.msra.gmra.mxu1 %vm922_vm0, %v7294_v27  ;;  %v4056_v4 = vpop.permute.xlu0 %4055  ;;  %v7336_v28 = vld [vmem:[%s10667_s3 + $0x160] sm:$0xff] }
 0x247   :  { %3994 = vmatpush1.msra.mxu1 %v3875_v29  ;;  %3769 = vmatprep.mubr.f32.mxu0 %v7753_v3  ;;  %v4061_v31 = vsel %vm4059_vm3, %v4054_v30, %v4056_v4 }
 0x248   :  { %3846 = vmatprep.mubr.f32.mxu1 %v7753_v3  ;;  %4103 = vmatprep.subr.mxu0 %v4061_v31  ;;  %v7337_v31 = vld [vmem:[%s10667_s3 + $0x168] sm:$0xff] }
 0x249   :  { %7297 = vmatmul.mubr.msk.f32.gmra.mxu0 %vm922_vm0, %v7295_v62  ;;  %v4052_v32 = vpop.permute.xlu1 %4051 }
 0x24a   :  { %7299 = vmatmul.mubr.msk.f32.gmra.mxu1 %vm922_vm0, %v7295_v62  ;;  %v4058_v7 = vpop.permute.xlu0 %4057  ;;  %3950 = vmatprep.mubr.f32.mxu0 %v7753_v3  ;;  %v4060_v34 = vsel %vm4059_vm3, %v4052_v32, %v4054_v30 }
 0x24b   :  { %4180 = vmatprep.subr.mxu1 %v4058_v7  ;;  %4027 = vmatprep.mubr.f32.mxu1 %v7753_v3  ;;  %v4062_v8 = vsel %vm4059_vm3, %v4056_v4, %v4058_v7 }
 0x24d   :  { %7302 = vmatmul.mubr.msk.f32.vlgmr.msra.gmra.mxu0 %vm922_vm0, %v7300_v33  ;;  %v4241_v35 = vpop.permute.xlu1 %4240 }
 0x24e   :  { %4104 = vmatpush1.msra.mxu0 %v4060_v34  ;;  %7304 = vmatmul.mubr.msk.f32.vlgmr.msra.gmra.mxu1 %vm922_vm0, %v7300_v33  ;;  %v4243_v36 = vpop.permute.xlu0 %4242  ;;  %v7342_v34 = vld [vmem:[%s10667_s3 + $0x170] sm:$0xff] }
 0x24f   :  { %4181 = vmatpush1.msra.mxu1 %v4062_v8  ;;  %3956 = vmatprep.mubr.f32.mxu0 %v7753_v3  ;;  %v4248_v38 = vsel %vm4246_vm4, %v4241_v35, %v4243_v36 }
 0x250   :  { %4033 = vmatprep.mubr.f32.mxu1 %v7753_v3  ;;  %4290 = vmatprep.subr.mxu0 %v4248_v38 }
 0x251   :  { %7303 = vmatmul.mubr.msk.f32.gmra.mxu0 %vm922_vm0, %v7301_v37  ;;  %v4239_v39 = vpop.permute.xlu1 %4238 }
 0x252   :  { %7305 = vmatmul.mubr.msk.f32.gmra.mxu1 %vm922_vm0, %v7301_v37  ;;  %v4245_v40 = vpop.permute.xlu0 %4244  ;;  %4137 = vmatprep.mubr.f32.mxu0 %v7753_v3  ;;  %v4247_v42 = vsel %vm4246_vm4, %v4239_v39, %v4241_v35  ;;  %v7348_v37 = vld [vmem:[%s10667_s3 + $0x180] sm:$0xff] }
 0x253   :  { %4367 = vmatprep.subr.mxu1 %v4245_v40  ;;  %4214 = vmatprep.mubr.f32.mxu1 %v7753_v3  ;;  %v4249_v43 = vsel %vm4246_vm4, %v4243_v36, %v4245_v40  ;;  %v7343_v36 = vld [vmem:[%s10667_s3 + $0x178] sm:$0xff] }
 0x255   :  { %7308 = vmatmul.mubr.msk.f32.vlgmr.msra.gmra.mxu0 %vm922_vm0, %v7306_v41  ;;  %v4428_v44 = vpop.permute.xlu1 %4427 }
 0x256   :  { %4291 = vmatpush1.msra.mxu0 %v4247_v42  ;;  %7310 = vmatmul.mubr.msk.f32.vlgmr.msra.gmra.mxu1 %vm922_vm0, %v7306_v41  ;;  %v4430_v45 = vpop.permute.xlu0 %4429  ;;  %v7349_v41 = vld [vmem:[%s10667_s3 + $0x188] sm:$0xff]  ;;  %s7779_s3 = smov 105  }
 0x257   :  { %4368 = vmatpush1.msra.mxu1 %v4249_v43  ;;  %4143 = vmatprep.mubr.f32.mxu0 %v7753_v3  ;;  %v4435_v47 = vsel %vm4433_vm6, %v4428_v44, %v4430_v45 }
 0x258   :  { %4220 = vmatprep.mubr.f32.mxu1 %v7753_v3  ;;  %4477 = vmatprep.subr.mxu0 %v4435_v47 }
 0x259   :  { %7309 = vmatmul.mubr.msk.f32.gmra.mxu0 %vm922_vm0, %v7307_v46  ;;  %v4426_v49 = vpop.permute.xlu1 %4425 }
 0x25a   :  { %7311 = vmatmul.mubr.msk.f32.gmra.mxu1 %vm922_vm0, %v7307_v46  ;;  %v4432_v50 = vpop.permute.xlu0 %4431  ;;  %4324 = vmatprep.mubr.f32.mxu0 %v7753_v3  ;;  %v4434_v52 = vsel %vm4433_vm6, %v4426_v49, %v4428_v44 }
 0x25b   :  { %4554 = vmatprep.subr.mxu1 %v4432_v50  ;;  %4401 = vmatprep.mubr.f32.mxu1 %v7753_v3  ;;  %v4436_v53 = vsel %vm4433_vm6, %v4430_v45, %v4432_v50 }
 0x25d   :  { %7314 = vmatmul.mubr.msk.f32.vlgmr.msra.gmra.mxu0 %vm922_vm0, %v7312_v51  ;;  %v4615_v54 = vpop.permute.xlu1 %4614 }
 0x25e   :  { %4478 = vmatpush1.msra.mxu0 %v4434_v52  ;;  %7316 = vmatmul.mubr.msk.f32.vlgmr.msra.gmra.mxu1 %vm922_vm0, %v7312_v51  ;;  %v4617_v55 = vpop.permute.xlu0 %4616 }
 0x25f   :  { %4555 = vmatpush1.msra.mxu1 %v4436_v53  ;;  %4330 = vmatprep.mubr.f32.mxu0 %v7753_v3  ;;  %v4622_v57 = vsel %vm4620_vm7, %v4615_v54, %v4617_v55 }
 0x260   :  { %4407 = vmatprep.mubr.f32.mxu1 %v7753_v3  ;;  %4664 = vmatprep.subr.mxu0 %v4622_v57 }
 0x261   :  { %7315 = vmatmul.mubr.msk.f32.gmra.mxu0 %vm922_vm0, %v7313_v56  ;;  %v4613_v58 = vpop.permute.xlu1 %4612 }
 0x262   :  { %7317 = vmatmul.mubr.msk.f32.gmra.mxu1 %vm922_vm0, %v7313_v56  ;;  %v4619_v59 = vpop.permute.xlu0 %4618  ;;  %4511 = vmatprep.mubr.f32.mxu0 %v7753_v3  ;;  %v4621_v61 = vsel %vm4620_vm7, %v4613_v58, %v4615_v54 }
 0x263   :  { %4741 = vmatprep.subr.mxu1 %v4619_v59  ;;  %4588 = vmatprep.mubr.f32.mxu1 %v7753_v3  ;;  %v4623_v63 = vsel %vm4620_vm7, %v4617_v55, %v4619_v59 }
 0x265   :  { %7320 = vmatmul.mubr.msk.f32.vlgmr.msra.gmra.mxu0 %vm922_vm0, %v7318_v60  ;;  %v4802_v0 = vpop.permute.xlu1 %4801 }
 0x266   :  { %4665 = vmatpush1.msra.mxu0 %v4621_v61  ;;  %7322 = vmatmul.mubr.msk.f32.vlgmr.msra.gmra.mxu1 %vm922_vm0, %v7318_v60  ;;  %v4804_v2 = vpop.permute.xlu0 %4803 }
 0x267   :  { %4742 = vmatpush1.msra.mxu1 %v4623_v63  ;;  %4517 = vmatprep.mubr.f32.mxu0 %v7753_v3  ;;  %v4809_v6 = vsel %vm4807_vm8, %v4802_v0, %v4804_v2 }
 0x268   :  { %4594 = vmatprep.mubr.f32.mxu1 %v7753_v3  ;;  %4851 = vmatprep.subr.mxu0 %v4809_v6 }
 0x269   :  { %7321 = vmatmul.mubr.msk.f32.gmra.mxu0 %vm922_vm0, %v7319_v5  ;;  %v4800_v9 = vpop.permute.xlu1 %4799 }
 0x26a   :  { %7323 = vmatmul.mubr.msk.f32.gmra.mxu1 %vm922_vm0, %v7319_v5  ;;  %v4806_v10 = vpop.permute.xlu0 %4805  ;;  %4698 = vmatprep.mubr.f32.mxu0 %v7753_v3  ;;  %v4808_v12 = vsel %vm4807_vm8, %v4800_v9, %v4802_v0 }
 0x26b   :  { %4928 = vmatprep.subr.mxu1 %v4806_v10  ;;  %4775 = vmatprep.mubr.f32.mxu1 %v7753_v3  ;;  %v4810_v13 = vsel %vm4807_vm8, %v4804_v2, %v4806_v10 }
 0x26d   :  { %7326 = vmatmul.mubr.msk.f32.vlgmr.msra.gmra.mxu0 %vm922_vm0, %v7324_v11  ;;  %v4989_v14 = vpop.permute.xlu1 %4988 }
 0x26e   :  { %4852 = vmatpush1.msra.mxu0 %v4808_v12  ;;  %7328 = vmatmul.mubr.msk.f32.vlgmr.msra.gmra.mxu1 %vm922_vm0, %v7324_v11  ;;  %v4991_v15 = vpop.permute.xlu0 %4990 }
 0x26f   :  { %4929 = vmatpush1.msra.mxu1 %v4810_v13  ;;  %4704 = vmatprep.mubr.f32.mxu0 %v7753_v3  ;;  %v4996_v17 = vsel %vm4994_vm9, %v4989_v14, %v4991_v15 }
 0x270   :  { %4781 = vmatprep.mubr.f32.mxu1 %v7753_v3  ;;  %5038 = vmatprep.subr.mxu0 %v4996_v17 }
 0x271   :  { %7327 = vmatmul.mubr.msk.f32.gmra.mxu0 %vm922_vm0, %v7325_v16  ;;  %v4987_v18 = vpop.permute.xlu1 %4986 }
 0x272   :  { %7329 = vmatmul.mubr.msk.f32.gmra.mxu1 %vm922_vm0, %v7325_v16  ;;  %v4993_v19 = vpop.permute.xlu0 %4992  ;;  %4885 = vmatprep.mubr.f32.mxu0 %v7753_v3  ;;  %v4995_v21 = vsel %vm4994_vm9, %v4987_v18, %v4989_v14 }
 0x273   :  { %5115 = vmatprep.subr.mxu1 %v4993_v19  ;;  %4962 = vmatprep.mubr.f32.mxu1 %v7753_v3  ;;  %v4997_v1 = vsel %vm4994_vm9, %v4991_v15, %v4993_v19 }
 0x275   :  { %7332 = vmatmul.mubr.msk.f32.vlgmr.msra.gmra.mxu0 %vm922_vm0, %v7330_v20  ;;  %v5176_v23 = vpop.permute.xlu1 %5175 }
 0x276   :  { %5039 = vmatpush1.msra.mxu0 %v4995_v21  ;;  %7334 = vmatmul.mubr.msk.f32.vlgmr.msra.gmra.mxu1 %vm922_vm0, %v7330_v20  ;;  %v5178_v22 = vpop.permute.xlu0 %5177 }
 0x277   :  { %5116 = vmatpush1.msra.mxu1 %v4997_v1  ;;  %4891 = vmatprep.mubr.f32.mxu0 %v7753_v3  ;;  %v5183_v25 = vsel %vm5181_vm10, %v5176_v23, %v5178_v22 }
 0x278   :  { %4968 = vmatprep.mubr.f32.mxu1 %v7753_v3  ;;  %5225 = vmatprep.subr.mxu0 %v5183_v25 }
 0x279   :  { %7333 = vmatmul.mubr.msk.f32.gmra.mxu0 %vm922_vm0, %v7331_v24  ;;  %v5174_v26 = vpop.permute.xlu1 %5173 }
 0x27a   :  { %7335 = vmatmul.mubr.msk.f32.gmra.mxu1 %vm922_vm0, %v7331_v24  ;;  %v5180_v27 = vpop.permute.xlu0 %5179  ;;  %5072 = vmatprep.mubr.f32.mxu0 %v7753_v3  ;;  %v5182_v29 = vsel %vm5181_vm10, %v5174_v26, %v5176_v23 }
 0x27b   :  { %5302 = vmatprep.subr.mxu1 %v5180_v27  ;;  %5149 = vmatprep.mubr.f32.mxu1 %v7753_v3  ;;  %v5184_v30 = vsel %vm5181_vm10, %v5178_v22, %v5180_v27 }
 0x27d   :  { %7338 = vmatmul.mubr.msk.f32.vlgmr.msra.gmra.mxu0 %vm922_vm0, %v7336_v28  ;;  %v5363_v4 = vpop.permute.xlu1 %5362 }
 0x27e   :  { %5226 = vmatpush1.msra.mxu0 %v5182_v29  ;;  %7340 = vmatmul.mubr.msk.f32.vlgmr.msra.gmra.mxu1 %vm922_vm0, %v7336_v28  ;;  %v5365_v62 = vpop.permute.xlu0 %5364 }
 0x27f   :  { %5303 = vmatpush1.msra.mxu1 %v5184_v30  ;;  %5078 = vmatprep.mubr.f32.mxu0 %v7753_v3  ;;  %v5370_v32 = vsel %vm5368_vm11, %v5363_v4, %v5365_v62 }
 0x280   :  { %5155 = vmatprep.mubr.f32.mxu1 %v7753_v3  ;;  %5412 = vmatprep.subr.mxu0 %v5370_v32 }
 0x281   :  { %7339 = vmatmul.mubr.msk.f32.gmra.mxu0 %vm922_vm0, %v7337_v31  ;;  %v5361_v7 = vpop.permute.xlu1 %5360 }
 0x282   :  { %7341 = vmatmul.mubr.msk.f32.gmra.mxu1 %vm922_vm0, %v7337_v31  ;;  %v5367_v33 = vpop.permute.xlu0 %5366  ;;  %5259 = vmatprep.mubr.f32.mxu0 %v7753_v3  ;;  %v5369_v8 = vsel %vm5368_vm11, %v5361_v7, %v5363_v4 }
 0x283   :  { %5489 = vmatprep.subr.mxu1 %v5367_v33  ;;  %5336 = vmatprep.mubr.f32.mxu1 %v7753_v3  ;;  %v5371_v35 = vsel %vm5368_vm11, %v5365_v62, %v5367_v33 }
 0x285   :  { %7344 = vmatmul.mubr.msk.f32.vlgmr.msra.gmra.mxu0 %vm922_vm0, %v7342_v34 }
 0x286   :  { %5413 = vmatpush1.msra.mxu0 %v5369_v8  ;;  %7346 = vmatmul.mubr.msk.f32.vlgmr.msra.gmra.mxu1 %vm922_vm0, %v7342_v34 }
 0x287   :  { %5490 = vmatpush1.msra.mxu1 %v5371_v35  ;;  %5265 = vmatprep.mubr.f32.mxu0 %v7753_v3 }
 0x288   :  { %5342 = vmatprep.mubr.f32.mxu1 %v7753_v3 }
 0x289   :  { %7345 = vmatmul.mubr.msk.f32.gmra.mxu0 %vm922_vm0, %v7343_v36 }
 0x28a   :  { %7347 = vmatmul.mubr.msk.f32.gmra.mxu1 %vm922_vm0, %v7343_v36  ;;  %5446 = vmatprep.mubr.f32.mxu0 %v7753_v3 }
 0x28b   :  { %v995_v38 = vpop.f32.mrf.mxu0  ;;  %5523 = vmatprep.mubr.f32.mxu1 %v7753_v3 }
 0x28d   :  { %7350 = vmatmul.mubr.msk.f32.vlgmr.msra.gmra.mxu0 %vm922_vm0, %v7348_v37  ;;  %v9458_v39 = vpop.f32.mrf.mxu0 }
 0x28e   :  { %v1072_v40 = vpop.f32.mrf.mxu1  ;;  %7352 = vmatmul.mubr.msk.f32.vlgmr.msra.gmra.mxu1 %vm922_vm0, %v7348_v37  ;;  %5452 = vmatprep.mubr.f32.mxu0 %v7753_v3 }
 0x28f   :  { %5529 = vmatprep.mubr.f32.mxu1 %v7753_v3 }
 0x290   :  { %v9466_v42 = vpop.f32.mrf.mxu1 }
 0x291   :  { %v1001_v43 = vpop.f32.mrf.mxu0  ;;  %7351 = vmatmul.mubr.msk.f32.gmra.mxu0 %vm922_vm0, %v7349_v41 }
 0x292   :  { %v1078_v44 = vpop.f32.mrf.mxu1  ;;  %7353 = vmatmul.mubr.msk.f32.gmra.mxu1 %vm922_vm0, %v7349_v41 }
 0x293   :  { %v9470_v45 = vpop.f32.mrf.mxu0 }
 0x294   :  { %v9472_v46 = vpop.f32.mrf.mxu1 }
 0x295   :  { %v1155_v47 = vpop.f32.mrf.mxu0 }
 0x296   :  { %v1156_v48 = vadd.f32 %v1155_v47, %v995_v38  ;;  %v1232_v49 = vpop.f32.mrf.mxu1 }
 0x297   :  { %v9474_v50 = vpop.f32.mrf.mxu0  ;;  %v1233_v51 = vadd.f32 %v1232_v49, %v1072_v40 }
 0x298   :  { %v9476_v52 = vpop.f32.mrf.mxu1 }
 0x299   :  { %v1161_v3 = vpop.f32.mrf.mxu0 }
 0x29a   :  { %v1162_v53 = vadd.f32 %v1161_v3, %v1001_v43  ;;  %v1238_v54 = vpop.f32.mrf.mxu1 }
 0x29b   :  { %v9478_v55 = vpop.f32.mrf.mxu0  ;;  %v1239_v56 = vadd.f32 %v1238_v54, %v1078_v44 }
 0x29c   :  { %v9480_v57 = vpop.f32.mrf.mxu1 }
 0x29d   :  { %v1334_v58 = vpop.f32.mrf.mxu0 }
 0x29e   :  { %v1422_v59 = vadd.f32 %v1334_v58, %v1156_v48  ;;  %v1411_v60 = vpop.f32.mrf.mxu1 }
 0x29f   :  { %v9482_v61 = vpop.f32.mrf.mxu0  ;;  %v1424_v63 = vadd.f32 %v1411_v60, %v1233_v51 }
 0x2a0   :  { %v9484_v0 = vpop.f32.mrf.mxu1 }
 0x2a1   :  { %v1340_v2 = vpop.f32.mrf.mxu0 }
 0x2a2   :  { %v1426_v5 = vadd.f32 %v1340_v2, %v1162_v53  ;;  %v1417_v6 = vpop.f32.mrf.mxu1 }
 0x2a3   :  { %v9486_v9 = vpop.f32.mrf.mxu0  ;;  %v1428_v10 = vadd.f32 %v1417_v6, %v1239_v56 }
 0x2a4   :  { %v9488_v11 = vpop.f32.mrf.mxu1 }
 0x2a5   :  { %v1521_v12 = vpop.f32.mrf.mxu0 }
 0x2a6   :  { %v1609_v13 = vadd.f32 %v1521_v12, %v1422_v59  ;;  %v1598_v14 = vpop.f32.mrf.mxu1 }
 0x2a7   :  { %v9490_v15 = vpop.f32.mrf.mxu0  ;;  %v1611_v16 = vadd.f32 %v1598_v14, %v1424_v63 }
 0x2a8   :  { %v9492_v17 = vpop.f32.mrf.mxu1 }
 0x2a9   :  { %v1527_v18 = vpop.f32.mrf.mxu0 }
 0x2aa   :  { %v1613_v19 = vadd.f32 %v1527_v18, %v1426_v5  ;;  %v1604_v20 = vpop.f32.mrf.mxu1 }
 0x2ab   :  { %v9494_v21 = vpop.f32.mrf.mxu0  ;;  %v1615_v1 = vadd.f32 %v1604_v20, %v1428_v10 }
 0x2ac   :  { %v9496_v23 = vpop.f32.mrf.mxu1 }
 0x2ad   :  { %v1708_v22 = vpop.f32.mrf.mxu0 }
 0x2ae   :  { %v1796_v24 = vadd.f32 %v1708_v22, %v1609_v13  ;;  %v1785_v25 = vpop.f32.mrf.mxu1 }
 0x2af   :  { %v9498_v26 = vpop.f32.mrf.mxu0  ;;  %v1798_v27 = vadd.f32 %v1785_v25, %v1611_v16 }
 0x2b0   :  { %v9500_v28 = vpop.f32.mrf.mxu1 }
 0x2b1   :  { %v1714_v29 = vpop.f32.mrf.mxu0 }
 0x2b2   :  { %v1800_v30 = vadd.f32 %v1714_v29, %v1613_v19  ;;  %v1791_v4 = vpop.f32.mrf.mxu1  ;;  %v1235_v29 = vadd.f32 %v9476_v52, %v9466_v42 }
 0x2b3   :  { %v9502_v62 = vpop.f32.mrf.mxu0  ;;  %v1802_v31 = vadd.f32 %v1791_v4, %v1615_v1  ;;  %v1158_v1 = vadd.f32 %v9474_v50, %v9458_v39 }
 0x2b4   :  { %v9504_v32 = vpop.f32.mrf.mxu1 }
 0x2b5   :  { %v1895_v7 = vpop.f32.mrf.mxu0 }
 0x2b6   :  { %v1983_v33 = vadd.f32 %v1895_v7, %v1796_v24  ;;  %v1972_v34 = vpop.f32.mrf.mxu1  ;;  %v1423_v7 = vadd.f32 %v9482_v61, %v1158_v1 }
 0x2b7   :  { %v1897_v8 = vpop.f32.mrf.mxu0  ;;  %v1985_v35 = vadd.f32 %v1972_v34, %v1798_v27  ;;  %v1425_v34 = vadd.f32 %v9484_v0, %v1235_v29 }
 0x2b8   :  { %v1974_v36 = vpop.f32.mrf.mxu1  ;;  %v1610_v39 = vadd.f32 %v9490_v15, %v1423_v7 }
 0x2b9   :  { %v1901_v37 = vpop.f32.mrf.mxu0  ;;  %v1612_v42 = vadd.f32 %v9492_v17, %v1425_v34 }
 0x2ba   :  { %v1987_v38 = vadd.f32 %v1901_v37, %v1800_v30  ;;  %v1978_v40 = vpop.f32.mrf.mxu1 }
 0x2bb   :  { %v9506_v41 = vpop.f32.mrf.mxu0  ;;  %v1989_v43 = vadd.f32 %v1978_v40, %v1802_v31  ;;  %v1164_v31 = vadd.f32 %v9478_v55, %v9470_v45  ;;  %v1797_v45 = vadd.f32 %v9498_v26, %v1610_v39  ;;  %v1799_v0 = vadd.f32 %v9500_v28, %v1612_v42 }
 0x2bc   :  { %v9508_v44 = vpop.f32.mrf.mxu1 }
 0x2bd   :  { %v2082_v47 = vpop.f32.mrf.mxu0 }
 0x2be   :  { %v2170_v48 = vadd.f32 %v2082_v47, %v1983_v33  ;;  %v2159_v49 = vpop.f32.mrf.mxu1 }
 0x2bf   :  { %v2084_v51 = vpop.f32.mrf.mxu0  ;;  %v2172_v3 = vadd.f32 %v2159_v49, %v1985_v35 }
 0x2c0   :  { %v2161_v53 = vpop.f32.mrf.mxu1 }
 0x2c1   :  { %v2088_v54 = vpop.f32.mrf.mxu0 }
 0x2c2   :  { %v2174_v56 = vadd.f32 %v2088_v54, %v1987_v38  ;;  %v2165_v58 = vpop.f32.mrf.mxu1  ;;  %v1241_v38 = vadd.f32 %v9480_v57, %v9472_v46  ;;  %v1986_v57 = vadd.f32 %v1974_v36, %v1799_v0 }
 0x2c3   :  { %v2090_v59 = vpop.f32.mrf.mxu0  ;;  %v2176_v60 = vadd.f32 %v2165_v58, %v1989_v43  ;;  %v1427_v43 = vadd.f32 %v9486_v9, %v1164_v31 }
 0x2c4   :  { %v9510_v63 = vpop.f32.mrf.mxu1  ;;  %v1429_v61 = vadd.f32 %v9488_v11, %v1241_v38  ;;  %v2173_v11 = vadd.f32 %v2161_v53, %v1986_v57 }
 0x2c5   :  { %v2269_v2 = vpop.f32.mrf.mxu0  ;;  %v1614_v15 = vadd.f32 %v9494_v21, %v1427_v43 }
 0x2c6   :  { %v2357_v5 = vadd.f32 %v2269_v2, %v2170_v48  ;;  %v2346_v6 = vpop.f32.mrf.mxu1  ;;  %v1984_v48 = vadd.f32 %v1897_v8, %v1797_v45  ;;  %v1616_v46 = vadd.f32 %v9496_v23, %v1429_v61 }
 0x2c7   :  { %v2271_v10 = vpop.f32.mrf.mxu0  ;;  %v2359_v12 = vadd.f32 %v2346_v6, %v2172_v3  ;;  %v1801_v9 = vadd.f32 %v9502_v62, %v1614_v15 }
 0x2c8   :  { %v2348_v13 = vpop.f32.mrf.mxu1  ;;  %v1803_v58 = vadd.f32 %v9504_v32, %v1616_v46 }
 0x2c9   :  { %v2275_v14 = vpop.f32.mrf.mxu0  ;;  %v1988_v28 = vadd.f32 %v9506_v41, %v1801_v9  ;;  %v2360_v6 = vadd.f32 %v2348_v13, %v2173_v11 }
 0x2ca   :  { %v2361_v16 = vadd.f32 %v2275_v14, %v2174_v56  ;;  %v2352_v18 = vpop.f32.mrf.mxu1  ;;  %v2171_v56 = vadd.f32 %v2084_v51, %v1984_v48 }
 0x2cb   :  { %v2277_v19 = vpop.f32.mrf.mxu0  ;;  %v2363_v20 = vadd.f32 %v2352_v18, %v2176_v60 }
 0x2cc   :  { %v2354_v22 = vpop.f32.mrf.mxu1  ;;  %v2358_v2 = vadd.f32 %v2271_v10, %v2171_v56 }
 0x2cd   :  { %v2456_v24 = vpop.f32.mrf.mxu0 }
 0x2ce   :  { %v2544_v25 = vadd.f32 %v2456_v24, %v2357_v5  ;;  %v2533_v27 = vpop.f32.mrf.mxu1  ;;  %v1990_v5 = vadd.f32 %v9508_v44, %v1803_v58 }
 0x2cf   :  { %v2458_v30 = vpop.f32.mrf.mxu0  ;;  %v2546_v4 = vadd.f32 %v2533_v27, %v2359_v12  ;;  %v2175_v12 = vadd.f32 %v2090_v59, %v1988_v28 }
 0x2d0   :  { %v2535_v33 = vpop.f32.mrf.mxu1  ;;  %v2545_v14 = vadd.f32 %v2458_v30, %v2358_v2  ;;  %v2177_v62 = vadd.f32 %v9510_v63, %v1990_v5 }
 0x2d1   :  { %v2462_v35 = vpop.f32.mrf.mxu0  ;;  %v2547_v51 = vadd.f32 %v2535_v33, %v2360_v6  ;;  %v2362_v32 = vadd.f32 %v2277_v19, %v2175_v12 }
 0x2d2   :  { %v2548_v50 = vadd.f32 %v2462_v35, %v2361_v16  ;;  %v2539_v37 = vpop.f32.mrf.mxu1  ;;  %v2364_v41 = vadd.f32 %v2354_v22, %v2177_v62 }
 0x2d3   :  { %v2464_v52 = vpop.f32.mrf.mxu0  ;;  %v2550_v40 = vadd.f32 %v2539_v37, %v2363_v20 }
 0x2d4   :  { %v2541_v55 = vpop.f32.mrf.mxu1  ;;  %v2549_v27 = vadd.f32 %v2464_v52, %v2362_v32 }
 0x2d5   :  { %v2643_v47 = vpop.f32.mrf.mxu0  ;;  %v2551_v29 = vadd.f32 %v2541_v55, %v2364_v41 }
 0x2d6   :  { %v2731_v49 = vadd.f32 %v2643_v47, %v2544_v25  ;;  %v2720_v3 = vpop.f32.mrf.mxu1 }
 0x2d7   :  { %v2645_v17 = vpop.f32.mrf.mxu0  ;;  %v2733_v54 = vadd.f32 %v2720_v3, %v2546_v4 }
 0x2d8   :  { %v2722_v26 = vpop.f32.mrf.mxu1  ;;  %v2732_v53 = vadd.f32 %v2645_v17, %v2545_v14 }
 0x2d9   :  { %v2649_v60 = vpop.f32.mrf.mxu0  ;;  %v2734_v10 = vadd.f32 %v2722_v26, %v2547_v51 }
 0x2da   :  { %v2735_v21 = vadd.f32 %v2649_v60, %v2548_v50  ;;  %v2726_v8 = vpop.f32.mrf.mxu1 }
 0x2db   :  { %v2651_v23 = vpop.f32.mrf.mxu0  ;;  %v2737_v36 = vadd.f32 %v2726_v8, %v2550_v40 }
 0x2dc   :  { %v2728_v16 = vpop.f32.mrf.mxu1  ;;  %v2736_v30 = vadd.f32 %v2651_v23, %v2549_v27 }
 0x2dd   :  { %v2830_v18 = vpop.f32.mrf.mxu0  ;;  %v2738_v63 = vadd.f32 %v2728_v16, %v2551_v29 }
 0x2de   :  { %v2918_v20 = vadd.f32 %v2830_v18, %v2731_v49  ;;  %v2907_v1 = vpop.f32.mrf.mxu1 }
 0x2df   :  { %v2832_v24 = vpop.f32.mrf.mxu0  ;;  %v2920_v25 = vadd.f32 %v2907_v1, %v2733_v54 }
 0x2e0   :  { %v2919_v44 = vadd.f32 %v2832_v24, %v2732_v53  ;;  %v2909_v13 = vpop.f32.mrf.mxu1 }
 0x2e1   :  { %v2836_v4 = vpop.f32.mrf.mxu0  ;;  %v2921_v59 = vadd.f32 %v2909_v13, %v2734_v10 }
 0x2e2   :  { %v2922_v31 = vadd.f32 %v2836_v4, %v2735_v21  ;;  %v2913_v7 = vpop.f32.mrf.mxu1 }
 0x2e3   :  { %v2838_v33 = vpop.f32.mrf.mxu0  ;;  %v2924_v34 = vadd.f32 %v2913_v7, %v2737_v36 }
 0x2e4   :  { %v2923_v19 = vadd.f32 %v2838_v33, %v2736_v30  ;;  %v2915_v35 = vpop.f32.mrf.mxu1 }
 0x2e5   :  { %v2925_v39 = vadd.f32 %v2915_v35, %v2738_v63  ;;  %v3017_v50 = vpop.f32.mrf.mxu0 }
 0x2e6   :  { %v3105_v22 = vadd.f32 %v3017_v50, %v2918_v20  ;;  %v3094_v37 = vpop.f32.mrf.mxu1 }
 0x2e7   :  { %v3019_v38 = vpop.f32.mrf.mxu0  ;;  %v3107_v42 = vadd.f32 %v3094_v37, %v2920_v25 }
 0x2e8   :  { %v3106_v52 = vadd.f32 %v3019_v38, %v2919_v44  ;;  %v3096_v40 = vpop.f32.mrf.mxu1 }
 0x2e9   :  { %v3023_v43 = vpop.f32.mrf.mxu0  ;;  %v3108_v45 = vadd.f32 %v3096_v40, %v2921_v59 }
 0x2ea   :  { %v3109_v55 = vadd.f32 %v3023_v43, %v2922_v31  ;;  %v3100_v61 = vpop.f32.mrf.mxu1 }
 0x2eb   :  { %v3025_v0 = vpop.f32.mrf.mxu0  ;;  %v3111_v47 = vadd.f32 %v3100_v61, %v2924_v34 }
 0x2ec   :  { %v3110_v15 = vadd.f32 %v3025_v0, %v2923_v19  ;;  %v3102_v48 = vpop.f32.mrf.mxu1 }
 0x2ed   :  { %v3112_v49 = vadd.f32 %v3102_v48, %v2925_v39  ;;  %v3204_v3 = vpop.f32.mrf.mxu0 }
 0x2ee   :  { %v3292_v46 = vadd.f32 %v3204_v3, %v3105_v22  ;;  %v3281_v57 = vpop.f32.mrf.mxu1 }
 0x2ef   :  { %v3206_v17 = vpop.f32.mrf.mxu0  ;;  %v3294_v54 = vadd.f32 %v3281_v57, %v3107_v42 }
 0x2f0   :  { %v3293_v9 = vadd.f32 %v3206_v17, %v3106_v52  ;;  %v3283_v56 = vpop.f32.mrf.mxu1 }
 0x2f1   :  { %v3210_v26 = vpop.f32.mrf.mxu0  ;;  %v3295_v58 = vadd.f32 %v3283_v56, %v3108_v45 }
 0x2f2   :  { %v3296_v11 = vadd.f32 %v3210_v26, %v3109_v55  ;;  %v3287_v60 = vpop.f32.mrf.mxu1 }
 0x2f3   :  { %v3212_v28 = vpop.f32.mrf.mxu0  ;;  %v3298_v2 = vadd.f32 %v3287_v60, %v3111_v47 }
 0x2f4   :  { %v3297_v21 = vadd.f32 %v3212_v28, %v3110_v15  ;;  %v3289_v8 = vpop.f32.mrf.mxu1 }
 0x2f5   :  { %v3299_v5 = vadd.f32 %v3289_v8, %v3112_v49  ;;  %v3391_v6 = vpop.f32.mrf.mxu0 }
 0x2f6   :  { %v9535_v23 = vadd.f32 %v3391_v6, %v3292_v46  ;;  %v3468_v36 = vpop.f32.mrf.mxu1 }
 0x2f7   :  { %v3393_v12 = vpop.f32.mrf.mxu0  ;;  %v9537_v14 = vadd.f32 %v3468_v36, %v3294_v54 }
 0x2f8   :  { %v9539_v16 = vadd.f32 %v3393_v12, %v3293_v9  ;;  %v3470_v62 = vpop.f32.mrf.mxu1 }
 0x2f9   :  { %v3397_v51 = vpop.f32.mrf.mxu0  ;;  %v9541_v18 = vadd.f32 %v3470_v62, %v3295_v58 }
 0x2fa   :  { %v3483_v32 = vadd.f32 %v3397_v51, %v3296_v11  ;;  %v3474_v53 = vpop.f32.mrf.mxu1 }
 0x2fb   :  { %v3399_v20 = vpop.f32.mrf.mxu0  ;;  %v3485_v1 = vadd.f32 %v3474_v53, %v3298_v2 }
 0x2fc   :  { %v3484_v41 = vadd.f32 %v3399_v20, %v3297_v21  ;;  %v3476_v10 = vpop.f32.mrf.mxu1 }
 0x2fd   :  { %v3486_v24 = vadd.f32 %v3476_v10, %v3299_v5  ;;  %v9543_v25 = vpop.f32.mrf.mxu0 }
 0x2fe   :  { %v9545_v27 = vpop.f32.mrf.mxu1 }
 0x2ff   :  { %v9547_v44 = vpop.f32.mrf.mxu0 }
 0x300   :  { %v9549_v13 = vpop.f32.mrf.mxu1 }
 0x301   :  { %v3584_v29 = vpop.f32.mrf.mxu0 }
 0x302   :  { %v9551_v4 = vadd.f32 %v3584_v29, %v3483_v32  ;;  %v3661_v59 = vpop.f32.mrf.mxu1 }
 0x303   :  { %v3586_v30 = vpop.f32.mrf.mxu0  ;;  %v9553_v31 = vadd.f32 %v3661_v59, %v3485_v1 }
 0x304   :  { %v9555_v7 = vadd.f32 %v3586_v30, %v3484_v41  ;;  %v3663_v63 = vpop.f32.mrf.mxu1 }
 0x305   :  { %v9557_v33 = vadd.f32 %v3663_v63, %v3486_v24  ;;  %v3765_v34 = vpop.f32.mrf.mxu0 }
 0x306   :  { %v3842_v19 = vpop.f32.mrf.mxu1 }
 0x307   :  { %v3767_v35 = vpop.f32.mrf.mxu0 }
 0x308   :  { %v3844_v39 = vpop.f32.mrf.mxu1 }
 0x309   :  { %v9559_v50 = vpop.f32.mrf.mxu0 }
 0x30a   :  { %v9561_v22 = vpop.f32.mrf.mxu1 }
 0x30b   :  { %v9563_v37 = vpop.f32.mrf.mxu0 }
 0x30c   :  { %v9565_v38 = vpop.f32.mrf.mxu1 }
 0x30d   :  { %v3952_v42 = vpop.f32.mrf.mxu0 }
 0x30e   :  { %v4029_v52 = vpop.f32.mrf.mxu1 }
 0x30f   :  { %v3954_v40 = vpop.f32.mrf.mxu0 }
 0x310   :  { %v4031_v43 = vpop.f32.mrf.mxu1 }
 0x311   :  { %v9567_v45 = vpop.f32.mrf.mxu0 }
 0x312   :  { %v9569_v55 = vpop.f32.mrf.mxu1 }
 0x313   :  { %v9571_v61 = vpop.f32.mrf.mxu0 }
 0x314   :  { %v9573_v0 = vpop.f32.mrf.mxu1 }
 0x315   :  { %v4139_v47 = vpop.f32.mrf.mxu0 }
 0x316   :  { %v4216_v15 = vpop.f32.mrf.mxu1 }
 0x317   :  { %v4141_v48 = vpop.f32.mrf.mxu0 }
 0x318   :  { %v4218_v49 = vpop.f32.mrf.mxu1 }
 0x319   :  { %v9575_v3 = vpop.f32.mrf.mxu0 }
 0x31a   :  { %v9577_v46 = vpop.f32.mrf.mxu1 }
 0x31b   :  { %v9579_v57 = vpop.f32.mrf.mxu0 }
 0x31c   :  { %10700 = vst [vmem:[#allocation3_spill] sm:$0xff] %v9579_v57  ;;  %v9581_v17 = vpop.f32.mrf.mxu1 }
 0x31d   :  { %v4326_v54 = vpop.f32.mrf.mxu0 }
 0x31e   :  { %v4403_v9 = vpop.f32.mrf.mxu1 }
 0x31f   :  { %v4328_v56 = vpop.f32.mrf.mxu0 }
 0x320   :  { %v4405_v26 = vpop.f32.mrf.mxu1 }
 0x321   :  { %v9583_v58 = vpop.f32.mrf.mxu0 }
 0x322   :  { %10701 = vst [vmem:[#allocation4_spill] sm:$0xff] %v9583_v58  ;;  %v9585_v11 = vpop.f32.mrf.mxu1 }
 0x323   :  { %v9587_v60 = vpop.f32.mrf.mxu0 }
 0x324   :  { %10702 = vst [vmem:[#allocation5_spill] sm:$0xff] %v9587_v60  ;;  %v9589_v28 = vpop.f32.mrf.mxu1  ;;  %v3666_v60 = vadd.f32 %v9543_v25, %v9535_v23 }
 0x325   :  { %v4513_v2 = vpop.f32.mrf.mxu0 }
 0x326   :  { %v4590_v21 = vpop.f32.mrf.mxu1 }
 0x327   :  { %v9591_v8 = vpop.f32.mrf.mxu0 }
 0x328   :  { %v9593_v5 = vpop.f32.mrf.mxu1 }
 0x329   :  { %v9595_v6 = vpop.f32.mrf.mxu0 }
 0x32a   :  { %10703 = vst [vmem:[#allocation6_spill] sm:$0xff] %v9595_v6  ;;  %v9597_v36 = vpop.f32.mrf.mxu1 }
 0x32b   :  { %v9599_v12 = vpop.f32.mrf.mxu0 }
 0x32c   :  { %10704 = vst [vmem:[#allocation7_spill] sm:$0xff] %v9599_v12  ;;  %v9601_v62 = vpop.f32.mrf.mxu1 }
 0x32d   :  { %10705 = vst [vmem:[#allocation8_spill] sm:$0xff] %v9601_v62  ;;  %v4700_v51 = vpop.f32.mrf.mxu0 }
 0x32e   :  { %v4777_v32 = vpop.f32.mrf.mxu1 }
 0x32f   :  { %v9603_v53 = vpop.f32.mrf.mxu0 }
 0x330   :  { %10706 = vst [vmem:[#allocation9_spill] sm:$0xff] %v9603_v53  ;;  %v9605_v20 = vpop.f32.mrf.mxu1 }
 0x331   :  { %10707 = vst [vmem:[#allocation10_spill] sm:$0xff] %v9605_v20  ;;  %v9607_v1 = vpop.f32.mrf.mxu0 }
 0x332   :  { %10708 = vst [vmem:[#allocation11_spill] sm:$0xff] %v9607_v1  ;;  %v9609_v41 = vpop.f32.mrf.mxu1  ;;  %v3668_v1 = vadd.f32 %v9545_v27, %v9537_v14  ;;  %v3859_v14 = vadd.f32 %v9561_v22, %v9553_v31  ;;  %v3857_v31 = vadd.f32 %v9559_v50, %v9551_v4 }
 0x333   :  { %10709 = vst [vmem:[#allocation12_spill] sm:$0xff] %v9609_v41  ;;  %v9611_v10 = vpop.f32.mrf.mxu0 }
 0x334   :  { %10710 = vst [vmem:[#allocation13_spill] sm:$0xff] %v9611_v10  ;;  %v9613_v24 = vpop.f32.mrf.mxu1 }
 0x335   :  { %10711 = vst [vmem:[#allocation14_spill] sm:$0xff] %v9613_v24  ;;  %v4887_v29 = vpop.f32.mrf.mxu0  ;;  %v3667_v24 = vadd.f32 %v9547_v44, %v9539_v16 }
 0x336   :  { %v4964_v59 = vpop.f32.mrf.mxu1 }
 0x337   :  { %v9615_v30 = vpop.f32.mrf.mxu0  ;;  %v3854_v58 = vadd.f32 %v3767_v35, %v3667_v24 }
 0x338   :  { %10712 = vst [vmem:[#allocation15_spill] sm:$0xff] %v9615_v30  ;;  %v9617_v63 = vpop.f32.mrf.mxu1  ;;  %v3853_v30 = vadd.f32 %v3765_v34, %v3666_v60 }
 0x339   :  { %10713 = vst [vmem:[#allocation16_spill] sm:$0xff] %v9617_v63  ;;  %v9619_v12 = vpop.f32.mrf.mxu0  ;;  %v3669_v63 = vadd.f32 %v9549_v13, %v9541_v18  ;;  %v3860_v18 = vadd.f32 %v9565_v38, %v9557_v33  ;;  %v4046_v13 = vadd.f32 %v9569_v55, %v3859_v14  ;;  %v10726_v14 = vld [vmem:[#allocation5_spill] sm:$0xff] }
 0x33a   :  { %10714 = vst [vmem:[#allocation17_spill] sm:$0xff] %v9619_v12  ;;  %v9621_v6 = vpop.f32.mrf.mxu1  ;;  %v3855_v12 = vadd.f32 %v3842_v19, %v3668_v1  ;;  %v4040_v23 = vadd.f32 %v3952_v42, %v3853_v30  ;;  %v10722_v1 = vld [vmem:[#allocation8_spill] sm:$0xff] }
 0x33b   :  { %10715 = vst [vmem:[#allocation18_spill] sm:$0xff] %v9621_v6  ;;  %v9627_v41 = vpop.f32.mrf.mxu0  ;;  %v3856_v57 = vadd.f32 %v3844_v39, %v3669_v63  ;;  %v4047_v22 = vadd.f32 %v9573_v0, %v3860_v18 }
 0x33c   :  { %10716 = vst [vmem:[#allocation19_spill] sm:$0xff] %v9627_v41  ;;  %v9629_v10 = vpop.f32.mrf.mxu1  ;;  %v4042_v25 = vadd.f32 %v4029_v52, %v3855_v12  ;;  %v4041_v41 = vadd.f32 %v3954_v40, %v3854_v58  ;;  %v4227_v53 = vadd.f32 %v4139_v47, %v4040_v23  ;;  %v4233_v40 = vadd.f32 %v9577_v46, %v4046_v13  ;;  %v10728_v18 = vld [vmem:[#allocation14_spill] sm:$0xff] }
 0x33d   :  { %10717 = vst [vmem:[#allocation20_spill] sm:$0xff] %v9629_v10  ;;  %v5074_v62 = vpop.f32.mrf.mxu0  ;;  %v4043_v10 = vadd.f32 %v4031_v43, %v3856_v57  ;;  %v4234_v57 = vadd.f32 %v9581_v17, %v4047_v22  ;;  %v10718_v17 = vld [vmem:[#allocation9_spill] sm:$0xff] }
 0x33e   :  { %v5151_v6 = vpop.f32.mrf.mxu1  ;;  %v4229_v16 = vadd.f32 %v4216_v15, %v4042_v25  ;;  %v4228_v19 = vadd.f32 %v4141_v48, %v4041_v41  ;;  %v4414_v39 = vadd.f32 %v4326_v54, %v4227_v53  ;;  %v3858_v48 = vadd.f32 %v9563_v37, %v9555_v7  ;;  %v10723_v41 = vld [vmem:[#allocation12_spill] sm:$0xff] }
 0x33f   :  { %v5076_v20 = vpop.f32.mrf.mxu0  ;;  %v4230_v35 = vadd.f32 %v4218_v49, %v4043_v10  ;;  %v4044_v49 = vadd.f32 %v9567_v45, %v3857_v31  ;;  %v4420_v54 = vadd.f32 %v9585_v11, %v4233_v40  ;;  %v4421_v7 = vadd.f32 %v9589_v28, %v4234_v57  ;;  %v10719_v11 = vld [vmem:[#allocation10_spill] sm:$0xff]  ;;  %v10724_v28 = vld [vmem:[#allocation15_spill] sm:$0xff] }
 0x340   :  { %v5153_v27 = vpop.f32.mrf.mxu1  ;;  %v4416_v42 = vadd.f32 %v4403_v9, %v4229_v16  ;;  %v4415_v47 = vadd.f32 %v4328_v56, %v4228_v19  ;;  %v4601_v33 = vadd.f32 %v4513_v2, %v4414_v39 }
 0x341   :  { %v9637_v44 = vpop.f32.mrf.mxu0  ;;  %v4417_v15 = vadd.f32 %v4405_v26, %v4230_v35  ;;  %v4045_v26 = vadd.f32 %v9571_v61, %v3858_v48  ;;  %v4231_v58 = vadd.f32 %v9575_v3, %v4044_v49  ;;  %v4607_v37 = vadd.f32 %v9597_v36, %v4420_v54  ;;  %v10725_v36 = vld [vmem:[#allocation16_spill] sm:$0xff] }
 0x342   :  { %v5157_v34 = vpop.f32.mrf.mxu1  ;;  %v4603_v38 = vadd.f32 %v4590_v21, %v4416_v42  ;;  %v4602_v50 = vadd.f32 %v9591_v8, %v4415_v47  ;;  %v4788_v46 = vadd.f32 %v4700_v51, %v4601_v33  ;;  %v4608_v61 = vadd.f32 %v10722_v1, %v4421_v7  ;;  %v10729_v19 = vld [vmem:[#allocation18_spill] sm:$0xff] }
 0x343   :  { %v9642_v52 = vpop.f32.mrf.mxu0  ;;  %v4604_v0 = vadd.f32 %v9593_v5, %v4417_v15  ;;  %v10720_v5 = vld [vmem:[#allocation3_spill] sm:$0xff]  ;;  %v4794_v3 = vadd.f32 %v10723_v41, %v4607_v37 }
 0x344   :  { %v5159_v43 = vpop.f32.mrf.mxu1  ;;  %v4790_v9 = vadd.f32 %v4777_v32, %v4603_v38  ;;  %v4789_v60 = vadd.f32 %v10718_v17, %v4602_v50  ;;  %v4975_v21 = vadd.f32 %v4887_v29, %v4788_v46  ;;  %v4232_v51 = vadd.f32 %v10720_v5, %v4045_v26  ;;  %v10721_v32 = vld [vmem:[#allocation4_spill] sm:$0xff]  ;;  %v10730_v15 = vld [vmem:[#allocation7_spill] sm:$0xff]  ;;  %v5549_v26 = vpop.permute.xlu0 %5548 }
 0x345   :  { %v5261_v55 = vpop.f32.mrf.mxu0  ;;  %v4791_v2 = vadd.f32 %v10719_v11, %v4604_v0  ;;  %v4418_v53 = vadd.f32 %v10721_v32, %v4231_v58  ;;  %v4795_v13 = vadd.f32 %v10728_v18, %v4608_v61  ;;  %v4981_v35 = vadd.f32 %v10729_v19, %v4794_v3  ;;  %v10731_v38 = vld [vmem:[#allocation11_spill] sm:$0xff]  ;;  %v10733_v58 = vld [vmem:[#allocation13_spill] sm:$0xff] }
 0x346   :  { %v5338_v4 = vpop.f32.mrf.mxu1  ;;  %v4977_v8 = vadd.f32 %v4964_v59, %v4790_v9  ;;  %v4976_v24 = vadd.f32 %v10724_v28, %v4789_v60  ;;  %v5162_v63 = vadd.f32 %v5074_v62, %v4975_v21  ;;  %v4419_v29 = vadd.f32 %v10726_v14, %v4232_v51  ;;  %v10727_v59 = vld [vmem:[#allocation6_spill] sm:$0xff] }
 0x347   :  { %v5263_v56 = vpop.f32.mrf.mxu0  ;;  %v4978_v30 = vadd.f32 %v10725_v36, %v4791_v2  ;;  %v4605_v16 = vadd.f32 %v10727_v59, %v4418_v53  ;;  %v5168_v49 = vadd.f32 %v5157_v34, %v4981_v35  ;;  %v10735_v2 = vld [vmem:[#allocation19_spill] sm:$0xff] }
 0x348   :  { %v5340_v45 = vpop.f32.mrf.mxu1  ;;  %v5164_v23 = vadd.f32 %v5151_v6, %v4977_v8  ;;  %v5163_v42 = vadd.f32 %v5076_v20, %v4976_v24  ;;  %v5349_v22 = vadd.f32 %v5261_v55, %v5162_v63  ;;  %v4606_v33 = vadd.f32 %v10730_v15, %v4419_v29  ;;  %v10732_v6 = vld [vmem:[#allocation20_spill] sm:$0xff]  ;;  %v5554_v24 = vpop.permute.xlu1 %5553 }
 0x349   :  { %v5267_v12 = vpop.f32.mrf.mxu0  ;;  %v5165_v31 = vadd.f32 %v5153_v27, %v4978_v30  ;;  %v4792_v62 = vadd.f32 %v10731_v38, %v4605_v16  ;;  %v4982_v48 = vadd.f32 %v10732_v6, %v4795_v13  ;;  %v10734_v27 = vld [vmem:[#allocation17_spill] sm:$0xff] }
 0x34a   :  { %v5344_v10 = vpop.f32.mrf.mxu1  ;;  %v5351_v40 = vadd.f32 %v5338_v4, %v5164_v23  ;;  %v5350_v54 = vadd.f32 %v5263_v56, %v5163_v42  ;;  %v4793_v20 = vadd.f32 %v10733_v58, %v4606_v33 }
 0x34b   :  { %v5269_v25 = vpop.f32.mrf.mxu0  ;;  %v5352_v50 = vadd.f32 %v5340_v45, %v5165_v31  ;;  %v4979_v55 = vadd.f32 %v10734_v27, %v4792_v62  ;;  %v5169_v4 = vadd.f32 %v5159_v43, %v4982_v48  ;;  %v5355_v37 = vadd.f32 %v5344_v10, %v5168_v49 }
 0x34c   :  { %v5346_v39 = vpop.f32.mrf.mxu1  ;;  %v4980_v21 = vadd.f32 %v10735_v2, %v4793_v20 }
 0x34d   :  { %v5448_v47 = vpop.f32.mrf.mxu0  ;;  %v5166_v34 = vadd.f32 %v9637_v44, %v4979_v55  ;;  %v5356_v56 = vadd.f32 %v5346_v39, %v5169_v4 }
 0x34e   :  { %v5525_v57 = vpop.f32.mrf.mxu1  ;;  %v5536_v0 = vadd.f32 %v5448_v47, %v5349_v22  ;;  %v5167_v1 = vadd.f32 %v9642_v52, %v4980_v21 }
 0x34f   :  { %v5450_v46 = vpop.f32.mrf.mxu0  ;;  %v5538_v9 = vadd.f32 %v5525_v57, %v5351_v40  ;;  %v5353_v43 = vadd.f32 %v5267_v12, %v5166_v34 }
 0x350   :  { %v5527_v7 = vpop.f32.mrf.mxu1  ;;  %v5537_v17 = vadd.f32 %v5450_v46, %v5350_v54  ;;  %v5556_v5 = vadd.f32 %v5549_v26, %v5536_v0  ;;  %v5354_v36 = vadd.f32 %v5269_v25, %v5167_v1 }
 0x351   :  { %v5558_v60 = vadd.f32 %v5549_v26, %v5538_v9  ;;  %v5539_v11 = vadd.f32 %v5527_v7, %v5352_v50  ;;  %v5454_v45 = vpop.f32.mrf.mxu0 }
 0x352   :  { %v5531_v8 = vpop.f32.mrf.mxu1  ;;  %v5557_v41 = vadd.f32 %v5549_v26, %v5537_v17  ;;  %v5564_v44 = vmax.f32 %v5556_v5, 0.0  ;;  %v5540_v30 = vadd.f32 %v5454_v45, %v5353_v43 }
 0x353   :  { %v5566_v51 = vmax.f32 %v5558_v60, 0.0  ;;  %v5559_v32 = vadd.f32 %v5549_v26, %v5539_v11  ;;  %v5542_v53 = vadd.f32 %v5531_v8, %v5355_v37  ;;  %v5456_v28 = vpop.f32.mrf.mxu0 }
 0x354   :  { %v5533_v61 = vpop.f32.mrf.mxu1  ;;  %v5565_v23 = vmax.f32 %v5557_v41, 0.0  ;;  %v5541_v14 = vadd.f32 %v5456_v28, %v5354_v36  ;;  %v5560_v12 = vadd.f32 %v5554_v24, %v5540_v30 }
 0x355   :  { %v5567_v3 = vmax.f32 %v5559_v32, 0.0  ;;  %v5543_v10 = vadd.f32 %v5533_v61, %v5356_v56  ;;  %5584 = vrot.lane.b32.xlu1 %v5566_v51, %s7755_s0  ;;  %v5562_v63 = vadd.f32 %v5554_v24, %v5542_v53 }
 0x356   :  { %v5561_v16 = vadd.f32 %v5554_v24, %v5541_v14  ;;  %v5568_v25 = vmax.f32 %v5560_v12, 0.0 }
 0x357   :  { %5586 = vrot.lane.b32.xlu0 %v5567_v3, %s7755_s0  ;;  %v5563_v29 = vadd.f32 %v5554_v24, %v5543_v10  ;;  %v5570_v52 = vmax.f32 %v5562_v63, 0.0  ;;  %v6253_v10 = vld [vmem:[#allocation2 + $0x1f8] sm:$0xff] }
 0x358   :  { %v5569_v18 = vmax.f32 %v5561_v16, 0.0  ;;  %7434 = vmatprep.subr.mxu1 %v6253_v10 }
 0x359   :  { %5580 = vrot.lane.b32.xlu1 %v5564_v44, %s7755_s0  ;;  %v5571_v59 = vmax.f32 %v5563_v29, 0.0 }
 0x35b   :  { %5582 = vrot.lane.b32.xlu0 %v5565_v23, %s7755_s0 }
 0x35d   :  { %5592 = vrot.lane.b32.xlu1 %v5570_v52, %s7755_s0 }
 0x35f   :  { %5594 = vrot.lane.b32.xlu0 %v5571_v59, %s7755_s0 }
 0x361   :  { %5588 = vrot.lane.b32.xlu1 %v5568_v25, %s7755_s0 }
 0x363   :  { %5590 = vrot.lane.b32.xlu0 %v5569_v18, %s7755_s0 }
 0x3c7   :  { %v5585_v13 = vpop.permute.xlu1 %5584 }
 0x3c9   :  { %v5587_v19 = vpop.permute.xlu0 %5586 }
 0x3ca   :  { %v5598_v35 = vsel %vm914_vm1, %v5585_v13, %v5587_v19  ;;  %v5613_v39 = vmax.f32 %v5567_v3, %v5587_v19 }
 0x3cb   :  { %v5612_v42 = vmax.f32 %v5566_v51, %v5598_v35  ;;  %v5581_v31 = vpop.permute.xlu1 %5580 }
 0x3cc   :  { %5632 = vrot.lane.b32.xlu0 %v5613_v39, %s7759_s18 }
 0x3cd   :  { %v5583_v22 = vpop.permute.xlu0 %5582  ;;  %5630 = vrot.lane.b32.xlu1 %v5612_v42, %s7759_s18 }
 0x3ce   :  { %v5596_v40 = vsel %vm914_vm1, %v5581_v31, %v5583_v22  ;;  %v5597_v47 = vsel %vm914_vm1, %v5583_v22, %v5585_v13 }
 0x3cf   :  { %v5610_v15 = vmax.f32 %v5564_v44, %v5596_v40  ;;  %v5611_v33 = vmax.f32 %v5565_v23, %v5597_v47  ;;  %v5593_v38 = vpop.permute.xlu1 %5592 }
 0x3d1   :  { %v5595_v62 = vpop.permute.xlu0 %5594  ;;  %5628 = vrot.lane.b32.xlu0 %v5611_v33, %s7759_s18  ;;  %5626 = vrot.lane.b32.xlu1 %v5610_v15, %s7759_s18 }
 0x3d2   :  { %v5601_v6 = vsel %vm914_vm1, %v5593_v38, %v5595_v62  ;;  %v5617_v48 = vmax.f32 %v5571_v59, %v5595_v62 }
 0x3d3   :  { %v9695_v49 = vmax.f32 %v5570_v52, %v5601_v6  ;;  %v5589_v57 = vpop.permute.xlu1 %5588 }
 0x3d5   :  { %v5591_v54 = vpop.permute.xlu0 %5590  ;;  %5640 = vrot.lane.b32.xlu0 %v5617_v48, %s7759_s18  ;;  %5638 = vrot.lane.b32.xlu1 %v9695_v49, %s7759_s18 }
 0x3d6   :  { %v5599_v50 = vsel %vm914_vm1, %v5589_v57, %v5591_v54  ;;  %v5600_v0 = vsel %vm914_vm1, %v5591_v54, %v5593_v38  ;;  %vm5724_vm1 = vcmask 7168  }
 0x3d7   :  { %v5614_v46 = vmax.f32 %v5568_v25, %v5599_v50  ;;  %v9702_v9 = vmax.f32 %v5569_v18, %v5600_v0  ;;  %v6129_v50 = vld [vmem:[%s10669_s5 + $0x18] sm:$0xff] }
 0x3d8   :  { %6559 = vmatprep.mubr.f32.mxu1 %v6129_v50  ;;  %v6675_v50 = vld [vmem:[%s10671_s8 + $0x18] sm:$0xff] }
 0x3d9   :  { %5636 = vrot.lane.b32.xlu0 %v9702_v9, %s7759_s18  ;;  %5634 = vrot.lane.b32.xlu1 %v5614_v46, %s7759_s18  ;;  %s7780_s18 = smov 73  }
 0x43e   :  { %v5633_v26 = vpop.permute.xlu0 %5632 }
 0x43f   :  { %v5631_v58 = vpop.permute.xlu1 %5630 }
 0x440   :  { %v5644_v20 = vsel %vm1815_vm5, %v5631_v58, %v5633_v26  ;;  %v6269_v26 = vld [vmem:[%s10670_s6 + $0x78] sm:$0xff] }
 0x441   :  { %v9708_v27 = vmax.f32 %v5612_v42, %v5644_v20 }
 0x443   :  { %v5629_v55 = vpop.permute.xlu0 %5628  ;;  %6110 = vrot.lane.b32.xlu1 %v9708_v27, %s7775_s30  ;;  %6046 = vrot.lane.b32.xlu0 %v9708_v27, %s7779_s3  ;;  %v5627_v4 = vpop.permute.xlu1 %5626 }
 0x444   :  { %v5642_v7 = vsel %vm1815_vm5, %v5627_v4, %v5629_v55  ;;  %v5643_v56 = vsel %vm1815_vm5, %v5629_v55, %v5631_v58  ;;  %v6267_v55 = vld [vmem:[%s10670_s6 + $0x68] sm:$0xff] }
 0x445   :  { %v9715_v37 = vmax.f32 %v5610_v15, %v5642_v7  ;;  %v9752_v45 = vmax.f32 %v5611_v33, %v5643_v56 }
 0x447   :  { %v9717_v17 = vpop.permute.xlu0 %5640  ;;  %6102 = vrot.lane.b32.xlu1 %v9708_v27, %s7780_s18  ;;  %6038 = vrot.lane.b32.xlu0 %v9708_v27, %s7757_s16  ;;  %v9723_v60 = vpop.permute.xlu1 %5638  ;;  %5725 = vst.msk [vmem:[#allocation2] sm:$0xff] %vm5724_vm1, %v9715_v37 }
 0x448   :  { %v5647_v8 = vsel %vm1815_vm5, %v9723_v60, %v9717_v17  ;;  %v6265_v17 = vld [vmem:[%s10670_s6 + $0x58] sm:$0xff] }
 0x449   :  { %v5659_v5 = vmax.f32 %v9695_v49, %v5647_v8  ;;  %v6127_v49 = vld [vmem:[%s10669_s5 + $0x8] sm:$0xff]  ;;  %v6261_v8 = vld [vmem:[%s10670_s6 + $0x38] sm:$0xff] }
 0x44a   :  { %6414 = vmatprep.mubr.f32.mxu0 %v6127_v49 }
 0x44b   :  { %v9727_v11 = vpop.permute.xlu0 %5636  ;;  %6094 = vrot.lane.b32.xlu1 %v9708_v27, %s7781_s12  ;;  %6030 = vrot.lane.b32.xlu0 %v9708_v27, %s7755_s0  ;;  %v5635_v2 = vpop.permute.xlu1 %5634 }
 0x44c   :  { %v5645_v21 = vsel %vm1815_vm5, %v5635_v2, %v9727_v11  ;;  %v5646_v61 = vsel %vm1815_vm5, %v9727_v11, %v9723_v60  ;;  %vm5929_vm5 = vcmask 15368   ;;  %v6262_v2 = vld [vmem:[%s10670_s6 + $0x40] sm:$0xff] }
 0x44d   :  { %v9735_v34 = vmax.f32 %v5614_v46, %v5645_v21  ;;  %v9849_v43 = vmax.f32 %v9702_v9, %v5646_v61  ;;  %v6268_v9 = vld [vmem:[%s10670_s6 + $0x70] sm:$0xff]  ;;  %v6263_v21 = vld [vmem:[%s10670_s6 + $0x48] sm:$0xff] }
 0x44f   :  { %6086 = vrot.lane.b32.xlu1 %v9708_v27, %s7782_s13  ;;  %6022 = vrot.lane.b32.xlu0 %v9708_v27, %s7783_s14  ;;  %5726 = vst.msk [vmem:[#allocation2 + $0x8] sm:$0xff] %vm5724_vm1, %v9735_v34 }
 0x453   :  { %6078 = vrot.lane.b32.xlu1 %v9708_v27, %s7767_s24  ;;  %5841 = vrot.lane.b32.xlu0 %v9715_v37, %s10676_s19  ;;  %s10681_s19 = smov 31  }
 0x457   :  { %6070 = vrot.lane.b32.xlu1 %v9708_v27, %s7765_s22  ;;  %5777 = vrot.lane.b32.xlu0 %v9715_v37, %s10677_s25  ;;  %s10682_s25 = smov 12  }
 0x45b   :  { %6062 = vrot.lane.b32.xlu1 %v9708_v27, %s7785_s26  ;;  %5980 = vrot.lane.b32.xlu0 %v9752_v45, %s10678_s27  ;;  %s10683_s27 = smov 66  }
 0x45f   :  { %5905 = vrot.lane.b32.xlu1 %v9715_v37, %s10679_s4  ;;  %5769 = vrot.lane.b32.xlu0 %v9715_v37, %s7766_s23  ;;  %s10684_s4 = smov 33  }
 0x463   :  { %5833 = vrot.lane.b32.xlu1 %v9715_v37, %s10680_s28  ;;  %5972 = vrot.lane.b32.xlu0 %v9752_v45, %s10681_s19  ;;  %s10685_s28 = smov 14   ;;  %s7794_s19 = smov 120  }
 0x467   :  { %5897 = vrot.lane.b32.xlu1 %v9715_v37, %s10682_s25  ;;  %5761 = vrot.lane.b32.xlu0 %v9715_v37, %s7764_s2  ;;  %s10687_s25 = smov 53  }
 0x46b   :  { %5825 = vrot.lane.b32.xlu1 %v9715_v37, %s10683_s27  ;;  %5964 = vrot.lane.b32.xlu0 %v9752_v45, %s10684_s4  ;;  %s10688_s27 = smov 16   ;;  %s7797_s4 = smov 122  }
 0x46f   :  { %5889 = vrot.lane.b32.xlu1 %v9715_v37, %s10685_s28  ;;  %5753 = vrot.lane.b32.xlu0 %v9715_v37, %s7794_s19  ;;  %s10690_s28 = smov 3  }
 0x473   :  { %5817 = vrot.lane.b32.xlu1 %v9715_v37, %s10686_s21  ;;  %5956 = vrot.lane.b32.xlu0 %v9752_v45, %s10687_s25  ;;  %s10691_s21 = smov 36   ;;  %s7800_s25 = smov 55  }
 0x477   :  { %5881 = vrot.lane.b32.xlu1 %v9715_v37, %s10688_s27  ;;  %5745 = vrot.lane.b32.xlu0 %v9715_v37, %s7797_s4  ;;  %s10693_s27 = smov 38  }
 0x47b   :  { %5809 = vrot.lane.b32.xlu1 %v9715_v37, %s10689_s20  ;;  %6012 = vrot.lane.b32.xlu0 %v9752_v45, %s10690_s28  ;;  %s7802_s20 = smov 5   ;;  %s10694_s28 = smov 92  }
 0x47f   :  { %5873 = vrot.lane.b32.xlu1 %v9715_v37, %s10691_s21  ;;  %5948 = vrot.lane.b32.xlu0 %v9752_v45, %s7800_s25  ;;  %s10695_s21 = smov 57  }
 0x483   :  { %5801 = vrot.lane.b32.xlu1 %v9715_v37, %s10692_s1  ;;  %5737 = vrot.lane.b32.xlu0 %v9715_v37, %s7758_s17  ;;  %s10696_s1 = smov 27  }
 0x487   :  { %5865 = vrot.lane.b32.xlu1 %v9715_v37, %s10693_s27  ;;  %6004 = vrot.lane.b32.xlu0 %v9752_v45, %s7802_s20  ;;  %s10698_s27 = smov 8  }
 0x48b   :  { %5793 = vrot.lane.b32.xlu1 %v9715_v37, %s10694_s28  ;;  %5940 = vrot.lane.b32.xlu0 %v9752_v45, %s10695_s21  ;;  %s7807_s28 = smov 25   ;;  %s10699_s21 = smov 59  }
 0x48f   :  { %5988 = vrot.lane.b32.xlu1 %v9752_v45, %s10696_s1  ;;  %5729 = vrot.lane.b32.xlu0 %v9715_v37, %s10697_s15  ;;  %s7809_s1 = smov 40   ;;  %s7810_s15 = smov 94  }
 0x493   :  { %5913 = vrot.lane.b32.xlu1 %v9715_v37, %s10698_s27  ;;  %5996 = vrot.lane.b32.xlu0 %v9752_v45, %s7807_s28  ;;  %s7811_s27 = smov 61  }
 0x497   :  { %5932 = vrot.lane.b32.xlu0 %v9752_v45, %s10699_s21  ;;  %6048 = vrot.lane.b32.xlu1 %v5659_v5, %s7779_s3  ;;  %s7812_s21 = smov 42   ;;  %s10740_s3 = smov 10  }
 0x49b   :  { %5857 = vrot.lane.b32.xlu0 %v9715_v37, %s7809_s1  ;;  %6112 = vrot.lane.b32.xlu1 %v5659_v5, %s7775_s30  ;;  %s7813_s30 = smov 103  }
 0x49f   :  { %5785 = vrot.lane.b32.xlu0 %v9715_v37, %s7810_s15  ;;  %6104 = vrot.lane.b32.xlu1 %v5659_v5, %s7780_s18  ;;  %s10742_s18 = smov 33  }
 0x4a3   :  { %5923 = vrot.lane.b32.xlu0 %v9752_v45, %s7811_s27  ;;  %6096 = vrot.lane.b32.xlu1 %v5659_v5, %s7781_s12  ;;  %s10743_s12 = smov 12   ;;  %v6260_v45 = vld [vmem:[%s10670_s6 + $0x30] sm:$0xff] }
 0x4a7   :  { %5849 = vrot.lane.b32.xlu0 %v9715_v37, %s7812_s21  ;;  %6088 = vrot.lane.b32.xlu1 %v5659_v5, %s7782_s13  ;;  %s10745_s13 = smov 53   ;;  %v6264_v37 = vld [vmem:[%s10670_s6 + $0x50] sm:$0xff] }
 0x4ab   :  { %6040 = vrot.lane.b32.xlu0 %v5659_v5, %s7757_s16  ;;  %6080 = vrot.lane.b32.xlu1 %v5659_v5, %s7767_s24  ;;  %s10737_s16 = smov 44   ;;  %s10739_s24 = smov 31  }
 0x4af   :  { %6032 = vrot.lane.b32.xlu0 %v5659_v5, %s7755_s0  ;;  %6072 = vrot.lane.b32.xlu1 %v5659_v5, %s7765_s22  ;;  %s10736_s0 = smov 96   ;;  %s10738_s22 = smov 29  }
 0x4b3   :  { %6024 = vrot.lane.b32.xlu0 %v5659_v5, %s7783_s14  ;;  %6064 = vrot.lane.b32.xlu1 %v5659_v5, %s7785_s26  ;;  %s10746_s14 = smov 14   ;;  %s10748_s26 = smov 3  }
 0x4b5   :  { %v6047_v51 = vpop.permute.xlu0 %6046  ;;  %v6111_v32 = vpop.permute.xlu1 %6110 }
 0x4b7   :  { %6120 = vrot.lane.b32.xlu0 %v5659_v5, %s7777_s29  ;;  %6056 = vrot.lane.b32.xlu1 %v5659_v5, %s7813_s30 }
 0x4b9   :  { %v6039_v53 = vpop.permute.xlu0 %6038  ;;  %v6103_v1 = vpop.permute.xlu1 %6102 }
 0x4bb   :  { %5779 = vrot.lane.b32.xlu0 %v9735_v34, %s10736_s0  ;;  %5843 = vrot.lane.b32.xlu1 %v9735_v34, %s10737_s16  ;;  %s10749_s0 = smov 16   ;;  %s10751_s16 = smov 36  }
 0x4bd   :  { %v6031_v41 = vpop.permute.xlu0 %6030  ;;  %v6095_v3 = vpop.permute.xlu1 %6094 }
 0x4bf   :  { %5771 = vrot.lane.b32.xlu0 %v9735_v34, %s7766_s23  ;;  %5982 = vrot.lane.b32.xlu1 %v9849_v43, %s10738_s22  ;;  %s10741_s23 = smov 64   ;;  %s10754_s22 = smov 38  }
 0x4c1   :  { %v6023_v28 = vpop.permute.xlu0 %6022  ;;  %v9855_v24 = vpop.permute.xlu1 %6086 }
 0x4c3   :  { %5974 = vrot.lane.b32.xlu0 %v9849_v43, %s10739_s24  ;;  %5907 = vrot.lane.b32.xlu1 %v9735_v34, %s10740_s3  ;;  %s10756_s24 = smov 92   ;;  %s10757_s3 = smov 59  }
 0x4c5   :  { %v5842_v36 = vpop.permute.xlu0 %5841  ;;  %v9861_v44 = vpop.permute.xlu1 %6078 }
 0x4c6   :  { %5847 = vst.msk [vmem:[#allocation2 + $0xf0] sm:$0xff] %vm5724_vm1, %v5842_v36 }
 0x4c7   :  { %6052 = vst.msk [vmem:[#allocation2 + $0xf0] sm:$0xff] %vm5929_vm5, %v6047_v51  ;;  %5763 = vrot.lane.b32.xlu0 %v9735_v34, %s7764_s2  ;;  %5835 = vrot.lane.b32.xlu1 %v9735_v34, %s10741_s23  ;;  %s10744_s2 = smov 66   ;;  %s10758_s23 = smov 27  }
 0x4c9   :  { %v5778_v30 = vpop.permute.xlu0 %5777  ;;  %v9869_v63 = vpop.permute.xlu1 %6070 }
 0x4ca   :  { %5783 = vst.msk [vmem:[#allocation2 + $0x70] sm:$0xff] %vm5724_vm1, %v5778_v30  ;;  %v6686_v30 = vld [vmem:[%s10671_s8 + $0x70] sm:$0xff] }
 0x4cb   :  { %5966 = vrot.lane.b32.xlu0 %v9849_v43, %s10742_s18  ;;  %5899 = vrot.lane.b32.xlu1 %v9735_v34, %s10743_s12 }
 0x4cd   :  { %v5981_v23 = vpop.permute.xlu0 %5980  ;;  %v9876_v14 = vpop.permute.xlu1 %6062 }
 0x4ce   :  { %5986 = vst.msk [vmem:[#allocation2 + $0x70] sm:$0xff] %vm5929_vm5, %v5981_v23  ;;  %v6220_v49 = vld [vmem:[#allocation2 + $0xf0] sm:$0xff] }
 0x4cf   :  { %5755 = vrot.lane.b32.xlu0 %v9735_v34, %s7794_s19  ;;  %5827 = vrot.lane.b32.xlu1 %v9735_v34, %s10744_s2  ;;  %s10747_s19 = smov 68  }
 0x4d1   :  { %v5770_v29 = vpop.permute.xlu0 %5769  ;;  %v5906_v52 = vpop.permute.xlu1 %5905 }
 0x4d2   :  { %5775 = vst.msk [vmem:[#allocation2 + $0x60] sm:$0xff] %vm5724_vm1, %v5770_v29  ;;  %5911 = vst.msk [vmem:[#allocation2 + $0x170] sm:$0xff] %vm5724_vm1, %v5906_v52  ;;  %v6684_v29 = vld [vmem:[%s10671_s8 + $0x60] sm:$0xff]  ;;  %v6685_v52 = vld [vmem:[%s10671_s8 + $0x68] sm:$0xff] }
 0x4d3   :  { %6116 = vst.msk [vmem:[#allocation2 + $0x170] sm:$0xff] %vm5929_vm5, %v6111_v32  ;;  %5958 = vrot.lane.b32.xlu0 %v9849_v43, %s10745_s13  ;;  %5891 = vrot.lane.b32.xlu1 %v9735_v34, %s10746_s14  ;;  %v6258_v32 = vld [vmem:[%s10670_s6 + $0x20] sm:$0xff] }
 0x4d5   :  { %v5973_v12 = vpop.permute.xlu0 %5972  ;;  %v5834_v59 = vpop.permute.xlu1 %5833 }
 0x4d6   :  { %5978 = vst.msk [vmem:[#allocation2 + $0x60] sm:$0xff] %vm5929_vm5, %v5973_v12 }
 0x4d7   :  { %5839 = vst.msk [vmem:[#allocation2 + $0xe0] sm:$0xff] %vm5724_vm1, %v5834_v59  ;;  %5747 = vrot.lane.b32.xlu0 %v9735_v34, %s7797_s4  ;;  %5819 = vrot.lane.b32.xlu1 %v9735_v34, %s10747_s19  ;;  %s10750_s4 = smov 70  }
 0x4d8   :  { %6044 = vst.msk [vmem:[#allocation2 + $0xe0] sm:$0xff] %vm5929_vm5, %v6039_v53  ;;  %v6259_v53 = vld [vmem:[%s10670_s6 + $0x28] sm:$0xff] }
 0x4d9   :  { %v5762_v16 = vpop.permute.xlu0 %5761  ;;  %v5898_v25 = vpop.permute.xlu1 %5897 }
 0x4da   :  { %5767 = vst.msk [vmem:[#allocation2 + $0x50] sm:$0xff] %vm5724_vm1, %v5762_v16  ;;  %5903 = vst.msk [vmem:[#allocation2 + $0x160] sm:$0xff] %vm5724_vm1, %v5898_v25  ;;  %v6682_v16 = vld [vmem:[%s10671_s8 + $0x50] sm:$0xff]  ;;  %v6683_v25 = vld [vmem:[%s10671_s8 + $0x58] sm:$0xff] }
 0x4db   :  { %6108 = vst.msk [vmem:[#allocation2 + $0x160] sm:$0xff] %vm5929_vm5, %v6103_v1  ;;  %6014 = vrot.lane.b32.xlu0 %v9849_v43, %s10748_s26  ;;  %5883 = vrot.lane.b32.xlu1 %v9735_v34, %s10749_s0 }
 0x4dd   :  { %v5965_v18 = vpop.permute.xlu0 %5964  ;;  %v5826_v13 = vpop.permute.xlu1 %5825 }
 0x4de   :  { %5970 = vst.msk [vmem:[#allocation2 + $0x50] sm:$0xff] %vm5929_vm5, %v5965_v18 }
 0x4df   :  { %5831 = vst.msk [vmem:[#allocation2 + $0xd0] sm:$0xff] %vm5724_vm1, %v5826_v13  ;;  %5950 = vrot.lane.b32.xlu0 %v9849_v43, %s7800_s25  ;;  %5811 = vrot.lane.b32.xlu1 %v9735_v34, %s10750_s4  ;;  %s10752_s25 = smov 72  }
 0x4e0   :  { %6036 = vst.msk [vmem:[#allocation2 + $0xd0] sm:$0xff] %vm5929_vm5, %v6031_v41  ;;  %v6257_v41 = vld [vmem:[%s10670_s6 + $0x18] sm:$0xff] }
 0x4e1   :  { %v5754_v19 = vpop.permute.xlu0 %5753  ;;  %v5890_v35 = vpop.permute.xlu1 %5889 }
 0x4e2   :  { %5759 = vst.msk [vmem:[#allocation2 + $0x40] sm:$0xff] %vm5724_vm1, %v5754_v19  ;;  %5895 = vst.msk [vmem:[#allocation2 + $0x150] sm:$0xff] %vm5724_vm1, %v5890_v35  ;;  %v6680_v19 = vld [vmem:[%s10671_s8 + $0x40] sm:$0xff]  ;;  %v6681_v35 = vld [vmem:[%s10671_s8 + $0x48] sm:$0xff] }
 0x4e3   :  { %6100 = vst.msk [vmem:[#allocation2 + $0x150] sm:$0xff] %vm5929_vm5, %v6095_v3  ;;  %5739 = vrot.lane.b32.xlu0 %v9735_v34, %s7758_s17  ;;  %5875 = vrot.lane.b32.xlu1 %v9735_v34, %s10751_s16  ;;  %s10753_s17 = smov 57  }
 0x4e5   :  { %v5957_v39 = vpop.permute.xlu0 %5956  ;;  %v5818_v42 = vpop.permute.xlu1 %5817 }
 0x4e6   :  { %5962 = vst.msk [vmem:[#allocation2 + $0x40] sm:$0xff] %vm5929_vm5, %v5957_v39 }
 0x4e7   :  { %5823 = vst.msk [vmem:[#allocation2 + $0xc0] sm:$0xff] %vm5724_vm1, %v5818_v42  ;;  %6006 = vrot.lane.b32.xlu0 %v9849_v43, %s7802_s20  ;;  %5803 = vrot.lane.b32.xlu1 %v9735_v34, %s10752_s25  ;;  %s10755_s20 = smov 126  }
 0x4e8   :  { %6028 = vst.msk [vmem:[#allocation2 + $0xc0] sm:$0xff] %vm5929_vm5, %v6023_v28  ;;  %v6254_v28 = vld [vmem:[%s10670_s6] sm:$0xff] }
 0x4e9   :  { %v5746_v31 = vpop.permute.xlu0 %5745  ;;  %v5882_v22 = vpop.permute.xlu1 %5881 }
 0x4ea   :  { %5751 = vst.msk [vmem:[#allocation2 + $0x30] sm:$0xff] %vm5724_vm1, %v5746_v31  ;;  %5887 = vst.msk [vmem:[#allocation2 + $0x140] sm:$0xff] %vm5724_vm1, %v5882_v22  ;;  %v6678_v31 = vld [vmem:[%s10671_s8 + $0x30] sm:$0xff]  ;;  %v6679_v22 = vld [vmem:[%s10671_s8 + $0x38] sm:$0xff] }
 0x4eb   :  { %6092 = vst.msk [vmem:[#allocation2 + $0x140] sm:$0xff] %vm5929_vm5, %v9855_v24  ;;  %5942 = vrot.lane.b32.xlu0 %v9849_v43, %s10753_s17  ;;  %5867 = vrot.lane.b32.xlu1 %v9735_v34, %s10754_s22  ;;  %v6255_v24 = vld [vmem:[%s10670_s6 + $0x8] sm:$0xff] }
 0x4ed   :  { %v6013_v40 = vpop.permute.xlu0 %6012  ;;  %v5810_v47 = vpop.permute.xlu1 %5809 }
 0x4ee   :  { %5815 = vst.msk [vmem:[#allocation2 + $0xb0] sm:$0xff] %vm5724_vm1, %v5810_v47 }
 0x4ef   :  { %6018 = vst.msk [vmem:[#allocation2 + $0xb0] sm:$0xff] %vm5929_vm5, %v6013_v40  ;;  %5731 = vrot.lane.b32.xlu0 %v9735_v34, %s10755_s20  ;;  %5795 = vrot.lane.b32.xlu1 %v9735_v34, %s10756_s24 }
 0x4f1   :  { %v5949_v15 = vpop.permute.xlu0 %5948  ;;  %v5874_v33 = vpop.permute.xlu1 %5873 }
 0x4f2   :  { %5954 = vst.msk [vmem:[#allocation2 + $0x30] sm:$0xff] %vm5929_vm5, %v5949_v15 }
 0x4f3   :  { %5879 = vst.msk [vmem:[#allocation2 + $0x130] sm:$0xff] %vm5724_vm1, %v5874_v33  ;;  %5998 = vrot.lane.b32.xlu0 %v9849_v43, %s7807_s28  ;;  %5859 = vrot.lane.b32.xlu1 %v9735_v34, %s7809_s1  ;;  %v6676_v33 = vld [vmem:[%s10671_s8 + $0x20] sm:$0xff] }
 0x4f4   :  { %6084 = vst.msk [vmem:[#allocation2 + $0x130] sm:$0xff] %vm5929_vm5, %v9861_v44 }
 0x4f5   :  { %v5738_v38 = vpop.permute.xlu0 %5737  ;;  %v5802_v62 = vpop.permute.xlu1 %5801 }
 0x4f6   :  { %5743 = vst.msk [vmem:[#allocation2 + $0x20] sm:$0xff] %vm5724_vm1, %v5738_v38  ;;  %5807 = vst.msk [vmem:[#allocation2 + $0xa0] sm:$0xff] %vm5724_vm1, %v5802_v62  ;;  %v6677_v38 = vld [vmem:[%s10671_s8 + $0x28] sm:$0xff] }
 0x4f7   :  { %5934 = vrot.lane.b32.xlu0 %v9849_v43, %s10757_s3  ;;  %5787 = vrot.lane.b32.xlu1 %v9735_v34, %s7810_s15  ;;  %s10759_s15 = smov 8  }
 0x4f9   :  { %v6005_v6 = vpop.permute.xlu0 %6004  ;;  %v5866_v48 = vpop.permute.xlu1 %5865 }
 0x4fa   :  { %6010 = vst.msk [vmem:[#allocation2 + $0xa0] sm:$0xff] %vm5929_vm5, %v6005_v6 }
 0x4fb   :  { %5871 = vst.msk [vmem:[#allocation2 + $0x120] sm:$0xff] %vm5724_vm1, %v5866_v48  ;;  %5925 = vrot.lane.b32.xlu0 %v9849_v43, %s7811_s27  ;;  %5990 = vrot.lane.b32.xlu1 %v9849_v43, %s10758_s23  ;;  %v6256_v43 = vld [vmem:[%s10670_s6 + $0x10] sm:$0xff] }
 0x4fc   :  { %6076 = vst.msk [vmem:[#allocation2 + $0x120] sm:$0xff] %vm5929_vm5, %v9869_v63  ;;  %v6687_v63 = vld [vmem:[%s10671_s8 + $0x78] sm:$0xff] }
 0x4fd   :  { %v5941_v57 = vpop.permute.xlu0 %5940  ;;  %v5794_v54 = vpop.permute.xlu1 %5793 }
 0x4fe   :  { %5946 = vst.msk [vmem:[#allocation2 + $0x20] sm:$0xff] %vm5929_vm5, %v5941_v57  ;;  %v6204_v57 = vld [vmem:[#allocation2 + $0x70] sm:$0xff] }
 0x4ff   :  { %5799 = vst.msk [vmem:[#allocation2 + $0x90] sm:$0xff] %vm5724_vm1, %v5794_v54  ;;  %5851 = vrot.lane.b32.xlu0 %v9735_v34, %s7812_s21  ;;  %5915 = vrot.lane.b32.xlu1 %v9735_v34, %s10759_s15  ;;  %v6674_v54 = vld [vmem:[%s10671_s8 + $0x10] sm:$0xff] }
 0x501   :  { %v5730_v0 = vpop.permute.xlu0 %5729  ;;  %v5989_v46 = vpop.permute.xlu1 %5988 }
 0x502   :  { %5735 = vst.msk [vmem:[#allocation2 + $0x10] sm:$0xff] %vm5724_vm1, %v5730_v0 }
 0x503   :  { %6054 = vrot.lane.b32.xlu0 %v9708_v27, %s7813_s30  ;;  %6118 = vrot.lane.b32.xlu1 %v9708_v27, %s7777_s29  ;;  %v6266_v27 = vld [vmem:[%s10670_s6 + $0x60] sm:$0xff] }
 0x505   :  { %v5997_v58 = vpop.permute.xlu0 %5996  ;;  %v5914_v20 = vpop.permute.xlu1 %5913 }
 0x506   :  { %6002 = vst.msk [vmem:[#allocation2 + $0x90] sm:$0xff] %vm5929_vm5, %v5997_v58  ;;  %v6672_v58 = vld [vmem:[%s10671_s8] sm:$0xff] }
 0x507   :  { %5919 = vst.msk [vmem:[#allocation2 + $0x180] sm:$0xff] %vm5724_vm1, %v5914_v20  ;;  %6342 = vperm.xlu0 %7751, %v6268_v9   ;;  %6347 = vperm.xlu1 %7752, %v6269_v26   ;;  %v6252_v26 = vld [vmem:[#allocation2 + $0x1f0] sm:$0xff]  ;;  %v6673_v20 = vld [vmem:[%s10671_s8 + $0x8] sm:$0xff] }
 0x509   :  { %v5933_v4 = vpop.permute.xlu0 %5932  ;;  %v9992_v7 = vpop.permute.xlu1 %6048 }
 0x50a   :  { %5938 = vst.msk [vmem:[#allocation2 + $0x10] sm:$0xff] %vm5929_vm5, %v5933_v4 }
 0x50b   :  { %6332 = vperm.xlu0 %7751, %v6266_v27   ;;  %6337 = vperm.xlu1 %7752, %v6267_v55   ;;  %v6236_v55 = vld [vmem:[#allocation2 + $0x170] sm:$0xff] }
 0x50d   :  { %v5858_v60 = vpop.permute.xlu0 %5857  ;;  %v10001_v11 = vpop.permute.xlu1 %6112 }
 0x50e   :  { %5863 = vst.msk [vmem:[#allocation2 + $0x110] sm:$0xff] %vm5724_vm1, %v5858_v60  ;;  %v6946_v60 = vld [vmem:[%s10672_s10 + $0x8] sm:$0xff] }
 0x50f   :  { %6068 = vst.msk [vmem:[#allocation2 + $0x110] sm:$0xff] %vm5929_vm5, %v9876_v14  ;;  %6322 = vperm.xlu0 %7751, %v6264_v37   ;;  %6327 = vperm.xlu1 %7752, %v6265_v17  }
 0x511   :  { %v5786_v34 = vpop.permute.xlu0 %5785  ;;  %v10012_v56 = vpop.permute.xlu1 %6104 }
 0x512   :  { %5791 = vst.msk [vmem:[#allocation2 + $0x80] sm:$0xff] %vm5724_vm1, %v5786_v34  ;;  %v6945_v34 = vld [vmem:[%s10672_s10] sm:$0xff] }
 0x513   :  { %5994 = vst.msk [vmem:[#allocation2 + $0x80] sm:$0xff] %vm5929_vm5, %v5989_v46  ;;  %6312 = vperm.xlu0 %7751, %v6262_v2   ;;  %6317 = vperm.xlu1 %7752, %v6263_v21   ;;  %v6218_v2 = vld [vmem:[#allocation2 + $0xe0] sm:$0xff] }
 0x515   :  { %v5924_v5 = vpop.permute.xlu0 %5923  ;;  %v10022_v51 = vpop.permute.xlu1 %6096 }
 0x516   :  { %5930 = vst.msk [vmem:[#allocation2] sm:$0xff] %vm5929_vm5, %v5924_v5  ;;  %v6948_v5 = vld [vmem:[%s10672_s10 + $0x18] sm:$0xff] }
 0x517   :  { %6302 = vperm.xlu0 %7751, %v6260_v45   ;;  %6307 = vperm.xlu1 %7752, %v6261_v8   ;;  %v6250_v8 = vld [vmem:[#allocation2 + $0x1e0] sm:$0xff] }
 0x519   :  { %v5850_v1 = vpop.permute.xlu0 %5849  ;;  %v10031_v61 = vpop.permute.xlu1 %6088 }
 0x51a   :  { %5855 = vst.msk [vmem:[#allocation2 + $0x100] sm:$0xff] %vm5724_vm1, %v5850_v1 }
 0x51b   :  { %6292 = vperm.xlu0 %7751, %v6258_v32   ;;  %6297 = vperm.xlu1 %7752, %v6259_v53   ;;  %v6234_v53 = vld [vmem:[#allocation2 + $0x160] sm:$0xff] }
 0x51d   :  { %v6041_v3 = vpop.permute.xlu0 %6040  ;;  %v10040_v10 = vpop.permute.xlu1 %6080 }
 0x51f   :  { %6282 = vperm.xlu0 %7751, %v6256_v43   ;;  %6287 = vperm.xlu1 %7752, %v6257_v41   ;;  %v6947_v43 = vld [vmem:[%s10672_s10 + $0x10] sm:$0xff]  ;;  %v6249_v41 = vld [vmem:[#allocation2 + $0x1d8] sm:$0xff] }
 0x521   :  { %v10048_v36 = vpop.permute.xlu0 %6032  ;;  %v10050_v44 = vpop.permute.xlu1 %6072 }
 0x523   :  { %6272 = vperm.xlu0 %7751, %v6254_v28   ;;  %6277 = vperm.xlu1 %7752, %v6255_v24   ;;  %v6216_v28 = vld [vmem:[#allocation2 + $0xd0] sm:$0xff]  ;;  %v6950_v24 = vld [vmem:[%s10672_s10 + $0x28] sm:$0xff] }
 0x525   :  { %v10058_v23 = vpop.permute.xlu0 %6024  ;;  %v10060_v14 = vpop.permute.xlu1 %6064 }
 0x527   :  { %6760 = vperm.xlu0 %7751, %v6686_v30   ;;  %6765 = vperm.xlu1 %7752, %v6687_v63   ;;  %v6200_v63 = vld [vmem:[#allocation2 + $0x50] sm:$0xff] }
 0x529   :  { %v10068_v12 = vpop.permute.xlu0 %6120  ;;  %v10070_v59 = vpop.permute.xlu1 %6056 }
 0x52b   :  { %6750 = vperm.xlu0 %7751, %v6684_v29   ;;  %6755 = vperm.xlu1 %7752, %v6685_v52   ;;  %v6949_v29 = vld [vmem:[%s10672_s10 + $0x20] sm:$0xff] }
 0x52d   :  { %v5780_v18 = vpop.permute.xlu0 %5779  ;;  %v5844_v13 = vpop.permute.xlu1 %5843 }
 0x52e   :  { %5784 = vst.msk [vmem:[#allocation2 + $0x78] sm:$0xff] %vm5724_vm1, %v5780_v18  ;;  %5848 = vst.msk [vmem:[#allocation2 + $0xf8] sm:$0xff] %vm5724_vm1, %v5844_v13  ;;  %v6952_v18 = vld [vmem:[%s10672_s10 + $0x38] sm:$0xff] }
 0x52f   :  { %6053 = vst.msk [vmem:[#allocation2 + $0xf8] sm:$0xff] %vm5929_vm5, %v9992_v7  ;;  %6740 = vperm.xlu0 %7751, %v6682_v16   ;;  %6745 = vperm.xlu1 %7752, %v6683_v25   ;;  %v6251_v7 = vld [vmem:[#allocation2 + $0x1e8] sm:$0xff]  ;;  %v6232_v25 = vld [vmem:[#allocation2 + $0x150] sm:$0xff] }
 0x530   :  { %v6247_v16 = vld [vmem:[#allocation2 + $0x1c8] sm:$0xff] }
 0x531   :  { %v5772_v39 = vpop.permute.xlu0 %5771  ;;  %v5983_v42 = vpop.permute.xlu1 %5982 }
 0x532   :  { %5776 = vst.msk [vmem:[#allocation2 + $0x68] sm:$0xff] %vm5724_vm1, %v5772_v39 }
 0x533   :  { %5987 = vst.msk [vmem:[#allocation2 + $0x78] sm:$0xff] %vm5929_vm5, %v5983_v42  ;;  %6730 = vperm.xlu0 %7751, %v6680_v19   ;;  %6735 = vperm.xlu1 %7752, %v6681_v35   ;;  %v6951_v35 = vld [vmem:[%s10672_s10 + $0x30] sm:$0xff]  ;;  %v6214_v42 = vld [vmem:[#allocation2 + $0xc0] sm:$0xff] }
 0x535   :  { %v5975_v40 = vpop.permute.xlu0 %5974  ;;  %v5908_v47 = vpop.permute.xlu1 %5907 }
 0x536   :  { %5979 = vst.msk [vmem:[#allocation2 + $0x68] sm:$0xff] %vm5929_vm5, %v5975_v40  ;;  %v6221_v15 = vld [vmem:[#allocation2 + $0xf8] sm:$0xff] }
 0x537   :  { %5912 = vst.msk [vmem:[#allocation2 + $0x178] sm:$0xff] %vm5724_vm1, %v5908_v47  ;;  %6720 = vperm.xlu0 %7751, %v6678_v31   ;;  %6725 = vperm.xlu1 %7752, %v6679_v22   ;;  %v6954_v31 = vld [vmem:[%s10672_s10 + $0x48] sm:$0xff]  ;;  %v6198_v47 = vld [vmem:[#allocation2 + $0x40] sm:$0xff] }
 0x538   :  { %6117 = vst.msk [vmem:[#allocation2 + $0x178] sm:$0xff] %vm5929_vm5, %v10001_v11  ;;  %7354 = vmatprep.subr.mxu0 %v6221_v15  ;;  %v6953_v15 = vld [vmem:[%s10672_s10 + $0x40] sm:$0xff] }
 0x539   :  { %v5764_v62 = vpop.permute.xlu0 %5763  ;;  %v5836_v6 = vpop.permute.xlu1 %5835 }
 0x53a   :  { %v6205_v48 = vld [vmem:[#allocation2 + $0x78] sm:$0xff]  ;;  %5768 = vst.msk [vmem:[#allocation2 + $0x58] sm:$0xff] %vm5724_vm1, %v5764_v62  ;;  %5840 = vst.msk [vmem:[#allocation2 + $0xe8] sm:$0xff] %vm5724_vm1, %v5836_v6  ;;  %v6230_v6 = vld [vmem:[#allocation2 + $0x140] sm:$0xff] }
 0x53b   :  { %7355 = vmatpush3.msra.mxu0 %v6205_v48  ;;  %6045 = vst.msk [vmem:[#allocation2 + $0xe8] sm:$0xff] %vm5929_vm5, %v6041_v3  ;;  %6710 = vperm.xlu0 %7751, %v6676_v33   ;;  %v6246_v33 = vld [vmem:[#allocation2 + $0x1c0] sm:$0xff]  ;;  %v6245_v62 = vld [vmem:[#allocation2 + $0x1b8] sm:$0xff] }
 0x53c   :  { %6715 = vperm.xlu1 %7752, %v6677_v38   ;;  %7356 = vmatprep.subr.mxu0 %v6220_v49  ;;  %v6956_v48 = vld [vmem:[%s10672_s10 + $0x58] sm:$0xff] }
 0x53d   :  { %7357 = vmatpush3.msra.mxu0 %v6204_v57  ;;  %v5967_v0 = vpop.permute.xlu0 %5966  ;;  %v5900_v46 = vpop.permute.xlu1 %5899  ;;  %v6203_v17 = vld [vmem:[#allocation2 + $0x68] sm:$0xff] }
 0x53e   :  { %5971 = vst.msk [vmem:[#allocation2 + $0x58] sm:$0xff] %vm5929_vm5, %v5967_v0  ;;  %v6212_v0 = vld [vmem:[#allocation2 + $0xb0] sm:$0xff] }
 0x53f   :  { %5904 = vst.msk [vmem:[#allocation2 + $0x168] sm:$0xff] %vm5724_vm1, %v5900_v46  ;;  %v6237_v9 = vld [vmem:[#allocation2 + $0x178] sm:$0xff]  ;;  %6700 = vperm.xlu0 %7751, %v6674_v54   ;;  %v6955_v54 = vld [vmem:[%s10672_s10 + $0x50] sm:$0xff]  ;;  %v6958_v46 = vld [vmem:[%s10672_s10 + $0x68] sm:$0xff] }
 0x540   :  { %6109 = vst.msk [vmem:[#allocation2 + $0x168] sm:$0xff] %vm5929_vm5, %v10012_v56  ;;  %6705 = vperm.xlu1 %7752, %v6675_v50   ;;  %7435 = vmatpush3.msra.mxu1 %v6237_v9  ;;  %v6202_v56 = vld [vmem:[#allocation2 + $0x60] sm:$0xff] }
 0x541   :  { %7436 = vmatprep.subr.mxu1 %v6252_v26  ;;  %v5756_v27 = vpop.permute.xlu0 %5755  ;;  %v5828_v4 = vpop.permute.xlu1 %5827 }
 0x542   :  { %5760 = vst.msk [vmem:[#allocation2 + $0x48] sm:$0xff] %vm5724_vm1, %v5756_v27  ;;  %7437 = vmatpush3.msra.mxu1 %v6236_v55  ;;  %5832 = vst.msk [vmem:[#allocation2 + $0xd8] sm:$0xff] %vm5724_vm1, %v5828_v4  ;;  %v6219_v37 = vld [vmem:[#allocation2 + $0xe8] sm:$0xff]  ;;  %v6244_v27 = vld [vmem:[#allocation2 + $0x1b0] sm:$0xff] }
 0x543   :  { %6037 = vst.msk [vmem:[#allocation2 + $0xd8] sm:$0xff] %vm5929_vm5, %v10048_v36  ;;  %6690 = vperm.xlu0 %7751, %v6672_v58   ;;  %7358 = vmatprep.subr.mxu0 %v6219_v37  ;;  %v6196_v58 = vld [vmem:[#allocation2 + $0x30] sm:$0xff]  ;;  %v6243_v4 = vld [vmem:[#allocation2 + $0x1a8] sm:$0xff]  ;;  %v6960_v37 = vld [vmem:[%s10672_s10 + $0x78] sm:$0xff] }
 0x544   :  { %6695 = vperm.xlu1 %7752, %v6673_v20   ;;  %7438 = vmatprep.subr.mxu1 %v6251_v7  ;;  %v6957_v20 = vld [vmem:[%s10672_s10 + $0x60] sm:$0xff]  ;;  %v6228_v7 = vld [vmem:[#allocation2 + $0x130] sm:$0xff] }
 0x545   :  { %7359 = vmatpush3.msra.mxu0 %v6203_v17  ;;  %v5959_v11 = vpop.permute.xlu0 %5958  ;;  %v5892_v21 = vpop.permute.xlu1 %5891  ;;  %v6201_v3 = vld [vmem:[#allocation2 + $0x58] sm:$0xff] }
 0x546   :  { %5963 = vst.msk [vmem:[#allocation2 + $0x48] sm:$0xff] %vm5929_vm5, %v5959_v11  ;;  %7360 = vmatprep.subr.mxu0 %v6218_v2  ;;  %v6959_v11 = vld [vmem:[%s10672_s10 + $0x70] sm:$0xff] }
 0x547   :  { %5896 = vst.msk [vmem:[#allocation2 + $0x158] sm:$0xff] %vm5724_vm1, %v5892_v21  ;;  %v6235_v45 = vld [vmem:[#allocation2 + $0x168] sm:$0xff]  ;;  %7361 = vmatpush3.msra.mxu0 %v6202_v56  ;;  %6968 = vperm.xlu0 %7751, %v6946_v60   ;;  %v6242_v56 = vld [vmem:[#allocation2 + $0x1a0] sm:$0xff] }
 0x548   :  { %6101 = vst.msk [vmem:[#allocation2 + $0x158] sm:$0xff] %vm5929_vm5, %v10022_v51  ;;  %6963 = vperm.xlu1 %7752, %v6945_v34   ;;  %7439 = vmatpush3.msra.mxu1 %v6235_v45  ;;  %v6210_v45 = vld [vmem:[#allocation2 + $0xa0] sm:$0xff] }
 0x549   :  { %7440 = vmatprep.subr.mxu1 %v6250_v8  ;;  %v5748_v32 = vpop.permute.xlu0 %5747  ;;  %v5820_v1 = vpop.permute.xlu1 %5819 }
 0x54a   :  { %5752 = vst.msk [vmem:[#allocation2 + $0x38] sm:$0xff] %vm5724_vm1, %v5748_v32  ;;  %7441 = vmatpush3.msra.mxu1 %v6234_v53  ;;  %5824 = vst.msk [vmem:[#allocation2 + $0xc8] sm:$0xff] %vm5724_vm1, %v5820_v1  ;;  %v6217_v51 = vld [vmem:[#allocation2 + $0xd8] sm:$0xff]  ;;  %v6226_v53 = vld [vmem:[#allocation2 + $0x120] sm:$0xff] }
 0x54b   :  { %6029 = vst.msk [vmem:[#allocation2 + $0xc8] sm:$0xff] %vm5929_vm5, %v10058_v23  ;;  %6978 = vperm.xlu0 %7751, %v6948_v5   ;;  %7362 = vmatprep.subr.mxu0 %v6217_v51  ;;  %v6248_v23 = vld [vmem:[#allocation2 + $0x1d0] sm:$0xff]  ;;  %v6194_v5 = vld [vmem:[#allocation2 + $0x20] sm:$0xff]  ;;  %v6241_v32 = vld [vmem:[#allocation2 + $0x198] sm:$0xff] }
 0x54c   :  { %6973 = vperm.xlu1 %7752, %v6947_v43   ;;  %7363 = vmatpush3.msra.mxu0 %v6201_v3 }
 0x54d   :  { %v6015_v36 = vpop.permute.xlu0 %6014  ;;  %7364 = vmatprep.subr.mxu0 %v6216_v28  ;;  %v5884_v30 = vpop.permute.xlu1 %5883  ;;  %7442 = vmatprep.subr.mxu1 %v6249_v41  ;;  %v6199_v39 = vld [vmem:[#allocation2 + $0x48] sm:$0xff]  ;;  %v6240_v28 = vld [vmem:[#allocation2 + $0x190] sm:$0xff] }
 0x54e   :  { %5888 = vst.msk [vmem:[#allocation2 + $0x148] sm:$0xff] %vm5724_vm1, %v5884_v30  ;;  %7365 = vmatpush3.msra.mxu0 %v6200_v63 }
 0x54f   :  { %v6233_v52 = vld [vmem:[#allocation2 + $0x158] sm:$0xff]  ;;  %6093 = vst.msk [vmem:[#allocation2 + $0x148] sm:$0xff] %vm5929_vm5, %v10031_v61  ;;  %6988 = vperm.xlu0 %7751, %v6950_v24   ;;  %v6224_v24 = vld [vmem:[#allocation2 + $0x110] sm:$0xff] }
 0x550   :  { %7443 = vmatpush3.msra.mxu1 %v6233_v52  ;;  %6983 = vperm.xlu1 %7752, %v6949_v29   ;;  %v6208_v29 = vld [vmem:[#allocation2 + $0x90] sm:$0xff] }
 0x551   :  { %7444 = vmatprep.subr.mxu1 %v6248_v23  ;;  %v5951_v13 = vpop.permute.xlu0 %5950  ;;  %v5812_v19 = vpop.permute.xlu1 %5811  ;;  %v6192_v23 = vld [vmem:[#allocation2 + $0x10] sm:$0xff] }
 0x552   :  { %7445 = vmatpush3.msra.mxu1 %v6232_v25  ;;  %5955 = vst.msk [vmem:[#allocation2 + $0x38] sm:$0xff] %vm5929_vm5, %v5951_v13  ;;  %v6215_v61 = vld [vmem:[#allocation2 + $0xc8] sm:$0xff]  ;;  %v6206_v13 = vld [vmem:[#allocation2 + $0x80] sm:$0xff] }
 0x553   :  { %5816 = vst.msk [vmem:[#allocation2 + $0xb8] sm:$0xff] %vm5724_vm1, %v5812_v19  ;;  %7446 = vmatprep.subr.mxu1 %v6247_v16  ;;  %6998 = vperm.xlu0 %7751, %v6952_v18   ;;  %v6131_v19 = vld [vmem:[%s10669_s5 + $0x28] sm:$0xff] }
 0x554   :  { %6019 = vst.msk [vmem:[#allocation2 + $0xb8] sm:$0xff] %vm5929_vm5, %v6015_v36  ;;  %7366 = vmatprep.subr.mxu0 %v6215_v61  ;;  %6993 = vperm.xlu1 %7752, %v6951_v35  }
 0x555   :  { %7367 = vmatpush3.msra.mxu0 %v6199_v39  ;;  %v5740_v22 = vpop.permute.xlu0 %5739  ;;  %v5876_v40 = vpop.permute.xlu1 %5875  ;;  %v6130_v39 = vld [vmem:[%s10669_s5 + $0x20] sm:$0xff] }
 0x556   :  { %7368 = vmatprep.subr.mxu0 %v6214_v42  ;;  %5744 = vst.msk [vmem:[#allocation2 + $0x28] sm:$0xff] %vm5724_vm1, %v5740_v22  ;;  %5880 = vst.msk [vmem:[#allocation2 + $0x138] sm:$0xff] %vm5724_vm1, %v5876_v40  ;;  %v6231_v38 = vld [vmem:[#allocation2 + $0x148] sm:$0xff]  ;;  %v6128_v40 = vld [vmem:[%s10669_s5 + $0x10] sm:$0xff] }
 0x557   :  { %7369 = vmatpush3.msra.mxu0 %v6198_v47  ;;  %6085 = vst.msk [vmem:[#allocation2 + $0x138] sm:$0xff] %vm5929_vm5, %v10040_v10  ;;  %7008 = vperm.xlu0 %7751, %v6954_v31   ;;  %v6135_v42 = vld [vmem:[%s10669_s5 + $0x48] sm:$0xff]  ;;  %v6133_v47 = vld [vmem:[%s10669_s5 + $0x38] sm:$0xff] }
 0x558   :  { %7447 = vmatpush3.msra.mxu1 %v6231_v38  ;;  %7003 = vperm.xlu1 %7752, %v6953_v15   ;;  %v6134_v15 = vld [vmem:[%s10669_s5 + $0x40] sm:$0xff]  ;;  %v6132_v38 = vld [vmem:[%s10669_s5 + $0x30] sm:$0xff] }
 0x559   :  { %7448 = vmatprep.subr.mxu1 %v6246_v33  ;;  %v6007_v49 = vpop.permute.xlu0 %6006  ;;  %v5804_v57 = vpop.permute.xlu1 %5803  ;;  %v6197_v50 = vld [vmem:[#allocation2 + $0x38] sm:$0xff]  ;;  %v6139_v33 = vld [vmem:[%s10669_s5 + $0x68] sm:$0xff] }
 0x55a   :  { %7449 = vmatpush3.msra.mxu1 %v6230_v6  ;;  %5808 = vst.msk [vmem:[#allocation2 + $0xa8] sm:$0xff] %vm5724_vm1, %v5804_v57  ;;  %v6138_v6 = vld [vmem:[%s10669_s5 + $0x60] sm:$0xff]  ;;  %v6141_v57 = vld [vmem:[%s10669_s5 + $0x78] sm:$0xff] }
 0x55b   :  { %v6213_v10 = vld [vmem:[#allocation2 + $0xb8] sm:$0xff]  ;;  %7450 = vmatprep.subr.mxu1 %v6245_v62  ;;  %6011 = vst.msk [vmem:[#allocation2 + $0xa8] sm:$0xff] %vm5929_vm5, %v6007_v49  ;;  %7018 = vperm.xlu0 %7751, %v6956_v48   ;;  %v6143_v48 = vld [vmem:[%s10669_s5 + $0x88] sm:$0xff]  ;;  %v6136_v49 = vld [vmem:[%s10669_s5 + $0x50] sm:$0xff] }
 0x55c   :  { %7370 = vmatprep.subr.mxu0 %v6213_v10  ;;  %7013 = vperm.xlu1 %7752, %v6955_v54   ;;  %v6137_v62 = vld [vmem:[%s10669_s5 + $0x58] sm:$0xff]  ;;  %v6142_v54 = vld [vmem:[%s10669_s5 + $0x80] sm:$0xff]  ;;  %v6147_v10 = vld [vmem:[%s10669_s5 + $0xa8] sm:$0xff] }
 0x55d   :  { %7371 = vmatpush3.msra.mxu0 %v6197_v50  ;;  %v5943_v9 = vpop.permute.xlu0 %5942  ;;  %v5868_v26 = vpop.permute.xlu1 %5867  ;;  %v6140_v50 = vld [vmem:[%s10669_s5 + $0x70] sm:$0xff] }
 0x55e   :  { %7372 = vmatprep.subr.mxu0 %v6212_v0  ;;  %5947 = vst.msk [vmem:[#allocation2 + $0x28] sm:$0xff] %vm5929_vm5, %v5943_v9  ;;  %v6229_v55 = vld [vmem:[#allocation2 + $0x138] sm:$0xff]  ;;  %v6151_v9 = vld [vmem:[%s10669_s5 + $0xc8] sm:$0xff] }
 0x55f   :  { %5872 = vst.msk [vmem:[#allocation2 + $0x128] sm:$0xff] %vm5724_vm1, %v5868_v26  ;;  %7373 = vmatpush3.msra.mxu0 %v6196_v58  ;;  %7028 = vperm.xlu0 %7751, %v6958_v46   ;;  %v6145_v0 = vld [vmem:[%s10669_s5 + $0x98] sm:$0xff]  ;;  %v6146_v46 = vld [vmem:[%s10669_s5 + $0xa0] sm:$0xff]  ;;  %v6144_v26 = vld [vmem:[%s10669_s5 + $0x90] sm:$0xff] }
 0x560   :  { %6077 = vst.msk [vmem:[#allocation2 + $0x128] sm:$0xff] %vm5929_vm5, %v10050_v44  ;;  %7451 = vmatpush3.msra.mxu1 %v6229_v55  ;;  %7023 = vperm.xlu1 %7752, %v6957_v20   ;;  %v6149_v58 = vld [vmem:[%s10669_s5 + $0xb8] sm:$0xff]  ;;  %v6150_v20 = vld [vmem:[%s10669_s5 + $0xc0] sm:$0xff]  ;;  %v6148_v55 = vld [vmem:[%s10669_s5 + $0xb0] sm:$0xff] }
 0x561   :  { %7452 = vmatprep.subr.mxu1 %v6244_v27  ;;  %v5732_v17 = vpop.permute.xlu0 %5731  ;;  %v5796_v60 = vpop.permute.xlu1 %5795  ;;  %v6155_v27 = vld [vmem:[%s10669_s5 + $0xe8] sm:$0xff] }
 0x562   :  { %7453 = vmatpush3.msra.mxu1 %v6228_v7  ;;  %5736 = vst.msk [vmem:[#allocation2 + $0x18] sm:$0xff] %vm5724_vm1, %v5732_v17  ;;  %5800 = vst.msk [vmem:[#allocation2 + $0x98] sm:$0xff] %vm5724_vm1, %v5796_v60  ;;  %v6211_v44 = vld [vmem:[#allocation2 + $0xa8] sm:$0xff]  ;;  %v6154_v7 = vld [vmem:[%s10669_s5 + $0xe0] sm:$0xff] }
 0x563   :  { %7454 = vmatprep.subr.mxu1 %v6243_v4  ;;  %7038 = vperm.xlu0 %7751, %v6960_v37   ;;  %v6153_v4 = vld [vmem:[%s10669_s5 + $0xd8] sm:$0xff]  ;;  %v6159_v37 = vld [vmem:[%s10669_s5 + $0x108] sm:$0xff]  ;;  %v6152_v17 = vld [vmem:[%s10669_s5 + $0xd0] sm:$0xff] }
 0x564   :  { %7374 = vmatprep.subr.mxu0 %v6211_v44  ;;  %7033 = vperm.xlu1 %7752, %v6959_v11   ;;  %v6157_v60 = vld [vmem:[%s10669_s5 + $0xf8] sm:$0xff]  ;;  %v6158_v11 = vld [vmem:[%s10669_s5 + $0x100] sm:$0xff]  ;;  %v6163_v44 = vld [vmem:[%s10669_s5 + $0x128] sm:$0xff] }
 0x565   :  { %v5999_v2 = vpop.permute.xlu0 %5998  ;;  %v5860_v21 = vpop.permute.xlu1 %5859  ;;  %v6195_v34 = vld [vmem:[#allocation2 + $0x28] sm:$0xff] }
 0x566   :  { %6003 = vst.msk [vmem:[#allocation2 + $0x98] sm:$0xff] %vm5929_vm5, %v5999_v2  ;;  %7375 = vmatpush3.msra.mxu0 %v6195_v34  ;;  %v6156_v2 = vld [vmem:[%s10669_s5 + $0xf0] sm:$0xff]  ;;  %v6162_v34 = vld [vmem:[%s10669_s5 + $0x120] sm:$0xff] }
 0x567   :  { %5864 = vst.msk [vmem:[#allocation2 + $0x118] sm:$0xff] %vm5724_vm1, %v5860_v21  ;;  %v6227_v8 = vld [vmem:[#allocation2 + $0x128] sm:$0xff]  ;;  %7376 = vmatprep.subr.mxu0 %v6210_v45  ;;  %v6161_v21 = vld [vmem:[%s10669_s5 + $0x118] sm:$0xff]  ;;  %v6160_v45 = vld [vmem:[%s10669_s5 + $0x110] sm:$0xff] }
 0x568   :  { %6069 = vst.msk [vmem:[#allocation2 + $0x118] sm:$0xff] %vm5929_vm5, %v10060_v14  ;;  %7455 = vmatpush3.msra.mxu1 %v6227_v8  ;;  %7377 = vmatpush3.msra.mxu0 %v6194_v5  ;;  %v6165_v8 = vld [vmem:[%s10669_s5 + $0x138] sm:$0xff]  ;;  %v6166_v5 = vld [vmem:[%s10669_s5 + $0x140] sm:$0xff] }
 0x569   :  { %7456 = vmatprep.subr.mxu1 %v6242_v56  ;;  %v5935_v1 = vpop.permute.xlu0 %5934  ;;  %v5788_v43 = vpop.permute.xlu1 %5787  ;;  %v6167_v56 = vld [vmem:[%s10669_s5 + $0x148] sm:$0xff] }
 0x56a   :  { %7457 = vmatpush3.msra.mxu1 %v6226_v53  ;;  %5939 = vst.msk [vmem:[#allocation2 + $0x18] sm:$0xff] %vm5929_vm5, %v5935_v1  ;;  %v6164_v53 = vld [vmem:[%s10669_s5 + $0x130] sm:$0xff]  ;;  %v6169_v1 = vld [vmem:[%s10669_s5 + $0x158] sm:$0xff] }
 0x56b   :  { %5792 = vst.msk [vmem:[#allocation2 + $0x88] sm:$0xff] %vm5724_vm1, %v5788_v43  ;;  %7458 = vmatprep.subr.mxu1 %v6241_v32  ;;  %v6171_v32 = vld [vmem:[%s10669_s5 + $0x168] sm:$0xff]  ;;  %v6170_v43 = vld [vmem:[%s10669_s5 + $0x160] sm:$0xff] }
 0x56d   :  { %v5926_v51 = vpop.permute.xlu0 %5925  ;;  %v5991_v41 = vpop.permute.xlu1 %5990  ;;  %v6209_v3 = vld [vmem:[#allocation2 + $0x98] sm:$0xff] }
 0x56e   :  { %5931 = vst.msk [vmem:[#allocation2 + $0x8] sm:$0xff] %vm5929_vm5, %v5926_v51  ;;  %5995 = vst.msk [vmem:[#allocation2 + $0x88] sm:$0xff] %vm5929_vm5, %v5991_v41  ;;  %7378 = vmatprep.subr.mxu0 %v6209_v3  ;;  %v6175_v51 = vld [vmem:[%s10669_s5 + $0x188] sm:$0xff]  ;;  %v6168_v41 = vld [vmem:[%s10669_s5 + $0x150] sm:$0xff] }
 0x56f   :  { %v6225_v14 = vld [vmem:[#allocation2 + $0x118] sm:$0xff] }
 0x570   :  { %7459 = vmatpush3.msra.mxu1 %v6225_v14  ;;  %v6173_v3 = vld [vmem:[%s10669_s5 + $0x178] sm:$0xff]  ;;  %v6179_v14 = vld [vmem:[%s10669_s5 + $0x1a8] sm:$0xff] }
 0x571   :  { %7460 = vmatprep.subr.mxu1 %v6240_v28  ;;  %v5852_v36 = vpop.permute.xlu0 %5851  ;;  %v5916_v30 = vpop.permute.xlu1 %5915  ;;  %v6193_v63 = vld [vmem:[#allocation2 + $0x18] sm:$0xff]  ;;  %v6174_v28 = vld [vmem:[%s10669_s5 + $0x180] sm:$0xff] }
 0x572   :  { %7461 = vmatpush3.msra.mxu1 %v6224_v24  ;;  %5856 = vst.msk [vmem:[#allocation2 + $0x108] sm:$0xff] %vm5724_vm1, %v5852_v36  ;;  %5920 = vst.msk [vmem:[#allocation2 + $0x188] sm:$0xff] %vm5724_vm1, %v5916_v30  ;;  %7379 = vmatpush3.msra.mxu0 %v6193_v63  ;;  %v6172_v24 = vld [vmem:[%s10669_s5 + $0x170] sm:$0xff]  ;;  %v6177_v36 = vld [vmem:[%s10669_s5 + $0x198] sm:$0xff] }
 0x573   :  { %6061 = vst.msk [vmem:[#allocation2 + $0x108] sm:$0xff] %vm5929_vm5, %v10070_v59  ;;  %6125 = vst.msk [vmem:[#allocation2 + $0x188] sm:$0xff] %vm5929_vm5, %v10068_v12  ;;  %7380 = vmatprep.subr.mxu0 %v6208_v29  ;;  %v6126_v59 = vld [vmem:[%s10669_s5] sm:$0xff]  ;;  %v6183_v63 = vld [vmem:[%s10669_s5 + $0x1c8] sm:$0xff] }
 0x574   :  { %7381 = vmatpush3.msra.mxu0 %v6192_v23  ;;  %v6190_v12 = vld [vmem:[#allocation2] sm:$0xff]  ;;  %v6176_v29 = vld [vmem:[%s10669_s5 + $0x190] sm:$0xff]  ;;  %v6181_v23 = vld [vmem:[%s10669_s5 + $0x1b8] sm:$0xff] }
 0x575   :  { %v6055_v52 = vpop.permute.xlu0 %6054  ;;  %v6119_v16 = vpop.permute.xlu1 %6118  ;;  %v6207_v25 = vld [vmem:[#allocation2 + $0x88] sm:$0xff]  ;;  %v6178_v30 = vld [vmem:[%s10669_s5 + $0x1a0] sm:$0xff] }
 0x576   :  { %v6191_v18 = vld [vmem:[#allocation2 + $0x8] sm:$0xff]  ;;  %6060 = vst.msk [vmem:[#allocation2 + $0x100] sm:$0xff] %vm5929_vm5, %v6055_v52  ;;  %6124 = vst.msk [vmem:[#allocation2 + $0x180] sm:$0xff] %vm5929_vm5, %v6119_v16  ;;  %7382 = vmatprep.subr.mxu0 %v6207_v25  ;;  %v6182_v52 = vld [vmem:[%s10669_s5 + $0x1c0] sm:$0xff] }
 0x577   :  { %7383 = vmatpush3.msra.mxu0 %v6191_v18  ;;  %v6187_v16 = vld [vmem:[%s10669_s5 + $0x1e8] sm:$0xff]  ;;  %v6180_v25 = vld [vmem:[%s10669_s5 + $0x1b0] sm:$0xff]  ;;  %v6185_v18 = vld [vmem:[%s10669_s5 + $0x1d8] sm:$0xff] }
 0x578   :  { %7384 = vmatprep.subr.mxu0 %v6206_v13  ;;  %v6186_v13 = vld [vmem:[%s10669_s5 + $0x1e0] sm:$0xff] }
 0x579   :  { %7385 = vmatpush3.msra.mxu0 %v6190_v12  ;;  %v6189_v12 = vld [vmem:[%s10669_s5 + $0x1f8] sm:$0xff] }
 0x57a   :  { %6415 = vmatmul.mubr.f32.vlgmr.msra.gmra.mxu0 %v6126_v59  ;;  %v6239_v35 = vld [vmem:[#allocation2 + $0x188] sm:$0xff]  ;;  %v6184_v59 = vld [vmem:[%s10669_s5 + $0x1d0] sm:$0xff] }
 0x57b   :  { %v6223_v61 = vld [vmem:[#allocation2 + $0x108] sm:$0xff]  ;;  %7462 = vmatprep.subr.mxu1 %v6239_v35  ;;  %6419 = vmatprep.mubr.f32.mxu0 %v6131_v19  ;;  %v6188_v19 = vld [vmem:[%s10669_s5 + $0x1f0] sm:$0xff] }
 0x57c   :  { %7463 = vmatpush3.msra.mxu1 %v6223_v61 }
 0x57d   :  { %v6238_v31 = vld [vmem:[#allocation2 + $0x180] sm:$0xff] }
 0x57e   :  { %v6222_v22 = vld [vmem:[#allocation2 + $0x100] sm:$0xff]  ;;  %6420 = vmatmul.mubr.f32.gmra.mxu0 %v6130_v39  ;;  %7464 = vmatprep.subr.mxu1 %v6238_v31 }
 0x57f   :  { %7465 = vmatpush3.msra.mxu1 %v6222_v22  ;;  %6424 = vmatprep.mubr.f32.mxu0 %v6135_v42  ;;  %v6656_v22 = vld [vmem:[%s10673_s7] sm:$0xff] }
 0x580   :  { %6560 = vmatmul.mubr.f32.vlgmr.msra.gmra.mxu1 %v6128_v40 }
 0x581   :  { %6564 = vmatprep.mubr.f32.mxu1 %v6133_v47 }
 0x582   :  { %6425 = vmatmul.mubr.f32.gmra.mxu0 %v6134_v15  ;;  %v10405_v35 = vpop.permute.xlu0 %6342  ;;  %v10407_v61 = vpop.permute.xlu1 %6347 }
 0x583   :  { %6429 = vmatprep.mubr.f32.mxu0 %v6139_v33 }
 0x584   :  { %6565 = vmatmul.mubr.f32.gmra.mxu1 %v6132_v38 }
 0x585   :  { %6569 = vmatprep.mubr.f32.mxu1 %v6137_v62 }
 0x586   :  { %6430 = vmatmul.mubr.f32.gmra.mxu0 %v6138_v6  ;;  %v10409_v39 = vpop.permute.xlu0 %6332  ;;  %v10411_v42 = vpop.permute.xlu1 %6337 }
 0x587   :  { %6434 = vmatprep.mubr.f32.mxu0 %v6143_v48 }
 0x588   :  { %6570 = vmatmul.mubr.f32.gmra.mxu1 %v6136_v49 }
 0x589   :  { %6574 = vmatprep.mubr.f32.mxu1 %v6141_v57 }
 0x58a   :  { %6435 = vmatmul.mubr.f32.gmra.mxu0 %v6142_v54  ;;  %v10413_v31 = vpop.permute.xlu0 %6322  ;;  %v10418_v40 = vpop.permute.xlu1 %6327 }
 0x58b   :  { %6439 = vmatprep.mubr.f32.mxu0 %v6147_v10 }
 0x58c   :  { %6575 = vmatmul.mubr.f32.gmra.mxu1 %v6140_v50 }
 0x58d   :  { %6579 = vmatprep.mubr.f32.mxu1 %v6145_v0 }
 0x58e   :  { %6440 = vmatmul.mubr.f32.gmra.mxu0 %v6146_v46  ;;  %v10420_v47 = vpop.permute.xlu0 %6312  ;;  %v10422_v15 = vpop.permute.xlu1 %6317 }
 0x58f   :  { %6444 = vmatprep.mubr.f32.mxu0 %v6151_v9 }
 0x590   :  { %6580 = vmatmul.mubr.f32.gmra.mxu1 %v6144_v26 }
 0x591   :  { %6584 = vmatprep.mubr.f32.mxu1 %v6149_v58 }
 0x592   :  { %6445 = vmatmul.mubr.f32.gmra.mxu0 %v6150_v20  ;;  %v10424_v33 = vpop.permute.xlu0 %6302  ;;  %v10426_v38 = vpop.permute.xlu1 %6307 }
 0x593   :  { %6449 = vmatprep.mubr.f32.mxu0 %v6155_v27  ;;  %10760 = vst [vmem:[#allocation9_spill] sm:$0xff] %v10424_v33 }
 0x594   :  { %6585 = vmatmul.mubr.f32.gmra.mxu1 %v6148_v55 }
 0x595   :  { %6589 = vmatprep.mubr.f32.mxu1 %v6153_v4 }
 0x596   :  { %6450 = vmatmul.mubr.f32.gmra.mxu0 %v6154_v7  ;;  %v6293_v62 = vpop.permute.xlu0 %6292  ;;  %v10428_v6 = vpop.permute.xlu1 %6297 }
 0x597   :  { %6454 = vmatprep.mubr.f32.mxu0 %v6159_v37  ;;  %10761 = vst [vmem:[#allocation10_spill] sm:$0xff] %v10428_v6 }
 0x598   :  { %6590 = vmatmul.mubr.f32.gmra.mxu1 %v6152_v17 }
 0x599   :  { %6594 = vmatprep.mubr.f32.mxu1 %v6157_v60 }
 0x59a   :  { %6455 = vmatmul.mubr.f32.gmra.mxu0 %v6158_v11  ;;  %v6283_v49 = vpop.permute.xlu0 %6282  ;;  %v6288_v50 = vpop.permute.xlu1 %6287 }
 0x59b   :  { %6459 = vmatprep.mubr.f32.mxu0 %v6163_v44 }
 0x59c   :  { %6595 = vmatmul.mubr.f32.gmra.mxu1 %v6156_v2 }
 0x59d   :  { %6599 = vmatprep.mubr.f32.mxu1 %v6161_v21 }
 0x59e   :  { %6460 = vmatmul.mubr.f32.gmra.mxu0 %v6162_v34  ;;  %v6273_v9 = vpop.permute.xlu0 %6272  ;;  %v6278_v37 = vpop.permute.xlu1 %6277 }
 0x59f   :  { %6464 = vmatprep.mubr.f32.mxu0 %v6167_v56 }
 0x5a0   :  { %6600 = vmatmul.mubr.f32.gmra.mxu1 %v6160_v45 }
 0x5a1   :  { %6604 = vmatprep.mubr.f32.mxu1 %v6165_v8 }
 0x5a2   :  { %6465 = vmatmul.mubr.f32.gmra.mxu0 %v6166_v5 }
 0x5a3   :  { %6469 = vmatprep.mubr.f32.mxu0 %v6171_v32 }
 0x5a4   :  { %6605 = vmatmul.mubr.f32.gmra.mxu1 %v6164_v53 }
 0x5a5   :  { %6609 = vmatprep.mubr.f32.mxu1 %v6169_v1 }
 0x5a6   :  { %6470 = vmatmul.mubr.f32.gmra.mxu0 %v6170_v43 }
 0x5a7   :  { %6474 = vmatprep.mubr.f32.mxu0 %v6175_v51 }
 0x5a8   :  { %6610 = vmatmul.mubr.f32.gmra.mxu1 %v6168_v41 }
 0x5a9   :  { %6614 = vmatprep.mubr.f32.mxu1 %v6173_v3 }
 0x5aa   :  { %6475 = vmatmul.mubr.f32.gmra.mxu0 %v6174_v28 }
 0x5ab   :  { %6479 = vmatprep.mubr.f32.mxu0 %v6179_v14 }
 0x5ac   :  { %6615 = vmatmul.mubr.f32.gmra.mxu1 %v6172_v24 }
 0x5ad   :  { %6619 = vmatprep.mubr.f32.mxu1 %v6177_v36 }
 0x5ae   :  { %6480 = vmatmul.mubr.f32.gmra.mxu0 %v6178_v30 }
 0x5af   :  { %6484 = vmatprep.mubr.f32.mxu0 %v6183_v63 }
 0x5b0   :  { %6620 = vmatmul.mubr.f32.gmra.mxu1 %v6176_v29 }
 0x5b1   :  { %6624 = vmatprep.mubr.f32.mxu1 %v6181_v23 }
 0x5b2   :  { %6485 = vmatmul.mubr.f32.gmra.mxu0 %v6182_v52 }
 0x5b3   :  { %6489 = vmatprep.mubr.f32.mxu0 %v6187_v16 }
 0x5b4   :  { %6625 = vmatmul.mubr.f32.gmra.mxu1 %v6180_v25 }
 0x5b5   :  { %6629 = vmatprep.mubr.f32.mxu1 %v6185_v18 }
 0x5b6   :  { %6490 = vmatmul.mubr.f32.gmra.mxu0 %v6186_v13 }
 0x5b7   :  { %7610 = vmatprep.mubr.f32.mxu0 %v6656_v22 }
 0x5b8   :  { %6630 = vmatmul.mubr.f32.gmra.mxu1 %v6184_v59 }
 0x5b9   :  { %6634 = vmatprep.mubr.f32.mxu1 %v6189_v12 }
 0x5bc   :  { %6635 = vmatmul.mubr.f32.gmra.mxu1 %v6188_v19 }
 0x63a   :  { %v7386_v48 = vpop.f32.mrf.mxu0 }
 0x63c   :  { %v7387_v57 = vpop.f32.mrf.mxu0 }
 0x63d   :  { %v7388_v54 = vadd.f32 %v7387_v57, %v7386_v48 }
 0x63e   :  { %v7389_v10 = vpop.f32.mrf.mxu0 }
 0x63f   :  { %v6417_v27 = vadd.f32 %v7388_v54, %v6273_v9 }
 0x640   :  { %v7390_v0 = vpop.f32.mrf.mxu0  ;;  %v7466_v46 = vpop.f32.mrf.mxu1 }
 0x641   :  { %v7391_v26 = vadd.f32 %v7390_v0, %v7389_v10 }
 0x642   :  { %v7392_v58 = vpop.f32.mrf.mxu0  ;;  %v7467_v20 = vpop.f32.mrf.mxu1 }
 0x643   :  { %v7468_v55 = vadd.f32 %v7467_v20, %v7466_v46  ;;  %v6422_v2 = vadd.f32 %v7391_v26, %v6278_v37 }
 0x644   :  { %v7393_v4 = vpop.f32.mrf.mxu0  ;;  %v7469_v7 = vpop.f32.mrf.mxu1 }
 0x645   :  { %v10430_v17 = vadd.f32 %v7468_v55, %v6417_v27  ;;  %v7394_v60 = vadd.f32 %v7393_v4, %v7392_v58 }
 0x646   :  { %v7395_v11 = vpop.f32.mrf.mxu0  ;;  %v7470_v44 = vpop.f32.mrf.mxu1 }
 0x647   :  { %10762 = vst [vmem:[#allocation3_spill] sm:$0xff] %v10430_v17  ;;  %v7471_v21 = vadd.f32 %v7470_v44, %v7469_v7  ;;  %v6427_v53 = vadd.f32 %v7394_v60, %v6283_v49 }
 0x648   :  { %v7396_v34 = vpop.f32.mrf.mxu0  ;;  %v7472_v56 = vpop.f32.mrf.mxu1 }
 0x649   :  { %v10432_v45 = vadd.f32 %v7471_v21, %v6422_v2  ;;  %v7397_v8 = vadd.f32 %v7396_v34, %v7395_v11 }
 0x64a   :  { %v7398_v5 = vpop.f32.mrf.mxu0  ;;  %v7473_v32 = vpop.f32.mrf.mxu1 }
 0x64b   :  { %10763 = vst [vmem:[#allocation4_spill] sm:$0xff] %v10432_v45  ;;  %v7474_v1 = vadd.f32 %v7473_v32, %v7472_v56  ;;  %v6432_v24 = vadd.f32 %v7397_v8, %v6288_v50 }
 0x64c   :  { %v7399_v43 = vpop.f32.mrf.mxu0  ;;  %v7475_v51 = vpop.f32.mrf.mxu1 }
 0x64d   :  { %v10434_v41 = vadd.f32 %v7474_v1, %v6427_v53  ;;  %v7400_v3 = vadd.f32 %v7399_v43, %v7398_v5 }
 0x64e   :  { %v10436_v28 = vpop.f32.mrf.mxu0  ;;  %v7476_v14 = vpop.f32.mrf.mxu1 }
 0x64f   :  { %10764 = vst [vmem:[#allocation8_spill] sm:$0xff] %v10434_v41  ;;  %v7477_v36 = vadd.f32 %v7476_v14, %v7475_v51  ;;  %v6437_v16 = vadd.f32 %v7400_v3, %v6293_v62 }
 0x650   :  { %v10438_v30 = vpop.f32.mrf.mxu0  ;;  %v7478_v63 = vpop.f32.mrf.mxu1 }
 0x651   :  { %v10440_v29 = vadd.f32 %v7477_v36, %v6432_v24 }
 0x652   :  { %v10442_v23 = vpop.f32.mrf.mxu0  ;;  %v7479_v52 = vpop.f32.mrf.mxu1 }
 0x653   :  { %10765 = vst [vmem:[#allocation12_spill] sm:$0xff] %v10440_v29  ;;  %v7480_v25 = vadd.f32 %v7479_v52, %v7478_v63 }
 0x654   :  { %v10444_v18 = vpop.f32.mrf.mxu0  ;;  %v10446_v13 = vpop.f32.mrf.mxu1 }
 0x655   :  { %10766 = vst [vmem:[#allocation15_spill] sm:$0xff] %v10446_v13  ;;  %v10448_v59 = vadd.f32 %v7480_v25, %v6437_v16 }
 0x656   :  { %v10450_v12 = vpop.f32.mrf.mxu0  ;;  %v10452_v19 = vpop.f32.mrf.mxu1 }
 0x657   :  { %10767 = vst [vmem:[#allocation16_spill] sm:$0xff] %v10448_v59  ;;  %10768 = vst [vmem:[#allocation5_spill] sm:$0xff] %v10452_v19 }
 0x658   :  { %v10454_v22 = vpop.f32.mrf.mxu0  ;;  %v10456_v48 = vpop.f32.mrf.mxu1 }
 0x659   :  { %10769 = vst [vmem:[#allocation6_spill] sm:$0xff] %v10456_v48 }
 0x65a   :  { %v7410_v49 = vpop.f32.mrf.mxu0  ;;  %v10458_v57 = vpop.f32.mrf.mxu1 }
 0x65b   :  { %10770 = vst [vmem:[#allocation14_spill] sm:$0xff] %v10458_v57 }
 0x65c   :  { %v7411_v54 = vpop.f32.mrf.mxu0  ;;  %v10460_v62 = vpop.f32.mrf.mxu1 }
 0x65e   :  { %v7413_v10 = vpop.f32.mrf.mxu0  ;;  %v10462_v50 = vpop.f32.mrf.mxu1 }
 0x660   :  { %v7414_v0 = vpop.f32.mrf.mxu0  ;;  %v10464_v46 = vpop.f32.mrf.mxu1 }
 0x662   :  { %v7416_v9 = vpop.f32.mrf.mxu0  ;;  %v7491_v26 = vpop.f32.mrf.mxu1 }
 0x664   :  { %v7417_v58 = vpop.f32.mrf.mxu0  ;;  %v7493_v20 = vpop.f32.mrf.mxu1 }
 0x665   :  { %v7418_v48 = vadd.f32 %v7417_v58, %v7416_v9 }
 0x666   :  { %v7419_v27 = vpop.f32.mrf.mxu0  ;;  %v7494_v55 = vpop.f32.mrf.mxu1 }
 0x668   :  { %v7420_v4 = vpop.f32.mrf.mxu0  ;;  %v7496_v7 = vpop.f32.mrf.mxu1 }
 0x669   :  { %v7421_v6 = vadd.f32 %v7420_v4, %v7419_v27 }
 0x66a   :  { %v7422_v37 = vpop.f32.mrf.mxu0  ;;  %v7497_v60 = vpop.f32.mrf.mxu1 }
 0x66c   :  { %v7423_v11 = vpop.f32.mrf.mxu0  ;;  %v7499_v44 = vpop.f32.mrf.mxu1 }
 0x66d   :  { %v7424_v25 = vadd.f32 %v7423_v11, %v7422_v37  ;;  %v7415_v37 = vadd.f32 %v7414_v0, %v7413_v10  ;;  %v6472_v11 = vadd.f32 %v7421_v6, %v10418_v40  ;;  %v7492_v40 = vadd.f32 %v7491_v26, %v10464_v46  ;;  %v10774_v10 = vld [vmem:[#allocation15_spill] sm:$0xff] }
 0x66e   :  { %v7425_v2 = vpop.f32.mrf.mxu0  ;;  %v7500_v21 = vpop.f32.mrf.mxu1 }
 0x670   :  { %v7426_v34 = vpop.f32.mrf.mxu0  ;;  %v7502_v56 = vpop.f32.mrf.mxu1 }
 0x671   :  { %v7427_v52 = vadd.f32 %v7426_v34, %v7425_v2 }
 0x672   :  { %v7428_v8 = vpop.f32.mrf.mxu0  ;;  %v7503_v5 = vpop.f32.mrf.mxu1 }
 0x673   :  { %v6482_v19 = vadd.f32 %v7427_v52, %v10411_v42  ;;  %v7504_v13 = vadd.f32 %v7503_v5, %v7502_v56  ;;  %v6467_v42 = vadd.f32 %v7418_v48, %v10413_v31  ;;  %v10780_v56 = vld [vmem:[#allocation4_spill] sm:$0xff]  ;;  %v6662_v52 = vld [vmem:[%s10673_s7 + $0x30] sm:$0xff] }
 0x674   :  { %v7429_v32 = vpop.f32.mrf.mxu0  ;;  %v7505_v53 = vpop.f32.mrf.mxu1  ;;  %v6641_v5 = vmax.f32 %v10780_v56, 0.0 }
 0x675   :  { %v7430_v24 = vadd.f32 %v7429_v32, %v7428_v8  ;;  %v6477_v8 = vadd.f32 %v7424_v25, %v10409_v39  ;;  %v7501_v32 = vadd.f32 %v7500_v21, %v7499_v44  ;;  %v7409_v39 = vadd.f32 %v10454_v22, %v10450_v12  ;;  %v10771_v22 = vld [vmem:[#allocation6_spill] sm:$0xff]  ;;  %v10779_v44 = vld [vmem:[#allocation8_spill] sm:$0xff]  ;;  %v6664_v25 = vld [vmem:[%s10673_s7 + $0x40] sm:$0xff] }
 0x676   :  { %v7431_v1 = vpop.f32.mrf.mxu0  ;;  %v7506_v43 = vpop.f32.mrf.mxu1  ;;  %v6642_v21 = vmax.f32 %v10779_v44, 0.0 }
 0x677   :  { %v6487_v45 = vadd.f32 %v7430_v24, %v10405_v35  ;;  %v7507_v41 = vadd.f32 %v7506_v43, %v7505_v53  ;;  %v7498_v35 = vadd.f32 %v7497_v60, %v7496_v7  ;;  %v6622_v53 = vadd.f32 %v7504_v13, %v6477_v8  ;;  %v10778_v7 = vld [vmem:[#allocation12_spill] sm:$0xff]  ;;  %v10781_v43 = vld [vmem:[#allocation3_spill] sm:$0xff]  ;;  %v6659_v24 = vld [vmem:[%s10673_s7 + $0x18] sm:$0xff] }
 0x678   :  { %v7432_v51 = vpop.f32.mrf.mxu0  ;;  %v7508_v3 = vpop.f32.mrf.mxu1  ;;  %v6452_v12 = vadd.f32 %v7409_v39, %v10426_v38  ;;  %v6643_v60 = vmax.f32 %v10778_v7, 0.0  ;;  %v6665_v8 = vld [vmem:[%s10673_s7 + $0x48] sm:$0xff] }
 0x679   :  { %v7433_v36 = vadd.f32 %v7432_v51, %v7431_v1  ;;  %v6627_v2 = vadd.f32 %v7507_v41, %v6482_v19  ;;  %v6462_v41 = vadd.f32 %v7415_v37, %v10422_v15  ;;  %v6612_v6 = vadd.f32 %v7498_v35, %v6467_v42  ;;  %v6669_v37 = vld [vmem:[%s10673_s7 + $0x68] sm:$0xff]  ;;  %v6671_v35 = vld [vmem:[%s10673_s7 + $0x78] sm:$0xff]  ;;  %v6766_v39 = vpop.permute.xlu1 %6765 }
 0x67a   :  { %v7509_v14 = vpop.f32.mrf.mxu1  ;;  %v6652_v13 = vmax.f32 %v6622_v53, 0.0  ;;  %v7403_v15 = vadd.f32 %v10438_v30, %v10436_v28  ;;  %v10776_v28 = vld [vmem:[#allocation10_spill] sm:$0xff]  ;;  %v6640_v51 = vmax.f32 %v10781_v43, 0.0  ;;  %v6929_v53 = vld [vmem:[%s10674_s9] sm:$0xff] }
 0x67b   :  { %v7510_v16 = vadd.f32 %v7509_v14, %v7508_v3  ;;  %v6492_v29 = vadd.f32 %v7433_v36, %v10407_v61  ;;  %v7412_v61 = vadd.f32 %v7411_v54, %v7410_v49  ;;  %v10772_v49 = vld [vmem:[#allocation14_spill] sm:$0xff]  ;;  %v6657_v3 = vld [vmem:[%s10673_s7 + $0x8] sm:$0xff]  ;;  %v6658_v14 = vld [vmem:[%s10673_s7 + $0x10] sm:$0xff]  ;;  %7666 = vmatprep.mubr.f32.mxu1 %v6929_v53 }
 0x67c   :  { %v7511_v63 = vpop.f32.mrf.mxu1  ;;  %v6442_v30 = vadd.f32 %v7403_v15, %v10776_v28  ;;  %v6660_v36 = vld [vmem:[%s10673_s7 + $0x20] sm:$0xff] }
 0x67d   :  { %v6632_v33 = vadd.f32 %v7510_v16, %v6487_v45  ;;  %v6617_v45 = vadd.f32 %v7501_v32, %v6472_v11  ;;  %v6457_v31 = vadd.f32 %v7412_v61, %v10420_v47  ;;  %v10773_v47 = vld [vmem:[#allocation9_spill] sm:$0xff]  ;;  %v6663_v16 = vld [vmem:[%s10673_s7 + $0x38] sm:$0xff] }
 0x67e   :  { %v7512_v17 = vpop.f32.mrf.mxu1  ;;  %v6666_v32 = vld [vmem:[%s10673_s7 + $0x50] sm:$0xff] }
 0x67f   :  { %v7513_v59 = vadd.f32 %v7512_v17, %v7511_v63  ;;  %v6654_v1 = vmax.f32 %v6632_v33, 0.0  ;;  %v7495_v17 = vadd.f32 %v7494_v55, %v7493_v20  ;;  %v7406_v33 = vadd.f32 %v10444_v18, %v10442_v23  ;;  %v10777_v55 = vld [vmem:[#allocation16_spill] sm:$0xff]  ;;  %v6670_v11 = vld [vmem:[%s10673_s7 + $0x70] sm:$0xff] }
 0x680   :  { %v6651_v48 = vmax.f32 %v6617_v45, 0.0  ;;  %v6602_v54 = vadd.f32 %v7492_v40, %v6457_v31  ;;  %v6650_v23 = vmax.f32 %v6612_v6, 0.0  ;;  %v6644_v4 = vmax.f32 %v10777_v55, 0.0  ;;  %v6661_v63 = vld [vmem:[%s10673_s7 + $0x28] sm:$0xff]  ;;  %v6761_v40 = vpop.permute.xlu0 %6760 }
 0x681   :  { %v6637_v57 = vadd.f32 %v7513_v59, %v6492_v29  ;;  %v6653_v29 = vmax.f32 %v6627_v2, 0.0  ;;  %v7489_v59 = vadd.f32 %v10462_v50, %v10460_v62  ;;  %v6607_v19 = vadd.f32 %v7495_v17, %v6462_v41  ;;  %v10775_v62 = vld [vmem:[#allocation5_spill] sm:$0xff]  ;;  %v6667_v2 = vld [vmem:[%s10673_s7 + $0x58] sm:$0xff] }
 0x682   :  { %v6447_v18 = vadd.f32 %v7406_v33, %v10773_v47  ;;  %v7483_v50 = vadd.f32 %v10775_v62, %v10774_v10  ;;  %v6648_v38 = vmax.f32 %v6602_v54, 0.0  ;;  %v6756_v33 = vpop.permute.xlu1 %6755 }
 0x683   :  { %v6655_v34 = vmax.f32 %v6637_v57, 0.0  ;;  %v7486_v57 = vadd.f32 %v10772_v49, %v10771_v22  ;;  %v6597_v0 = vadd.f32 %v7489_v59, %v6452_v12  ;;  %v6649_v46 = vmax.f32 %v6607_v19, 0.0 }
 0x684   :  { %v6587_v26 = vadd.f32 %v7483_v50, %v6442_v30  ;;  %v6751_v59 = vpop.permute.xlu0 %6750 }
 0x685   :  { %7578 = vmatprep.subr.mxu0 %v6655_v34  ;;  %v6592_v9 = vadd.f32 %v7486_v57, %v6447_v18  ;;  %v6647_v58 = vmax.f32 %v6597_v0, 0.0 }
 0x686   :  { %7579 = vmatpush3.msra.mxu0 %v6655_v34  ;;  %v6645_v27 = vmax.f32 %v6587_v26, 0.0  ;;  %v6668_v34 = vld [vmem:[%s10673_s7 + $0x60] sm:$0xff]  ;;  %v6746_v15 = vpop.permute.xlu1 %6745 }
 0x687   :  { %7580 = vmatprep.subr.mxu0 %v6654_v1  ;;  %v6646_v20 = vmax.f32 %v6592_v9, 0.0 }
 0x688   :  { %7581 = vmatpush3.msra.mxu0 %v6654_v1  ;;  %v6741_v22 = vpop.permute.xlu0 %6740 }
 0x689   :  { %7582 = vmatprep.subr.mxu0 %v6653_v29 }
 0x68a   :  { %7583 = vmatpush3.msra.mxu0 %v6653_v29 }
 0x68b   :  { %7584 = vmatprep.subr.mxu0 %v6652_v13 }
 0x68c   :  { %7585 = vmatpush3.msra.mxu0 %v6652_v13  ;;  %v6731_v50 = vpop.permute.xlu0 %6730 }
 0x68d   :  { %7586 = vmatprep.subr.mxu0 %v6651_v48 }
 0x68e   :  { %7587 = vmatpush3.msra.mxu0 %v6651_v48 }
 0x68f   :  { %7588 = vmatprep.subr.mxu0 %v6650_v23 }
 0x690   :  { %7589 = vmatpush3.msra.mxu0 %v6650_v23  ;;  %v6736_v23 = vpop.permute.xlu1 %6735 }
 0x691   :  { %7590 = vmatprep.subr.mxu0 %v6649_v46 }
 0x692   :  { %7591 = vmatpush3.msra.mxu0 %v6649_v46 }
 0x693   :  { %7592 = vmatprep.subr.mxu0 %v6648_v38 }
 0x694   :  { %7593 = vmatpush3.msra.mxu0 %v6648_v38  ;;  %v6726_v9 = vpop.permute.xlu1 %6725 }
 0x695   :  { %7594 = vmatprep.subr.mxu0 %v6647_v58 }
 0x696   :  { %7595 = vmatpush3.msra.mxu0 %v6647_v58  ;;  %v6721_v58 = vpop.permute.xlu0 %6720 }
 0x697   :  { %7596 = vmatprep.subr.mxu0 %v6646_v20 }
 0x698   :  { %7597 = vmatpush3.msra.mxu0 %v6646_v20  ;;  %v6716_v7 = vpop.permute.xlu1 %6715 }
 0x699   :  { %7598 = vmatprep.subr.mxu0 %v6645_v27 }
 0x69a   :  { %7599 = vmatpush3.msra.mxu0 %v6645_v27 }
 0x69b   :  { %7600 = vmatprep.subr.mxu0 %v6644_v4 }
 0x69c   :  { %7601 = vmatpush3.msra.mxu0 %v6644_v4 }
 0x69d   :  { %7602 = vmatprep.subr.mxu0 %v6643_v60 }
 0x69e   :  { %7603 = vmatpush3.msra.mxu0 %v6643_v60 }
 0x69f   :  { %7604 = vmatprep.subr.mxu0 %v6642_v21 }
 0x6a0   :  { %7605 = vmatpush3.msra.mxu0 %v6642_v21  ;;  %v6711_v21 = vpop.permute.xlu0 %6710 }
 0x6a1   :  { %7606 = vmatprep.subr.mxu0 %v6641_v5 }
 0x6a2   :  { %7607 = vmatpush3.msra.mxu0 %v6641_v5 }
 0x6a3   :  { %7608 = vmatprep.subr.mxu0 %v6640_v51 }
 0x6a4   :  { %7609 = vmatpush3.msra.mxu0 %v6640_v51 }
 0x6a5   :  { %7611 = vmatmul.mubr.f32.vlgmr.msra.gmra.mxu0 %v6657_v3  ;;  %v6706_v3 = vpop.permute.xlu1 %6705 }
 0x6a6   :  { %7613 = vmatprep.mubr.f32.mxu0 %v6658_v14 }
 0x6a9   :  { %7614 = vmatmul.mubr.f32.gmra.mxu0 %v6659_v24 }
 0x6aa   :  { %7616 = vmatprep.mubr.f32.mxu0 %v6660_v36  ;;  %v6701_v36 = vpop.permute.xlu0 %6700 }
 0x6ad   :  { %7617 = vmatmul.mubr.f32.gmra.mxu0 %v6661_v63 }
 0x6ae   :  { %7619 = vmatprep.mubr.f32.mxu0 %v6662_v52 }
 0x6b1   :  { %7620 = vmatmul.mubr.f32.gmra.mxu0 %v6663_v16 }
 0x6b2   :  { %7622 = vmatprep.mubr.f32.mxu0 %v6664_v25 }
 0x6b5   :  { %7623 = vmatmul.mubr.f32.gmra.mxu0 %v6665_v8  ;;  %v6696_v8 = vpop.permute.xlu1 %6695 }
 0x6b6   :  { %7625 = vmatprep.mubr.f32.mxu0 %v6666_v32 }
 0x6b9   :  { %7626 = vmatmul.mubr.f32.gmra.mxu0 %v6667_v2 }
 0x6ba   :  { %7628 = vmatprep.mubr.f32.mxu0 %v6668_v34  ;;  %v6691_v34 = vpop.permute.xlu0 %6690 }
 0x6bd   :  { %7629 = vmatmul.mubr.f32.gmra.mxu0 %v6669_v37 }
 0x6be   :  { %7631 = vmatprep.mubr.f32.mxu0 %v6670_v11 }
 0x6c1   :  { %7632 = vmatmul.mubr.f32.gmra.mxu0 %v6671_v35 }
 0x765   :  { %v10543_v1 = vpop.f32.mrf.mxu0 }
 0x766   :  { %v6840_v32 = vadd.f32 %v10543_v1, %v6696_v8  ;;  %v6931_v1 = vld [vmem:[%s10674_s9 + $0x10] sm:$0xff] }
 0x767   :  { %v10545_v61 = vpop.f32.mrf.mxu0 }
 0x768   :  { %v6835_v37 = vadd.f32 %v10545_v61, %v6691_v34  ;;  %v6914_v35 = vmax.f32 %v6840_v32, 0.0  ;;  %v6932_v61 = vld [vmem:[%s10674_s9 + $0x18] sm:$0xff] }
 0x769   :  { %v10547_v42 = vpop.f32.mrf.mxu0 }
 0x76a   :  { %v6850_v63 = vadd.f32 %v10547_v42, %v6706_v3  ;;  %v6913_v53 = vmax.f32 %v6835_v37, 0.0  ;;  %v6930_v42 = vld [vmem:[%s10674_s9 + $0x8] sm:$0xff] }
 0x76b   :  { %v10549_v17 = vpop.f32.mrf.mxu0 }
 0x76c   :  { %v6845_v16 = vadd.f32 %v10549_v17, %v6701_v36  ;;  %v6916_v2 = vmax.f32 %v6850_v63, 0.0  ;;  %v6933_v17 = vld [vmem:[%s10674_s9 + $0x20] sm:$0xff] }
 0x76d   :  { %v7618_v45 = vpop.f32.mrf.mxu0 }
 0x76e   :  { %v6860_v43 = vadd.f32 %v7618_v45, %v6716_v7  ;;  %v6915_v11 = vmax.f32 %v6845_v16, 0.0  ;;  %v6934_v45 = vld [vmem:[%s10674_s9 + $0x28] sm:$0xff] }
 0x76f   :  { %v6854_v29 = vpop.f32.mrf.mxu0 }
 0x770   :  { %v6855_v14 = vadd.f32 %v6854_v29, %v6711_v21  ;;  %v6918_v52 = vmax.f32 %v6860_v43, 0.0  ;;  %v6935_v29 = vld [vmem:[%s10674_s9 + $0x30] sm:$0xff] }
 0x771   :  { %v7621_v41 = vpop.f32.mrf.mxu0 }
 0x772   :  { %v6870_v60 = vadd.f32 %v7621_v41, %v6726_v9  ;;  %v6917_v25 = vmax.f32 %v6855_v14, 0.0  ;;  %v6937_v41 = vld [vmem:[%s10674_s9 + $0x40] sm:$0xff] }
 0x773   :  { %v6864_v6 = vpop.f32.mrf.mxu0 }
 0x774   :  { %v6865_v56 = vadd.f32 %v6864_v6, %v6721_v58  ;;  %v6920_v51 = vmax.f32 %v6870_v60, 0.0  ;;  %v6939_v6 = vld [vmem:[%s10674_s9 + $0x50] sm:$0xff] }
 0x775   :  { %v7624_v13 = vpop.f32.mrf.mxu0 }
 0x776   :  { %v6880_v20 = vadd.f32 %v7624_v13, %v6736_v23  ;;  %v6919_v24 = vmax.f32 %v6865_v56, 0.0  ;;  %v6940_v13 = vld [vmem:[%s10674_s9 + $0x58] sm:$0xff] }
 0x777   :  { %v6874_v31 = vpop.f32.mrf.mxu0 }
 0x778   :  { %v6875_v55 = vadd.f32 %v6874_v31, %v6731_v50  ;;  %v6922_v44 = vmax.f32 %v6880_v20, 0.0  ;;  %v6942_v31 = vld [vmem:[%s10674_s9 + $0x68] sm:$0xff] }
 0x779   :  { %v7627_v19 = vpop.f32.mrf.mxu0 }
 0x77a   :  { %v6890_v28 = vadd.f32 %v7627_v19, %v6746_v15  ;;  %v6921_v5 = vmax.f32 %v6875_v55, 0.0  ;;  %v6944_v19 = vld [vmem:[%s10674_s9 + $0x78] sm:$0xff]  ;;  %v6964_v15 = vpop.permute.xlu1 %6963 }
 0x77b   :  { %v6884_v48 = vpop.f32.mrf.mxu0 }
 0x77c   :  { %v6885_v38 = vadd.f32 %v6884_v48, %v6741_v22  ;;  %v6924_v27 = vmax.f32 %v6890_v28, 0.0  ;;  %v6969_v48 = vpop.permute.xlu0 %6968 }
 0x77d   :  { %v7630_v12 = vpop.f32.mrf.mxu0 }
 0x77e   :  { %v6900_v18 = vadd.f32 %v7630_v12, %v6756_v33  ;;  %v6923_v4 = vmax.f32 %v6885_v38, 0.0  ;;  %v6941_v33 = vld [vmem:[%s10674_s9 + $0x60] sm:$0xff]  ;;  %v6974_v22 = vpop.permute.xlu1 %6973 }
 0x77f   :  { %v6894_v49 = vpop.f32.mrf.mxu0 }
 0x780   :  { %v6895_v0 = vadd.f32 %v6894_v49, %v6751_v59  ;;  %v6926_v30 = vmax.f32 %v6900_v18, 0.0  ;;  %v6943_v59 = vld [vmem:[%s10674_s9 + $0x70] sm:$0xff]  ;;  %v6979_v12 = vpop.permute.xlu0 %6978 }
 0x781   :  { %v7633_v57 = vpop.f32.mrf.mxu0 }
 0x782   :  { %v6910_v54 = vadd.f32 %v7633_v57, %v6766_v39  ;;  %v6925_v26 = vmax.f32 %v6895_v0, 0.0  ;;  %v6936_v39 = vld [vmem:[%s10674_s9 + $0x38] sm:$0xff]  ;;  %v6984_v57 = vpop.permute.xlu1 %6983 }
 0x783   :  { %v6904_v47 = vpop.f32.mrf.mxu0 }
 0x784   :  { %v6928_v10 = vmax.f32 %v6910_v54, 0.0  ;;  %v6905_v62 = vadd.f32 %v6904_v47, %v6761_v40  ;;  %v6938_v40 = vld [vmem:[%s10674_s9 + $0x48] sm:$0xff]  ;;  %v6989_v49 = vpop.permute.xlu0 %6988 }
 0x786   :  { %v6927_v46 = vmax.f32 %v6905_v62, 0.0  ;;  %7634 = vmatprep.subr.mxu1 %v6928_v10  ;;  %v6994_v0 = vpop.permute.xlu1 %6993 }
 0x787   :  { %7635 = vmatpush3.msra.mxu1 %v6928_v10 }
 0x788   :  { %7636 = vmatprep.subr.mxu1 %v6927_v46  ;;  %v6999_v10 = vpop.permute.xlu0 %6998 }
 0x789   :  { %7637 = vmatpush3.msra.mxu1 %v6927_v46 }
 0x78a   :  { %7638 = vmatprep.subr.mxu1 %v6926_v30  ;;  %v7004_v20 = vpop.permute.xlu1 %7003 }
 0x78b   :  { %7639 = vmatpush3.msra.mxu1 %v6926_v30 }
 0x78c   :  { %7640 = vmatprep.subr.mxu1 %v6925_v26  ;;  %v7009_v38 = vpop.permute.xlu0 %7008 }
 0x78d   :  { %7641 = vmatpush3.msra.mxu1 %v6925_v26 }
 0x78e   :  { %7642 = vmatprep.subr.mxu1 %v6924_v27  ;;  %v7014_v56 = vpop.permute.xlu1 %7013 }
 0x78f   :  { %7643 = vmatpush3.msra.mxu1 %v6924_v27 }
 0x790   :  { %7644 = vmatprep.subr.mxu1 %v6923_v4  ;;  %v7019_v60 = vpop.permute.xlu0 %7018 }
 0x791   :  { %7645 = vmatpush3.msra.mxu1 %v6923_v4 }
 0x792   :  { %7646 = vmatprep.subr.mxu1 %v6922_v44  ;;  %v7024_v63 = vpop.permute.xlu1 %7023 }
 0x793   :  { %7647 = vmatpush3.msra.mxu1 %v6922_v44 }
 0x794   :  { %7648 = vmatprep.subr.mxu1 %v6921_v5  ;;  %v7029_v14 = vpop.permute.xlu0 %7028 }
 0x795   :  { %7649 = vmatpush3.msra.mxu1 %v6921_v5 }
 0x796   :  { %7650 = vmatprep.subr.mxu1 %v6920_v51  ;;  %v7034_v37 = vpop.permute.xlu1 %7033 }
 0x797   :  { %7651 = vmatpush3.msra.mxu1 %v6920_v51 }
 0x798   :  { %7652 = vmatprep.subr.mxu1 %v6919_v24  ;;  %v7039_v32 = vpop.permute.xlu0 %7038 }
 0x799   :  { %7653 = vmatpush3.msra.mxu1 %v6919_v24 }
 0x79a   :  { %7654 = vmatprep.subr.mxu1 %v6918_v52 }
 0x79b   :  { %7655 = vmatpush3.msra.mxu1 %v6918_v52 }
 0x79c   :  { %7656 = vmatprep.subr.mxu1 %v6917_v25 }
 0x79d   :  { %7657 = vmatpush3.msra.mxu1 %v6917_v25 }
 0x79e   :  { %7658 = vmatprep.subr.mxu1 %v6916_v2 }
 0x79f   :  { %7659 = vmatpush3.msra.mxu1 %v6916_v2 }
 0x7a0   :  { %7660 = vmatprep.subr.mxu1 %v6915_v11 }
 0x7a1   :  { %7661 = vmatpush3.msra.mxu1 %v6915_v11 }
 0x7a2   :  { %7662 = vmatprep.subr.mxu1 %v6914_v35 }
 0x7a3   :  { %7663 = vmatpush3.msra.mxu1 %v6914_v35 }
 0x7a4   :  { %7664 = vmatprep.subr.mxu1 %v6913_v53 }
 0x7a5   :  { %7665 = vmatpush3.msra.mxu1 %v6913_v53 }
 0x7a6   :  { %7667 = vmatmul.mubr.f32.vlgmr.msra.gmra.mxu1 %v6930_v42 }
 0x7a7   :  { %7669 = vmatprep.mubr.f32.mxu1 %v6931_v1 }
 0x7aa   :  { %7670 = vmatmul.mubr.f32.gmra.mxu1 %v6932_v61 }
 0x7ab   :  { %7672 = vmatprep.mubr.f32.mxu1 %v6933_v17 }
 0x7ae   :  { %7673 = vmatmul.mubr.f32.gmra.mxu1 %v6934_v45 }
 0x7af   :  { %7675 = vmatprep.mubr.f32.mxu1 %v6935_v29 }
 0x7b2   :  { %7676 = vmatmul.mubr.f32.gmra.mxu1 %v6936_v39 }
 0x7b3   :  { %7678 = vmatprep.mubr.f32.mxu1 %v6937_v41 }
 0x7b6   :  { %7679 = vmatmul.mubr.f32.gmra.mxu1 %v6938_v40 }
 0x7b7   :  { %7681 = vmatprep.mubr.f32.mxu1 %v6939_v6 }
 0x7ba   :  { %7682 = vmatmul.mubr.f32.gmra.mxu1 %v6940_v13 }
 0x7bb   :  { %7684 = vmatprep.mubr.f32.mxu1 %v6941_v33 }
 0x7be   :  { %7685 = vmatmul.mubr.f32.gmra.mxu1 %v6942_v31 }
 0x7bf   :  { %7687 = vmatprep.mubr.f32.mxu1 %v6943_v59 }
 0x7c2   :  { %7688 = vmatmul.mubr.f32.gmra.mxu1 %v6944_v19 }
 0x866   :  { %v7668_v54 = vpop.f32.mrf.mxu1 }
 0x867   :  { %v7113_v23 = vadd.f32 %v7668_v54, %v6969_v48 }
 0x868   :  { %v7107_v47 = vpop.f32.mrf.mxu1 }
 0x869   :  { %7187 = vst.msk [vmem:[%s10675_s11 + $0x8] sm:$0xff] %vm922_vm0, %v7113_v23  ;;  %v7108_v18 = vadd.f32 %v7107_v47, %v6964_v15 }
 0x86a   :  { %v7671_v62 = vpop.f32.mrf.mxu1 }
 0x86b   :  { %7186 = vst.msk [vmem:[%s10675_s11] sm:$0xff] %vm922_vm0, %v7108_v18  ;;  %v7123_v50 = vadd.f32 %v7671_v62, %v6979_v12 }
 0x86c   :  { %v7117_v46 = vpop.f32.mrf.mxu1 }
 0x86d   :  { %7189 = vst.msk [vmem:[%s10675_s11 + $0x18] sm:$0xff] %vm922_vm0, %v7123_v50  ;;  %v7118_v28 = vadd.f32 %v7117_v46, %v6974_v22 }
 0x86e   :  { %v7674_v30 = vpop.f32.mrf.mxu1 }
 0x86f   :  { %7188 = vst.msk [vmem:[%s10675_s11 + $0x10] sm:$0xff] %vm922_vm0, %v7118_v28  ;;  %v7133_v9 = vadd.f32 %v7674_v30, %v6989_v49 }
 0x870   :  { %v7127_v26 = vpop.f32.mrf.mxu1 }
 0x871   :  { %7191 = vst.msk [vmem:[%s10675_s11 + $0x28] sm:$0xff] %vm922_vm0, %v7133_v9  ;;  %v7128_v58 = vadd.f32 %v7127_v26, %v6984_v57 }
 0x872   :  { %v7677_v27 = vpop.f32.mrf.mxu1 }
 0x873   :  { %7190 = vst.msk [vmem:[%s10675_s11 + $0x20] sm:$0xff] %vm922_vm0, %v7128_v58  ;;  %v7143_v55 = vadd.f32 %v7677_v27, %v6999_v10 }
 0x874   :  { %v7137_v4 = vpop.f32.mrf.mxu1 }
 0x875   :  { %7193 = vst.msk [vmem:[%s10675_s11 + $0x38] sm:$0xff] %vm922_vm0, %v7143_v55  ;;  %v7138_v7 = vadd.f32 %v7137_v4, %v6994_v0 }
 0x876   :  { %v7680_v44 = vpop.f32.mrf.mxu1 }
 0x877   :  { %7192 = vst.msk [vmem:[%s10675_s11 + $0x30] sm:$0xff] %vm922_vm0, %v7138_v7  ;;  %v7153_v21 = vadd.f32 %v7680_v44, %v7009_v38 }
 0x878   :  { %v7147_v5 = vpop.f32.mrf.mxu1 }
 0x879   :  { %7195 = vst.msk [vmem:[%s10675_s11 + $0x48] sm:$0xff] %vm922_vm0, %v7153_v21  ;;  %v7148_v43 = vadd.f32 %v7147_v5, %v7004_v20 }
 0x87a   :  { %v7683_v51 = vpop.f32.mrf.mxu1 }
 0x87b   :  { %7194 = vst.msk [vmem:[%s10675_s11 + $0x40] sm:$0xff] %vm922_vm0, %v7148_v43  ;;  %v7163_v3 = vadd.f32 %v7683_v51, %v7019_v60 }
 0x87c   :  { %v7157_v24 = vpop.f32.mrf.mxu1 }
 0x87d   :  { %7197 = vst.msk [vmem:[%s10675_s11 + $0x58] sm:$0xff] %vm922_vm0, %v7163_v3  ;;  %v7158_v36 = vadd.f32 %v7157_v24, %v7014_v56 }
 0x87e   :  { %v7686_v52 = vpop.f32.mrf.mxu1 }
 0x87f   :  { %7196 = vst.msk [vmem:[%s10675_s11 + $0x50] sm:$0xff] %vm922_vm0, %v7158_v36  ;;  %v7173_v16 = vadd.f32 %v7686_v52, %v7029_v14 }
 0x880   :  { %v7167_v25 = vpop.f32.mrf.mxu1 }
 0x881   :  { %7199 = vst.msk [vmem:[%s10675_s11 + $0x68] sm:$0xff] %vm922_vm0, %v7173_v16  ;;  %v7168_v8 = vadd.f32 %v7167_v25, %v7024_v63 }
 0x882   :  { %v7689_v2 = vpop.f32.mrf.mxu1 }
 0x883   :  { %7198 = vst.msk [vmem:[%s10675_s11 + $0x60] sm:$0xff] %vm922_vm0, %v7168_v8  ;;  %v7183_v34 = vadd.f32 %v7689_v2, %v7039_v32 }
 0x884   :  { %v7177_v11 = vpop.f32.mrf.mxu1 }
 0x885   :  { %7201 = vst.msk [vmem:[%s10675_s11 + $0x78] sm:$0xff] %vm922_vm0, %v7183_v34  ;;  %v7178_v35 = vadd.f32 %v7177_v11, %v7034_v37 }
 0x887   :  { %7200 = vst.msk [vmem:[%s10675_s11 + $0x70] sm:$0xff] %vm922_vm0, %v7178_v35 }

</bundles_post_ra>
